<compile_context>
chip_gen: v7x
topology: tpu7x:2x2x1
jax: 0.10.0
libtpu: 0.0.40
codegen_flags: <defaults>
</compile_context>

<pallas_src>
import math

import jax
import jax.numpy as jnp
from jax import lax
from jax.experimental import pallas as pl
from jax.experimental.pallas import tpu as pltpu

F_DIM = 512    # hardcoded by the module (view(-1, 1, 512), LayerNorm([1, 512]))
LN_EPS = 1e-5  # PyTorch nn.LayerNorm default


# --------------------------------------------------------------------------- #
# Kernel
# --------------------------------------------------------------------------- #
def nlblock_kernel(st_ref, lt_ref,
                   w1_ref, b1_ref, w2_ref, w3_ref, b3_ref,
                   w4_ref, b4_ref, g_ref, beta_ref, out_ref):
    F = F_DIM
    T = lt_ref.shape[1] // F

    st = st_ref[...]                                              # (bb, F) f32

    # s1 = scale * (St @ W1^T + b1); the softmax scale is folded into W1/b1.
    # bf16 MXU inputs, f32 accumulation.
    s1 = jnp.dot(st.astype(jnp.bfloat16), w1_ref[...],
                 preferred_element_type=jnp.float32) + b1_ref[...]
    # W2 hoist: q = s1 @ W2 (one matmul for ALL timesteps).
    q = jnp.dot(s1.astype(jnp.bfloat16), w2_ref[...],
                preferred_element_type=jnp.float32)               # (bb, F) f32

    # ---- Phase A: attention logits via VPU multiply + lane reduce, exact
    # softmax over the T per-timestep columns (only (bb,1) columns stay live).
    cols = []
    for t in range(T):
        lt_t = lt_ref[:, t * F:(t + 1) * F]                       # (bb, F) f32
        cols.append(jnp.sum(q * lt_t, axis=-1, keepdims=True))    # (bb, 1)
    m = cols[0]
    for t in range(1, T):
        m = jnp.maximum(m, cols[t])
    e = [jnp.exp(c - m) for c in cols]
    denom = e[0]
    for t in range(1, T):
        denom = denom + e[t]
    inv = 1.0 / denom
    p = [et * inv for et in e]                                    # T x (bb, 1)

    # ---- Phase B: z = sum_t p_t * (Lt_t @ W3^T) + b3 (b3 hoisted, sum p = 1).
    # One f32 accumulator; each (bb, F) matmul result is consumed immediately.
    w3 = w3_ref[...]
    z = p[0] * jnp.dot(lt_ref[:, 0:F].astype(jnp.bfloat16), w3,
                       preferred_element_type=jnp.float32)
    for t in range(1, T):
        lt_bf = lt_ref[:, t * F:(t + 1) * F].astype(jnp.bfloat16)
        z = z + p[t] * jnp.dot(lt_bf, w3, preferred_element_type=jnp.float32)
    z = z + b3_ref[...]

    # LayerNorm([1, 512]) == LayerNorm over the 512 features.
    mean = jnp.mean(z, axis=-1, keepdims=True)
    var = jnp.mean(jnp.square(z - mean), axis=-1, keepdims=True)
    zn = (z - mean) * lax.rsqrt(var + LN_EPS) * g_ref[...] + beta_ref[...]

    # ReLU -> linear4 -> (dropout: eval-mode identity) -> residual add.
    zn = jnp.maximum(zn, 0.0)
    out = jnp.dot(zn.astype(jnp.bfloat16), w4_ref[...],
                  preferred_element_type=jnp.float32) + b4_ref[...]
    # TODO(synk): nn.Dropout(0.2) is stochastic in train mode; eval-mode identity here.
    out_ref[...] = st + out


# --------------------------------------------------------------------------- #
# Parameter packing / wrapper
# --------------------------------------------------------------------------- #
def _pack_params(params):
    """Fold the (1/512)^0.5 scale into W1/b1, build the hoisted W2, cast MXU
    weights to bf16.  b2 is dropped (its logit contribution cancels in softmax)."""
    (w1t, b1, w2t, b2, w3t, b3, w4t, b4, gamma, beta) = params
    del b2
    scale = (1.0 / 512.0) ** 0.5
    w1s = (w1t * scale).astype(jnp.bfloat16)          # (F, F)
    b1s = b1 * scale                                  # (1, F) f32
    w2h = jnp.transpose(w2t).astype(jnp.bfloat16)     # (F, F): q = s1 @ w2h
    return (w1s, b1s, w2h,
            w3t.astype(jnp.bfloat16), b3,
            w4t.astype(jnp.bfloat16), b4, gamma, beta)


def _choose_batch_tile(B, block_b):
    """Pick (bb, padded_B): bb a multiple of 8 that divides padded_B and is
    <= block_b.  Never collapses a large batch to a single grid step."""
    Bp = ((B + 7) // 8) * 8
    bb = max(8, min((block_b // 8) * 8, Bp))
    if Bp % bb != 0:
        d = next((d for d in range(bb, 7, -8) if Bp % d == 0), None)
        if d is not None:
            bb = d
        else:
            Bp = ((Bp + bb - 1) // bb) * bb
    # v7x megacore: keep >= 2 grid steps when possible so both TCs get work.
    if Bp // bb == 1 and bb > 8 and (bb // 2) % 8 == 0:
        bb //= 2
    return bb, Bp


def nlblock_forward(St, Lt, params, block_b=256):
    """St: (B, 512) f32, Lt: (B, T, 512) f32.  block_b: batch tile
    (256 for v6e/v7x MXU width, 128 is plenty on v5e)."""
    B, F = St.shape
    _, T, _ = Lt.shape
    assert F == F_DIM and T >= 1

    bb, Bp = _choose_batch_tile(B, block_b)
    grid = (Bp // bb,)

    packed = _pack_params(params)
    Lt2 = Lt.reshape(B, T * F)                         # free row-major reshape
    if Bp != B:
        St_in = jnp.pad(St, ((0, Bp - B), (0, 0)))
        Lt_in = jnp.pad(Lt2, ((0, Bp - B), (0, 0)))
    else:
        St_in, Lt_in = St, Lt2

    def const(shape):                                  # constant-index blocks
        return pl.BlockSpec(shape, lambda i: (0, 0))
    # NOTE: these constant blocks could be single-buffered via
    # pipeline_mode=pl.Buffered(1) to save ~2 MiB VMEM where supported.

    in_specs = [
        pl.BlockSpec((bb, F), lambda i: (i, 0)),       # St (batch tile)
        pl.BlockSpec((bb, T * F), lambda i: (i, 0)),   # Lt as (B, T*F) f32
        const((F, F)), const((1, F)),                  # scaled W1^T, b1
        const((F, F)),                                 # hoisted W2
        const((F, F)), const((1, F)),                  # W3^T, b3
        const((F, F)), const((1, F)),                  # W4^T, b4
        const((1, F)), const((1, F)),                  # gamma, beta
    ]

    # Right-sized VMEM budget: double-buffered blocks + f32 intermediates.
    vmem_bytes = (2 * bb * T * F * 4        # Lt blocks
                  + 4 * bb * F * 4          # St + out blocks
                  + 2 * 4 * F * F * 2       # four bf16 weights
                  + 2 * 6 * F * 4           # biases / gamma / beta
                  + 6 * bb * F * 4)         # headroom for in-kernel f32 temps
    vmem_limit = int(min(max(vmem_bytes, 16 * 2**20), 56 * 2**20))

    cost = pl.CostEstimate(
        flops=int(2 * Bp * F * F * (T + 3) + Bp * (4 * T * F + 10 * F)),
        transcendentals=int(Bp * (T + 1)),
        bytes_accessed=int(St_in.size * 4 + Lt_in.size * 4 + Bp * F * 4
                           + 4 * F * F * 2 + 6 * F * 4),
    )

    out = pl.pallas_call(
        nlblock_kernel,
        out_shape=jax.ShapeDtypeStruct((Bp, F), jnp.float32),
        grid_spec=pltpu.PrefetchScalarGridSpec(
            num_scalar_prefetch=0,
            grid=grid,
            in_specs=in_specs,
            out_specs=pl.BlockSpec((bb, F), lambda i: (i, 0)),
        ),
        compiler_params=pltpu.CompilerParams(
            dimension_semantics=("parallel",),
            vmem_limit_bytes=vmem_limit,
        ),
        cost_estimate=cost,
    )(St_in, Lt_in, *packed)

    return out[:B] if Bp != B else out


# --------------------------------------------------------------------------- #
# Parameters & references
# --------------------------------------------------------------------------- #
def init_params(key, feature_num=F_DIM):
    """Deterministic synthetic parameters mirroring the module's __init__."""
    keys = jax.random.split(key, 8)
    xav = math.sqrt(6.0 / (feature_num + feature_num))
    bb = 1.0 / math.sqrt(feature_num)

    def linear(kw, kb):
        w = jax.random.uniform(kw, (feature_num, feature_num), jnp.float32, -xav, xav)
        b = jax.random.uniform(kb, (1, feature_num), jnp.float32, -bb, bb)
        return w.T, b                                   # pre-transposed (in, out)

    w1t, b1 = linear(keys[0], keys[1])
    w2t, b2 = linear(keys[2], keys[3])
    w3t, b3 = linear(keys[4], keys[5])
    w4t, b4 = linear(keys[6], keys[7])
    gamma = jnp.ones((1, feature_num), jnp.float32)
    beta = jnp.zeros((1, feature_num), jnp.float32)
    return (w1t, b1, w2t, b2, w3t, b3, w4t, b4, gamma, beta)


def nlblock_reference_matched(St, Lt, params):
    """Pure-JAX reference mirroring the kernel math exactly (same packed
    params, W2 hoist, folded scale, bf16 matmul inputs / f32 accumulation)."""
    w1s, b1s, w2h, w3b, b3, w4b, b4, gamma, beta = _pack_params(params)
    bf = jnp.bfloat16
    s1 = jnp.dot(St.astype(bf), w1s, preferred_element_type=jnp.float32) + b1s
    q = jnp.dot(s1.astype(bf), w2h, preferred_element_type=jnp.float32)
    logits = jnp.sum(q[:, None, :] * Lt, axis=-1)                 # f32 reduce
    p = jax.nn.softmax(logits, axis=-1)
    l3 = jnp.einsum("bti,io->bto", Lt.astype(bf), w3b,
                    preferred_element_type=jnp.float32)
    z = jnp.sum(p[:, :, None] * l3, axis=1) + b3
    mean = jnp.mean(z, axis=-1, keepdims=True)
    var = jnp.mean(jnp.square(z - mean), axis=-1, keepdims=True)
    zn = (z - mean) * lax.rsqrt(var + LN_EPS) * gamma + beta
    zn = jnp.maximum(zn, 0.0)
    out = jnp.dot(zn.astype(bf), w4b, preferred_element_type=jnp.float32) + b4
    return St + out


def nlblock_reference_f32(St, Lt, params):
    """Faithful f32 translation of the PyTorch forward (eval mode)."""
    (w1t, b1, w2t, b2, w3t, b3, w4t, b4, gamma, beta) = params
    hp = lax.Precision.HIGHEST
    s1 = jnp.einsum("bi,io->bo", St, w1t, precision=hp) + b1
    l1 = jnp.einsum("bti,io->bto", Lt, w2t, precision=hp) + b2
    sl = jnp.einsum("bo,bto->bt", s1, l1, precision=hp) * (1.0 / 512.0) ** 0.5
    p = jax.nn.softmax(sl, axis=-1)
    l2 = jnp.einsum("bti,io->bto", Lt, w3t, precision=hp) + b3
    z = jnp.einsum("bt,bto->bo", p, l2, precision=hp)
    mean = jnp.mean(z, axis=-1, keepdims=True)
    var = jnp.mean(jnp.square(z - mean), axis=-1, keepdims=True)
    zn = (z - mean) / jnp.sqrt(var + LN_EPS) * gamma + beta
    zn = jax.nn.relu(zn)
    out = jnp.einsum("bi,io->bo", zn, w4t, precision=hp) + b4
    return St + out


# --------------------------------------------------------------------------- #
# Self-test
# --------------------------------------------------------------------------- #
if __name__ == "__main__":
    B, T, F = 16, 4, F_DIM

    key = jax.random.PRNGKey(0)
    k_st, k_lt, k_p = jax.random.split(key, 3)
    St = jax.random.normal(k_st, (B, F), jnp.float32)
    Lt = jax.random.normal(k_lt, (B, T, F), jnp.float32)
    params = init_params(k_p, F)

    # block_b=8 keeps shapes small while still exercising a multi-step grid.
    out = nlblock_forward(St, Lt, params, block_b=8)
    out = jax.block_until_ready(out)
    assert out.shape == (B, F)
    assert bool(jnp.all(jnp.isfinite(out)))

    # Structural check vs a reference with the kernel's exact math; tolerance
    # covers bf16 / accumulation-order differences only.
    ref_m = nlblock_reference_matched(St, Lt, params)
    assert jnp.allclose(out, ref_m, atol=5e-2, rtol=5e-2), \
        "kernel mismatch vs matched reference"

    # Loose sanity check vs the faithful f32 PyTorch-style forward (bf16 MXU
    # inputs make the kernel differ from full-f32 math at the few-percent level).
    ref32 = nlblock_reference_f32(St, Lt, params)
    rel = jnp.linalg.norm(out - ref32) / jnp.linalg.norm(ref32)
    assert float(rel) < 0.1, "kernel deviates too far from f32 reference"

    print("KERNEL_OK")
</pallas_src>

<mosaic_0001>
module attributes {stable_mosaic.version = 11 : i64} {
  func.func @nlblock_kernel(%arg0: i32, %arg1: memref<8x512xf32, #tpu.memory_space<vmem>>, %arg2: memref<8x2048xf32, #tpu.memory_space<vmem>>, %arg3: memref<512x512xbf16, #tpu.memory_space<vmem>>, %arg4: memref<1x512xf32, #tpu.memory_space<vmem>>, %arg5: memref<512x512xbf16, #tpu.memory_space<vmem>>, %arg6: memref<512x512xbf16, #tpu.memory_space<vmem>>, %arg7: memref<1x512xf32, #tpu.memory_space<vmem>>, %arg8: memref<512x512xbf16, #tpu.memory_space<vmem>>, %arg9: memref<1x512xf32, #tpu.memory_space<vmem>>, %arg10: memref<1x512xf32, #tpu.memory_space<vmem>>, %arg11: memref<1x512xf32, #tpu.memory_space<vmem>>, %arg12: memref<8x512xf32, #tpu.memory_space<vmem>>) attributes {dimension_semantics = [#tpu.dimension_semantics<parallel>], iteration_bounds = array<i64: 2>, scalar_prefetch = 0 : i64, scratch_operands = 0 : i64, tpu.core_type = #tpu.core_type<tc>, window_params = [{transform_indices = @transform_0, window_bounds = array<i64: 8, 512>}, {transform_indices = @transform_1, window_bounds = array<i64: 8, 2048>}, {pipeline_mode = #tpu.pipeline_mode<synchronous>, transform_indices = @transform_2, window_bounds = array<i64: 512, 512>}, {pipeline_mode = #tpu.pipeline_mode<synchronous>, transform_indices = @transform_3, window_bounds = array<i64: 1, 512>}, {pipeline_mode = #tpu.pipeline_mode<synchronous>, transform_indices = @transform_4, window_bounds = array<i64: 512, 512>}, {pipeline_mode = #tpu.pipeline_mode<synchronous>, transform_indices = @transform_5, window_bounds = array<i64: 512, 512>}, {pipeline_mode = #tpu.pipeline_mode<synchronous>, transform_indices = @transform_6, window_bounds = array<i64: 1, 512>}, {pipeline_mode = #tpu.pipeline_mode<synchronous>, transform_indices = @transform_7, window_bounds = array<i64: 512, 512>}, {pipeline_mode = #tpu.pipeline_mode<synchronous>, transform_indices = @transform_8, window_bounds = array<i64: 1, 512>}, {pipeline_mode = #tpu.pipeline_mode<synchronous>, transform_indices = @transform_9, window_bounds = array<i64: 1, 512>}, {pipeline_mode = #tpu.pipeline_mode<synchronous>, transform_indices = @transform_10, window_bounds = array<i64: 1, 512>}, {transform_indices = @transform_11, window_bounds = array<i64: 8, 512>}]} {
    %c0 = arith.constant 0 : index
    %c0_0 = arith.constant 0 : index
    %0 = vector.load %arg1[%c0, %c0_0] : memref<8x512xf32, #tpu.memory_space<vmem>>, vector<8x512xf32>
    %1 = arith.truncf %0 : vector<8x512xf32> to vector<8x512xbf16>
    %c0_1 = arith.constant 0 : index
    %c0_2 = arith.constant 0 : index
    %2 = vector.load %arg3[%c0_1, %c0_2] : memref<512x512xbf16, #tpu.memory_space<vmem>>, vector<512x512xbf16>
    %cst = arith.constant dense<0.000000e+00> : vector<8x512xf32>
    %3 = tpu.matmul %1, %2, %cst {dimension_numbers = #tpu.dot_dimension_numbers<[1], [0], [0], [1], [0, 0, 1, 1], [], []>} : vector<8x512xbf16>, vector<512x512xbf16>, vector<8x512xf32> -> vector<8x512xf32>
    %c0_3 = arith.constant 0 : index
    %c0_4 = arith.constant 0 : index
    %4 = vector.load %arg4[%c0_3, %c0_4] : memref<1x512xf32, #tpu.memory_space<vmem>>, vector<1x512xf32>
    %5 = vector.broadcast %4 : vector<1x512xf32> to vector<8x512xf32>
    %6 = arith.addf %3, %5 : vector<8x512xf32>
    %7 = arith.truncf %6 : vector<8x512xf32> to vector<8x512xbf16>
    %c0_5 = arith.constant 0 : index
    %c0_6 = arith.constant 0 : index
    %8 = vector.load %arg5[%c0_5, %c0_6] : memref<512x512xbf16, #tpu.memory_space<vmem>>, vector<512x512xbf16>
    %cst_7 = arith.constant dense<0.000000e+00> : vector<8x512xf32>
    %9 = tpu.matmul %7, %8, %cst_7 {dimension_numbers = #tpu.dot_dimension_numbers<[1], [0], [0], [1], [0, 0, 1, 1], [], []>} : vector<8x512xbf16>, vector<512x512xbf16>, vector<8x512xf32> -> vector<8x512xf32>
    %c0_8 = arith.constant 0 : index
    %c0_9 = arith.constant 0 : index
    %10 = vector.load %arg2[%c0_8, %c0_9] : memref<8x2048xf32, #tpu.memory_space<vmem>>, vector<8x512xf32>
    %11 = arith.mulf %9, %10 : vector<8x512xf32>
    %cst_10 = arith.constant dense<0.000000e+00> : vector<8xf32>
    %12 = vector.multi_reduction <add>, %11, %cst_10 [1] : vector<8x512xf32> to vector<8xf32>
    %13 = vector.shape_cast %12 : vector<8xf32> to vector<8x1xf32>
    %c0_11 = arith.constant 0 : index
    %c512 = arith.constant 512 : index
    %14 = vector.load %arg2[%c0_11, %c512] : memref<8x2048xf32, #tpu.memory_space<vmem>>, vector<8x512xf32>
    %15 = arith.mulf %9, %14 : vector<8x512xf32>
    %cst_12 = arith.constant dense<0.000000e+00> : vector<8xf32>
    %16 = vector.multi_reduction <add>, %15, %cst_12 [1] : vector<8x512xf32> to vector<8xf32>
    %17 = vector.shape_cast %16 : vector<8xf32> to vector<8x1xf32>
    %c0_13 = arith.constant 0 : index
    %c1024 = arith.constant 1024 : index
    %18 = vector.load %arg2[%c0_13, %c1024] : memref<8x2048xf32, #tpu.memory_space<vmem>>, vector<8x512xf32>
    %19 = arith.mulf %9, %18 : vector<8x512xf32>
    %cst_14 = arith.constant dense<0.000000e+00> : vector<8xf32>
    %20 = vector.multi_reduction <add>, %19, %cst_14 [1] : vector<8x512xf32> to vector<8xf32>
    %21 = vector.shape_cast %20 : vector<8xf32> to vector<8x1xf32>
    %c0_15 = arith.constant 0 : index
    %c1536 = arith.constant 1536 : index
    %22 = vector.load %arg2[%c0_15, %c1536] : memref<8x2048xf32, #tpu.memory_space<vmem>>, vector<8x512xf32>
    %23 = arith.mulf %9, %22 : vector<8x512xf32>
    %cst_16 = arith.constant dense<0.000000e+00> : vector<8xf32>
    %24 = vector.multi_reduction <add>, %23, %cst_16 [1] : vector<8x512xf32> to vector<8xf32>
    %25 = vector.shape_cast %24 : vector<8xf32> to vector<8x1xf32>
    %26 = arith.maximumf %13, %17 : vector<8x1xf32>
    %27 = arith.maximumf %26, %21 : vector<8x1xf32>
    %28 = arith.maximumf %27, %25 : vector<8x1xf32>
    %29 = arith.subf %13, %28 : vector<8x1xf32>
    %30 = math.exp %29 : vector<8x1xf32>
    %31 = arith.subf %17, %28 : vector<8x1xf32>
    %32 = math.exp %31 : vector<8x1xf32>
    %33 = arith.subf %21, %28 : vector<8x1xf32>
    %34 = math.exp %33 : vector<8x1xf32>
    %35 = arith.subf %25, %28 : vector<8x1xf32>
    %36 = math.exp %35 : vector<8x1xf32>
    %37 = arith.addf %30, %32 : vector<8x1xf32>
    %38 = arith.addf %37, %34 : vector<8x1xf32>
    %39 = arith.addf %38, %36 : vector<8x1xf32>
    %cst_17 = arith.constant 1.000000e+00 : f32
    %40 = vector.broadcast %cst_17 : f32 to vector<8x1xf32>
    %41 = arith.divf %40, %39 : vector<8x1xf32>
    %42 = arith.mulf %30, %41 : vector<8x1xf32>
    %43 = arith.mulf %32, %41 : vector<8x1xf32>
    %44 = arith.mulf %34, %41 : vector<8x1xf32>
    %45 = arith.mulf %36, %41 : vector<8x1xf32>
    %c0_18 = arith.constant 0 : index
    %c0_19 = arith.constant 0 : index
    %46 = vector.load %arg6[%c0_18, %c0_19] : memref<512x512xbf16, #tpu.memory_space<vmem>>, vector<512x512xbf16>
    %c0_20 = arith.constant 0 : index
    %c0_21 = arith.constant 0 : index
    %47 = vector.load %arg2[%c0_20, %c0_21] : memref<8x2048xf32, #tpu.memory_space<vmem>>, vector<8x512xf32>
    %48 = arith.truncf %47 : vector<8x512xf32> to vector<8x512xbf16>
    %cst_22 = arith.constant dense<0.000000e+00> : vector<8x512xf32>
    %49 = tpu.matmul %48, %46, %cst_22 {dimension_numbers = #tpu.dot_dimension_numbers<[1], [0], [0], [1], [0, 0, 1, 1], [], []>} : vector<8x512xbf16>, vector<512x512xbf16>, vector<8x512xf32> -> vector<8x512xf32>
    %50 = vector.broadcast %42 : vector<8x1xf32> to vector<8x512xf32>
    %51 = arith.mulf %50, %49 : vector<8x512xf32>
    %c0_23 = arith.constant 0 : index
    %c512_24 = arith.constant 512 : index
    %52 = vector.load %arg2[%c0_23, %c512_24] : memref<8x2048xf32, #tpu.memory_space<vmem>>, vector<8x512xf32>
    %53 = arith.truncf %52 : vector<8x512xf32> to vector<8x512xbf16>
    %cst_25 = arith.constant dense<0.000000e+00> : vector<8x512xf32>
    %54 = tpu.matmul %53, %46, %cst_25 {dimension_numbers = #tpu.dot_dimension_numbers<[1], [0], [0], [1], [0, 0, 1, 1], [], []>} : vector<8x512xbf16>, vector<512x512xbf16>, vector<8x512xf32> -> vector<8x512xf32>
    %55 = vector.broadcast %43 : vector<8x1xf32> to vector<8x512xf32>
    %56 = arith.mulf %55, %54 : vector<8x512xf32>
    %57 = arith.addf %51, %56 : vector<8x512xf32>
    %c0_26 = arith.constant 0 : index
    %c1024_27 = arith.constant 1024 : index
    %58 = vector.load %arg2[%c0_26, %c1024_27] : memref<8x2048xf32, #tpu.memory_space<vmem>>, vector<8x512xf32>
    %59 = arith.truncf %58 : vector<8x512xf32> to vector<8x512xbf16>
    %cst_28 = arith.constant dense<0.000000e+00> : vector<8x512xf32>
    %60 = tpu.matmul %59, %46, %cst_28 {dimension_numbers = #tpu.dot_dimension_numbers<[1], [0], [0], [1], [0, 0, 1, 1], [], []>} : vector<8x512xbf16>, vector<512x512xbf16>, vector<8x512xf32> -> vector<8x512xf32>
    %61 = vector.broadcast %44 : vector<8x1xf32> to vector<8x512xf32>
    %62 = arith.mulf %61, %60 : vector<8x512xf32>
    %63 = arith.addf %57, %62 : vector<8x512xf32>
    %c0_29 = arith.constant 0 : index
    %c1536_30 = arith.constant 1536 : index
    %64 = vector.load %arg2[%c0_29, %c1536_30] : memref<8x2048xf32, #tpu.memory_space<vmem>>, vector<8x512xf32>
    %65 = arith.truncf %64 : vector<8x512xf32> to vector<8x512xbf16>
    %cst_31 = arith.constant dense<0.000000e+00> : vector<8x512xf32>
    %66 = tpu.matmul %65, %46, %cst_31 {dimension_numbers = #tpu.dot_dimension_numbers<[1], [0], [0], [1], [0, 0, 1, 1], [], []>} : vector<8x512xbf16>, vector<512x512xbf16>, vector<8x512xf32> -> vector<8x512xf32>
    %67 = vector.broadcast %45 : vector<8x1xf32> to vector<8x512xf32>
    %68 = arith.mulf %67, %66 : vector<8x512xf32>
    %69 = arith.addf %63, %68 : vector<8x512xf32>
    %c0_32 = arith.constant 0 : index
    %c0_33 = arith.constant 0 : index
    %70 = vector.load %arg7[%c0_32, %c0_33] : memref<1x512xf32, #tpu.memory_space<vmem>>, vector<1x512xf32>
    %71 = vector.broadcast %70 : vector<1x512xf32> to vector<8x512xf32>
    %72 = arith.addf %69, %71 : vector<8x512xf32>
    %cst_34 = arith.constant dense<0.000000e+00> : vector<8xf32>
    %73 = vector.multi_reduction <add>, %72, %cst_34 [1] : vector<8x512xf32> to vector<8xf32>
    %74 = vector.shape_cast %73 : vector<8xf32> to vector<8x1xf32>
    %cst_35 = arith.constant 5.120000e+02 : f32
    %75 = vector.broadcast %cst_35 : f32 to vector<8x1xf32>
    %76 = arith.divf %74, %75 : vector<8x1xf32>
    %77 = vector.broadcast %76 : vector<8x1xf32> to vector<8x512xf32>
    %78 = arith.subf %72, %77 : vector<8x512xf32>
    %79 = arith.mulf %78, %78 : vector<8x512xf32>
    %cst_36 = arith.constant dense<0.000000e+00> : vector<8xf32>
    %80 = vector.multi_reduction <add>, %79, %cst_36 [1] : vector<8x512xf32> to vector<8xf32>
    %81 = vector.shape_cast %80 : vector<8xf32> to vector<8x1xf32>
    %cst_37 = arith.constant 5.120000e+02 : f32
    %82 = vector.broadcast %cst_37 : f32 to vector<8x1xf32>
    %83 = arith.divf %81, %82 : vector<8x1xf32>
    %84 = vector.broadcast %76 : vector<8x1xf32> to vector<8x512xf32>
    %85 = arith.subf %72, %84 : vector<8x512xf32>
    %cst_38 = arith.constant 9.99999974E-6 : f32
    %86 = vector.broadcast %cst_38 : f32 to vector<8x1xf32>
    %87 = arith.addf %83, %86 : vector<8x1xf32>
    %88 = math.rsqrt %87 : vector<8x1xf32>
    %89 = vector.broadcast %88 : vector<8x1xf32> to vector<8x512xf32>
    %90 = arith.mulf %85, %89 : vector<8x512xf32>
    %c0_39 = arith.constant 0 : index
    %c0_40 = arith.constant 0 : index
    %91 = vector.load %arg10[%c0_39, %c0_40] : memref<1x512xf32, #tpu.memory_space<vmem>>, vector<1x512xf32>
    %92 = vector.broadcast %91 : vector<1x512xf32> to vector<8x512xf32>
    %93 = arith.mulf %90, %92 : vector<8x512xf32>
    %c0_41 = arith.constant 0 : index
    %c0_42 = arith.constant 0 : index
    %94 = vector.load %arg11[%c0_41, %c0_42] : memref<1x512xf32, #tpu.memory_space<vmem>>, vector<1x512xf32>
    %95 = vector.broadcast %94 : vector<1x512xf32> to vector<8x512xf32>
    %96 = arith.addf %93, %95 : vector<8x512xf32>
    %cst_43 = arith.constant 0.000000e+00 : f32
    %97 = vector.broadcast %cst_43 : f32 to vector<8x512xf32>
    %98 = arith.maximumf %96, %97 : vector<8x512xf32>
    %99 = arith.truncf %98 : vector<8x512xf32> to vector<8x512xbf16>
    %c0_44 = arith.constant 0 : index
    %c0_45 = arith.constant 0 : index
    %100 = vector.load %arg8[%c0_44, %c0_45] : memref<512x512xbf16, #tpu.memory_space<vmem>>, vector<512x512xbf16>
    %cst_46 = arith.constant dense<0.000000e+00> : vector<8x512xf32>
    %101 = tpu.matmul %99, %100, %cst_46 {dimension_numbers = #tpu.dot_dimension_numbers<[1], [0], [0], [1], [0, 0, 1, 1], [], []>} : vector<8x512xbf16>, vector<512x512xbf16>, vector<8x512xf32> -> vector<8x512xf32>
    %c0_47 = arith.constant 0 : index
    %c0_48 = arith.constant 0 : index
    %102 = vector.load %arg9[%c0_47, %c0_48] : memref<1x512xf32, #tpu.memory_space<vmem>>, vector<1x512xf32>
    %103 = vector.broadcast %102 : vector<1x512xf32> to vector<8x512xf32>
    %104 = arith.addf %101, %103 : vector<8x512xf32>
    %105 = arith.addf %0, %104 : vector<8x512xf32>
    %c0_49 = arith.constant 0 : index
    %c0_50 = arith.constant 0 : index
    %106 = vector.load %arg12[%c0_49, %c0_50] : memref<8x512xf32, #tpu.memory_space<vmem>>, vector<8x512xf32>
    tpu.vector_store %arg12[%c0_49, %c0_50], %105 {strides = array<i32>} : memref<8x512xf32, #tpu.memory_space<vmem>>, vector<8x512xf32>,
    return
  }
  func.func @transform_0(%arg0: i32) -> (i32, i32) {
    %c0_i32 = arith.constant 0 : i32
    %c0_i32_0 = arith.constant 0 : i32
    return %arg0, %c0_i32 : i32, i32
  }
  func.func @transform_1(%arg0: i32) -> (i32, i32) {
    %c0_i32 = arith.constant 0 : i32
    %c0_i32_0 = arith.constant 0 : i32
    return %arg0, %c0_i32 : i32, i32
  }
  func.func @transform_2(%arg0: i32) -> (i32, i32) {
    %c0_i32 = arith.constant 0 : i32
    %c0_i32_0 = arith.constant 0 : i32
    %c0_i32_1 = arith.constant 0 : i32
    return %c0_i32, %c0_i32_0 : i32, i32
  }
  func.func @transform_3(%arg0: i32) -> (i32, i32) {
    %c0_i32 = arith.constant 0 : i32
    %c0_i32_0 = arith.constant 0 : i32
    %c0_i32_1 = arith.constant 0 : i32
    return %c0_i32, %c0_i32_0 : i32, i32
  }
  func.func @transform_4(%arg0: i32) -> (i32, i32) {
    %c0_i32 = arith.constant 0 : i32
    %c0_i32_0 = arith.constant 0 : i32
    %c0_i32_1 = arith.constant 0 : i32
    return %c0_i32, %c0_i32_0 : i32, i32
  }
  func.func @transform_5(%arg0: i32) -> (i32, i32) {
    %c0_i32 = arith.constant 0 : i32
    %c0_i32_0 = arith.constant 0 : i32
    %c0_i32_1 = arith.constant 0 : i32
    return %c0_i32, %c0_i32_0 : i32, i32
  }
  func.func @transform_6(%arg0: i32) -> (i32, i32) {
    %c0_i32 = arith.constant 0 : i32
    %c0_i32_0 = arith.constant 0 : i32
    %c0_i32_1 = arith.constant 0 : i32
    return %c0_i32, %c0_i32_0 : i32, i32
  }
  func.func @transform_7(%arg0: i32) -> (i32, i32) {
    %c0_i32 = arith.constant 0 : i32
    %c0_i32_0 = arith.constant 0 : i32
    %c0_i32_1 = arith.constant 0 : i32
    return %c0_i32, %c0_i32_0 : i32, i32
  }
  func.func @transform_8(%arg0: i32) -> (i32, i32) {
    %c0_i32 = arith.constant 0 : i32
    %c0_i32_0 = arith.constant 0 : i32
    %c0_i32_1 = arith.constant 0 : i32
    return %c0_i32, %c0_i32_0 : i32, i32
  }
  func.func @transform_9(%arg0: i32) -> (i32, i32) {
    %c0_i32 = arith.constant 0 : i32
    %c0_i32_0 = arith.constant 0 : i32
    %c0_i32_1 = arith.constant 0 : i32
    return %c0_i32, %c0_i32_0 : i32, i32
  }
  func.func @transform_10(%arg0: i32) -> (i32, i32) {
    %c0_i32 = arith.constant 0 : i32
    %c0_i32_0 = arith.constant 0 : i32
    %c0_i32_1 = arith.constant 0 : i32
    return %c0_i32, %c0_i32_0 : i32, i32
  }
  func.func @transform_11(%arg0: i32) -> (i32, i32) {
    %c0_i32 = arith.constant 0 : i32
    %c0_i32_0 = arith.constant 0 : i32
    return %arg0, %c0_i32 : i32, i32
  }
}

</mosaic_0001>

<bundles_post_ra>
// kernel: tpu_custom_call.1
= control target key start
LH: loop header
LB: loop body
LE: loop exit
PB: predicated region body
PF: predicated region fallthrough
CT: control target
= control target key end

     0   :  { %s8313_s0 = inlined_call_operand.hbm [shape: f32[16,512], index: 0, kind: input, shape index: {}]   ;;  %s8314_s1 = inlined_call_operand.hbm [shape: f32[16,2048], index: 1, kind: input, shape index: {}]   ;;  %s8315_s2 = inlined_call_operand.hbm [shape: bf16[512,512], index: 2, kind: input, shape index: {}]   ;;  %s8316_s3 = inlined_call_operand.vmem [shape: f32[1,512], index: 3, kind: input, shape index: {}]   ;;  %s8317_s4 = inlined_call_operand.hbm [shape: bf16[512,512], index: 4, kind: input, shape index: {}]   ;;  %s8318_s5 = inlined_call_operand.hbm [shape: bf16[512,512], index: 5, kind: input, shape index: {}]   ;;  %s8319_s6 = inlined_call_operand.vmem [shape: f32[1,512], index: 6, kind: input, shape index: {}]   ;;  %s8320_s7 = inlined_call_operand.hbm [shape: bf16[512,512], index: 7, kind: input, shape index: {}]   ;;  %s8321_s8 = inlined_call_operand.vmem [shape: f32[1,512], index: 8, kind: input, shape index: {}]   ;;  %s8322_s9 = inlined_call_operand.vmem [shape: f32[1,512], index: 9, kind: input, shape index: {}]   ;;  %s8323_s10 = inlined_call_operand.vmem [shape: f32[1,512], index: 10, kind: input, shape index: {}]   ;;  %s8324_s11 = inlined_call_operand.hbm [shape: f32[16,512], index: 11, kind: output, shape index: {}]  }
   0x1   :  { %8511 = sst [smem:[#allocation127_spill]] %s8313_s0 }
   0x2   :  { %8512 = sst [smem:[#allocation128_spill]] %s8315_s2 }
   0x3   :  { %8513 = sst [smem:[#allocation129_spill]] %s8317_s4 }
   0x4   :  { %8514 = sst [smem:[#allocation130_spill]] %s8318_s5 }
   0x5   :  { %8515 = sst [smem:[#allocation131_spill]] %s8321_s8 }
   0x6   :  { %8516 = sst [smem:[#allocation132_spill]] %s8323_s10 }
   0x7   :  { %8517 = sst [smem:[#allocation133_spill]] %s8324_s11 }
   0x8   :  { %16 = vsyncpa [#allocation3], 0 }
   0x9   :  { %18 = vsyncpa [#allocation3 + $0x1], 0 }
   0xa   :  { %19 = vsyncpa [#allocation6], 0 }
   0xb   :  { %21 = vsyncpa [#allocation6 + $0x1], 0 }
   0xc   :  { %22 = vsyncpa [#allocation9], 0 }
   0xd   :  { %23 = vsyncpa [#allocation12], 0 }
   0xe   :  { %24 = vsyncpa [#allocation4], 0 }
   0xf   :  { %26 = vsyncpa [#allocation4 + $0x1], 0  ;;  %s7086_s17 = smov 0   ;;  %s7088_s18 = smov 0  }
  0x10   :  { %s7090_s19 = smov 0   ;;  %s7092_s20 = smov 0  }
  0x11 LB: > { %s7017_s21 = smov [#allocation7]   ;;  %s7107_s23 = sadd.s32 4294967295, %s7015_s20   ;;  %s7015_s20 = sphi %s7092_s20, %s8808_s20   ;;  %s7011_s19 = sphi %s7090_s19, %s8807_s19   ;;  %s7007_s18 = sphi %s7088_s18, %s8806_s18   ;;  %s7003_s17 = sphi %s7086_s17, %s8805_s17  }
  0x12   : > { %s316_s22 = sshll.u32 %s7017_s21, 4  ;;  %p5163_p0 = scmp.ge.s32.totalorder %s7015_s20, 1  ;;  %s7112_s22 = int_to_ptr.vmem [resolvable:$true] %s316_s22 }
  0x13   : > { %p8326_p1 = scmp.eq.s32.totalorder %s7107_s23, 0  ;;  %p304_p2 = scmp.lt.s32.totalorder %s7015_s20, 3 }
  0x14   : > { %s7018_s25 = smov [#allocation8]   ;;  %s7019_s28 = smov [#allocation10]  }
  0x15   : > { %p7114_p3 = pnand %p5163_p0, %p304_p2  ;;  %s332_s26 = sshll.u32 %s7018_s25, 4  ;;  %s7127_s26 = int_to_ptr.vmem [resolvable:$true] %s332_s26 }
  0x16   : > { %s345_s29 = sshll.u32 %s7019_s28, 4  ;;  %s8520_s2 = sld [smem:[#allocation128_spill]]  ;;  %s7129_s29 = int_to_ptr.vmem [resolvable:$true] %s345_s29 }
  0x17   : > { %s8518_s24 = scalar_select %p7114_p3, 1, 0 }
  0x18   : > { %p5777_p5 = pneg %p7114_p3 }
  0x1a   : > { %p7123_p6 = pnand %p5777_p5, %p8326_p1 }
  0x1c   : > { %s6761_s13 = scalar_lea.hbm %s8520_s2, 16384  ;;  %p7139_p8 = pneg %p7123_p6 }
  0x1d   : > { %p6762_p7 = scmp.ne.s32.totalorder %s8520_s2, %s6761_s13  ;;  %p6768_p11 = scmp.lt.u32.totalorder %s6761_s13, %s8520_s2 }
  0x1f   : > { %p6764_p9 = pnand %p7139_p8, %p6762_p7 }
  0x21   : > { %p6765_p10 = pneg %p6764_p9 }
  0x23   : > { %p6770_p12 = pnand %p6768_p11, %p6765_p10 }
  0x25   : > { %6773 = shalt.err (!%p6770_p12)
}
  0x26   : > { %s6774_s28 = scalar_lea.vmem %s7112_s22, 16384  ;;  %p6782_p5 = scmp.lt.s32.totalorder %s7112_s22, %s7112_s22 }
  0x27   : > { %p6775_p13 = scmp.ne.s32.totalorder %s7112_s22, %s6774_s28  ;;  %p6783_p4 = scmp.lt.s32.totalorder %s6774_s28, %s6774_s28 }
  0x29   : > { %p6777_p0 = pnand %p6775_p13, %p7139_p8  ;;  %p6784_p7 = por %p6783_p4, %p6782_p5 }
  0x2b   : > { %p6778_p2 = pneg %p6777_p0 }
  0x2d   : > { %p6785_p9 = pnand %p6784_p7, %p6778_p2 }
  0x2f   : > { %6788 = shalt.err (!%p6785_p9)
}
  0x30   : > { %s7020_s30 = smov 256   ;;  %s7021_s12 = smov 16  }
  0x31   : > { %5780 = dma.hbm_to_vmem [thread:$0]  (!%p7123_p6), %s8520_s2, 16384, %s7112_s22, [#allocation6], %s7020_s30, %s7020_s30, %s7021_s12  }
  0x32   : > { %s8522_s4 = sld [smem:[#allocation129_spill]] }
  0x38   : > { %s6789_s25 = scalar_lea.hbm %s8522_s4, 16384 }
  0x39   : > { %p6790_p4 = scmp.ne.s32.totalorder %s8522_s4, %s6789_s25  ;;  %p6796_p12 = scmp.lt.u32.totalorder %s6789_s25, %s8522_s4 }
  0x3b   : > { %p6792_p10 = pnand %p6790_p4, %p7139_p8 }
  0x3d   : > { %p6793_p11 = pneg %p6792_p10 }
  0x3f   : > { %p6798_p13 = pnand %p6796_p12, %p6793_p11 }
  0x41   : > { %6801 = shalt.err (!%p6798_p13)
}
  0x42   : > { %s6802_s22 = scalar_lea.vmem %s7127_s26, 16384  ;;  %p6810_p7 = scmp.lt.s32.totalorder %s7127_s26, %s7127_s26 }
  0x43   : > { %p6803_p0 = scmp.ne.s32.totalorder %s7127_s26, %s6802_s22  ;;  %p6811_p9 = scmp.lt.s32.totalorder %s6802_s22, %s6802_s22 }
  0x45   : > { %p6805_p2 = pnand %p6803_p0, %p7139_p8  ;;  %p6812_p4 = por %p6811_p9, %p6810_p7 }
  0x47   : > { %p6806_p5 = pneg %p6805_p2 }
  0x49   : > { %p6813_p10 = pnand %p6812_p4, %p6806_p5 }
  0x4b   : > { %6816 = shalt.err (!%p6813_p10)
}
  0x4c   : > { %5783 = dma.hbm_to_vmem [thread:$0]  (!%p7123_p6), %s8522_s4, 16384, %s7127_s26, [#allocation9], %s7020_s30, %s7020_s30, %s7021_s12  }
  0x4d   : > { %s8523_s5 = sld [smem:[#allocation130_spill]] }
  0x53   : > { %s6817_s14 = scalar_lea.hbm %s8523_s5, 16384 }
  0x54   : > { %p6818_p11 = scmp.ne.s32.totalorder %s8523_s5, %s6817_s14  ;;  %p6824_p0 = scmp.lt.u32.totalorder %s6817_s14, %s8523_s5 }
  0x56   : > { %p6820_p12 = pnand %p6818_p11, %p7139_p8 }
  0x58   : > { %p6821_p13 = pneg %p6820_p12 }
  0x5a   : > { %p6826_p2 = pnand %p6824_p0, %p6821_p13 }
  0x5c   : > { %6829 = shalt.err (!%p6826_p2)
}
  0x5d   : > { %s6830_s26 = scalar_lea.vmem %s7129_s29, 16384  ;;  %p6838_p4 = scmp.lt.s32.totalorder %s7129_s29, %s7129_s29 }
  0x5e   : > { %p6831_p5 = scmp.ne.s32.totalorder %s7129_s29, %s6830_s26  ;;  %p6839_p10 = scmp.lt.s32.totalorder %s6830_s26, %s6830_s26 }
  0x60   : > { %p6833_p7 = pnand %p6831_p5, %p7139_p8  ;;  %p6840_p11 = por %p6839_p10, %p6838_p4 }
  0x62   : > { %p6834_p9 = pneg %p6833_p7 }
  0x64   : > { %p6841_p12 = pnand %p6840_p11, %p6834_p9 }
  0x66   : > { %6844 = shalt.err (!%p6841_p12)
}
  0x67   : > { %5786 = dma.hbm_to_vmem [thread:$0]  (!%p7123_p6), %s8523_s5, 16384, %s7129_s29, [#allocation9], %s7020_s30, %s7020_s30, %s7021_s12  }
  0x68   : > { %s7022_s10 = smov [#allocation11]   ;;  %s6845_s15 = scalar_lea.hbm %s8320_s7, 16384 }
  0x69   : > { %s361_s11 = sshll.u32 %s7022_s10, 4  ;;  %p6846_p13 = scmp.ne.s32.totalorder %s8320_s7, %s6845_s15  ;;  %s362_s11 = int_to_ptr.vmem [resolvable:$true] %s361_s11 }
  0x6a   : > { %p6852_p5 = scmp.lt.u32.totalorder %s6845_s15, %s8320_s7 }
  0x6b   : > { %p6848_p0 = pnand %p6846_p13, %p7139_p8 }
  0x6d   : > { %p6849_p2 = pneg %p6848_p0 }
  0x6f   : > { %p6854_p7 = pnand %p6852_p5, %p6849_p2 }
  0x71   : > { %6857 = shalt.err (!%p6854_p7)
}
  0x72   : > { %s6858_s29 = scalar_lea.vmem %s362_s11, 16384  ;;  %p6866_p11 = scmp.lt.s32.totalorder %s362_s11, %s362_s11 }
  0x73   : > { %p6859_p9 = scmp.ne.s32.totalorder %s362_s11, %s6858_s29  ;;  %p6867_p12 = scmp.lt.s32.totalorder %s6858_s29, %s6858_s29 }
  0x75   : > { %p6861_p4 = pnand %p6859_p9, %p7139_p8  ;;  %p6868_p1 = por %p6867_p12, %p6866_p11 }
  0x77   : > { %p6862_p10 = pneg %p6861_p4 }
  0x79   : > { %p6869_p3 = pnand %p6868_p1, %p6862_p10 }
  0x7b   : > { %6872 = shalt.err (!%p6869_p3)
}
  0x7c   : > { %5789 = dma.hbm_to_vmem [thread:$0]  (!%p7123_p6), %s8320_s7, 16384, %s362_s11, [#allocation12], %s7020_s30, %s7020_s30, %s7021_s12  }
  0x7d   : > { %s5162_s27 = sadd.s32 4294967294, %s7015_s20   ;;  %s7238_s16 = sadd.s32 1, %s7015_s20  }
  0x7e   : > { %s36_s10 = ssub.s32 %s7015_s20, %s7238_s16  ;;  %s39_s13 = sadd.s32 1, %s7011_s19 }
  0x7f   : > { %p37_p1 = scmp.eq.s32.totalorder %s36_s10, 0  ;;  %p46_p3 = scmp.ne.s32.totalorder %s7011_s19, %s7007_s18 }
  0x80   : > { %p47_p8 = scmp.eq.s32.totalorder %s7015_s20, 0  ;;  %p52_p13 = scmp.ne.s32.totalorder %s7007_s18, %s7003_s17 }
  0x81   : > { %s7249_s14 = scalar_select %p37_p1, %s7011_s19, %s39_s13  }
  0x82   : > { %p7251_p0 = por %p47_p8, %p46_p3  ;;  %p8525_p2 = scmp.eq.s32.totalorder %s7107_s23, 0 }
  0x83   : > { %p291_p5 = scmp.eq.s32.totalorder %s7107_s23, 1  ;;  %p297_p7 = scmp.eq.s32.totalorder %s5162_s27, 1 }
  0x84   : > { %p7257_p6 = por %p8525_p2, %p52_p13  ;;  %p5805_p9 = scmp.lt.s32.totalorder %s7015_s20, 2 }
  0x85   : > { %s7264_s12 = sand.u32 1, %s7011_s19   ;;  %p7266_p4 = por %p291_p5, %p46_p3 }
  0x86   : > { %s8526_s30 = scalar_select %p7257_p6, 1, 0 }
  0x87   : > { %s8527_s11 = scalar_select %p7266_p4, 1, 0 }
  0x88   : > { %p7270_p10 = por %p297_p7, %p52_p13  ;;  %s5169_s25 = sshll.u32 %s7264_s12, 5 }
  0x89   : > { %s5700_s28 = sshll.u32 %s7015_s20, 9  ;;  %s8529_s0 = sld [smem:[#allocation127_spill]] }
  0x8a   : > { %s8528_s21 = scalar_select %p7270_p10, 1, 0 }
  0x8b   : > { %s388_s8 = scalar_lea.vmem [#allocation2], %s5169_s25  ;;  %p7285_p11 = pnand %p5805_p9, %p7251_p0 }
  0x8c   : > { %s396_s27 = sshll.u32 %s388_s8, 4  ;;  %s5172_s2 = sshll.u32 %s7264_s12, 7  ;;  %s7281_s27 = int_to_ptr.vmem [resolvable:$true] %s396_s27 }
  0x8d   : > { %s385_s26 = scalar_lea.sflag [#allocation3], %s7264_s12  ;;  %p6875_p1 = pneg %p7285_p11 }
  0x8f   : > { %s7279_s22 = scalar_lea.hbm %s8529_s0, %s5700_s28  ;;  %s6878_s15 = scalar_lea.hbm %s8529_s0, 1024 }
  0x90   : > { %s6873_s28 = scalar_lea.hbm %s7279_s22, 512  ;;  %p6879_p13 = scmp.lt.u32.totalorder %s7279_s22, %s8529_s0 }
  0x91   : > { %p6874_p12 = scmp.ne.s32.totalorder %s7279_s22, %s6873_s28  ;;  %p6880_p0 = scmp.lt.u32.totalorder %s6878_s15, %s6873_s28 }
  0x92   : > { %p6882_p5 = scmp.lt.u32.totalorder %s6873_s28, %s7279_s22 }
  0x93   : > { %p6876_p3 = pnand %p6875_p1, %p6874_p12  ;;  %p6881_p2 = por %p6880_p0, %p6879_p13 }
  0x95   : > { %p6877_p8 = pneg %p6876_p3  ;;  %p6883_p7 = por %p6882_p5, %p6881_p2 }
  0x97   : > { %p6884_p9 = pnand %p6883_p7, %p6877_p8 }
  0x99   : > { %6887 = shalt.err (!%p6884_p9)
}
  0x9a   : > { %s6888_s13 = scalar_lea.vmem %s7281_s27, 512  ;;  %s7023_s25 = smov [#allocation2]  }
  0x9b   : > { %p6889_p12 = scmp.ne.s32.totalorder %s7281_s27, %s6888_s13  ;;  %s6893_s29 = sshll.u32 %s7023_s25, 4  ;;  %s6894_s29 = int_to_ptr.vmem [resolvable:$false] %s6893_s29 }
  0x9c   : > { %s6895_s4 = scalar_lea.vmem %s6894_s29, 1024  ;;  %p6896_p4 = scmp.lt.s32.totalorder %s7281_s27, %s6894_s29 }
  0x9d   : > { %p6891_p3 = pnand %p6889_p12, %p6875_p1  ;;  %p6897_p13 = scmp.lt.s32.totalorder %s6895_s4, %s6888_s13 }
  0x9f   : > { %p6892_p10 = pneg %p6891_p3  ;;  %p6898_p0 = por %p6897_p13, %p6896_p4 }
  0xa1   : > { %p6899_p2 = pnand %p6898_p0, %p6892_p10 }
  0xa3   : > { %6902 = shalt.err (!%p6899_p2)
}
  0xa4   : > { %5793 = dma.hbm_to_vmem [thread:$0]  (!%p7285_p11), %s7279_s22, 512, %s7281_s27, %s385_s26  }
  0xa5   : > { %s5701_s28 = sshll.u32 %s7015_s20, 11  ;;  %s407_s13 = scalar_lea.vmem [#allocation5], %s5172_s2 }
  0xa6   : > { %s7321_s25 = scalar_lea.hbm %s8314_s1, %s5701_s28  ;;  %s415_s29 = sshll.u32 %s407_s13, 4  ;;  %s416_s29 = int_to_ptr.vmem [resolvable:$true] %s415_s29 }
  0xa7   : > { %s8531_s4 = sand.u32 1, %s7015_s20   ;;  %s6903_s5 = scalar_lea.hbm %s7321_s25, 2048 }
  0xa8   : > { %s404_s0 = scalar_lea.sflag [#allocation6], %s8531_s4  ;;  %p6904_p4 = scmp.ne.s32.totalorder %s7321_s25, %s6903_s5 }
  0xa9   : > { %s6908_s26 = scalar_lea.hbm %s8314_s1, 4096  ;;  %p6909_p5 = scmp.lt.u32.totalorder %s7321_s25, %s8314_s1 }
  0xaa   : > { %p6906_p10 = pnand %p6904_p4, %p6875_p1  ;;  %p6910_p7 = scmp.lt.u32.totalorder %s6908_s26, %s6903_s5 }
  0xab   : > { %p6912_p12 = scmp.lt.u32.totalorder %s6903_s5, %s7321_s25 }
  0xac   : > { %p6907_p8 = pneg %p6906_p10  ;;  %p6911_p9 = por %p6910_p7, %p6909_p5 }
  0xae   : > { %p6913_p3 = por %p6912_p12, %p6911_p9 }
  0xb0   : > { %p6914_p13 = pnand %p6913_p3, %p6907_p8 }
  0xb2   : > { %6917 = shalt.err (!%p6914_p13)
}
  0xb3   : > { %s6918_s2 = scalar_lea.vmem %s416_s29, 2048  ;;  %s7024_s15 = smov [#allocation5]  }
  0xb4   : > { %p6919_p0 = scmp.ne.s32.totalorder %s416_s29, %s6918_s2  ;;  %s6923_s8 = sshll.u32 %s7024_s15, 4  ;;  %s6924_s8 = int_to_ptr.vmem [resolvable:$false] %s6923_s8 }
  0xb5   : > { %s6925_s13 = scalar_lea.vmem %s6924_s8, 4096  ;;  %p6926_p10 = scmp.lt.s32.totalorder %s416_s29, %s6924_s8 }
  0xb6   : > { %p6921_p2 = pnand %p6919_p0, %p6875_p1  ;;  %p6927_p6 = scmp.lt.s32.totalorder %s6925_s13, %s6918_s2 }
  0xb8   : > { %p6922_p4 = pneg %p6921_p2  ;;  %p6928_p5 = por %p6927_p6, %p6926_p10 }
  0xba   : > { %p6929_p7 = pnand %p6928_p5, %p6922_p4 }
  0xbc   : > { %6932 = shalt.err (!%p6929_p7)
}
  0xbd   : > { %5796 = dma.hbm_to_vmem [thread:$0]  (!%p7285_p11), %s7321_s25, 2048, %s416_s29, %s404_s0  }
  0xbe   : > { %p8532_p8 = scmp.ne.s32.totalorder %s8518_s24, 0 }
  0xc0   : > { %424 = sbr.rel (%p8532_p8) target bundleno = 1983 (0x7bf), region = 64 }
  0xc7   : > { %s7349_s5 = sand.u32 1, %s7007_s18   ;;  %p8533_p6 = scmp.ne.s32.totalorder %s8526_s30, 0 }
  0xc8   : > { %s5176_s4 = sshll.u32 %s7349_s5, 5  ;;  %s427_s22 = scalar_lea.sflag [#allocation3], %s7349_s5 }
  0xc9   : > { %s7355_s27 = scalar_lea.vmem [#allocation2], %s5176_s4 }
  0xca   : > { %6978 = dma.done.wait (%p8533_p6), %s427_s22, 512  }
  0xcb   : > { %6980 = vsyncadd (%p8533_p6), %s427_s22, 4294966784  ;;  %s435_s0 = sand.u32 1, %s7107_s23   ;;  %s5177_s24 = sshll.u32 %s7349_s5, 7 }
  0xcc   : > { %s436_s10 = scalar_lea.sflag [#allocation6], %s435_s0  ;;  %s7363_s25 = scalar_lea.vmem [#allocation5], %s5177_s24 }
  0xcd   : > { %6982 = dma.done.wait (%p8533_p6), %s436_s10, 2048  }
  0xce   : > { %6984 = vsyncadd (%p8533_p6), %s436_s10, 4294965248  ;;  %p8534_p11 = scmp.eq.s32.totalorder %s7107_s23, 0 }
  0xd0   : > { %6986 = dma.done.wait (%p8534_p11), [#allocation6], 16384   ;;  %p8535_p1 = pmov %p8534_p11 }
  0xd2   : > { %6988 = vsyncadd (%p8535_p1), [#allocation6], 4294950912  ;;  %p8536_p9 = pmov %p8535_p1 }
  0xd3   : > { %p8537_p12 = pmov %p8535_p1 }
  0xd4   : > { %6990 = dma.done.wait (%p8536_p9), [#allocation9], 32768  }
  0xd5   : > { %6992 = vsyncadd (%p8537_p12), [#allocation9], 4294934528  ;;  %p8538_p3 = pmov %p8535_p1 }
  0xd6   : > { %p8539_p13 = pmov %p8535_p1 }
  0xd7   : > { %6994 = dma.done.wait (%p8538_p3), [#allocation12], 16384  }
  0xd8   : > { %6996 = vsyncadd (%p8539_p13), [#allocation12], 4294950912  ;;  %v5849_v0 = vld [vmem:[#allocation7 + $0x4] ss:$16 sps:$4 sm:$0xff]   ;;  %v5851_v1 = vld [vmem:[#allocation7 + $0xc] ss:$16 sps:$4 sm:$0xff]  }
  0xd9   : > { %1297 = vmatprep.subr.bf16.mxu0 %v5849_v0  ;;  %v5853_v2 = vld [vmem:[#allocation7] ss:$16 sps:$4 sm:$0xff]   ;;  %v5854_v3 = vld [vmem:[#allocation7 + $0x8] ss:$16 sps:$4 sm:$0xff]   ;;  %1379 = vmatprep.subr.bf16.mxu1 %v5851_v1  ;;  %v5855_v4 = vld [vmem:[#allocation7 + $0x24] ss:$16 sps:$4 sm:$0xff]  }
  0xda   : > { %1298 = vmatpush1.bf16.msra.mxu0 %v5853_v2  ;;  %1380 = vmatpush1.bf16.msra.mxu1 %v5854_v3  ;;  %v5857_v5 = vld [vmem:[#allocation7 + $0x2c] ss:$16 sps:$4 sm:$0xff]   ;;  %v5859_v6 = vld [vmem:[#allocation7 + $0x20] ss:$16 sps:$4 sm:$0xff]   ;;  %v5860_v7 = vld [vmem:[#allocation7 + $0x28] ss:$16 sps:$4 sm:$0xff]  }
  0xdb   : > { %1299 = vmatprep.subr.bf16.mxu0 %v5855_v4  ;;  %1381 = vmatprep.subr.bf16.mxu1 %v5857_v5  ;;  %v5861_v8 = vld [vmem:[#allocation7 + $0x44] ss:$16 sps:$4 sm:$0xff]   ;;  %v5863_v9 = vld [vmem:[#allocation7 + $0x4c] ss:$16 sps:$4 sm:$0xff]   ;;  %v5865_v10 = vld [vmem:[#allocation7 + $0x40] ss:$16 sps:$4 sm:$0xff]  }
  0xdc   : > { %v5866_v11 = vld [vmem:[#allocation7 + $0x48] ss:$16 sps:$4 sm:$0xff]   ;;  %v5867_v12 = vld [vmem:[#allocation7 + $0x64] ss:$16 sps:$4 sm:$0xff]   ;;  %v5869_v13 = vld [vmem:[#allocation7 + $0x6c] ss:$16 sps:$4 sm:$0xff]  }
  0xdd   : > { %v5871_v14 = vld [vmem:[#allocation7 + $0x60] ss:$16 sps:$4 sm:$0xff]   ;;  %v5872_v15 = vld [vmem:[#allocation7 + $0x68] ss:$16 sps:$4 sm:$0xff]   ;;  %v5873_v16 = vld [vmem:[#allocation7 + $0x84] ss:$16 sps:$4 sm:$0xff]  }
  0xde   : > { %1300 = vmatpush1.bf16.msra.mxu0 %v5859_v6  ;;  %1382 = vmatpush1.bf16.msra.mxu1 %v5860_v7  ;;  %v5875_v17 = vld [vmem:[#allocation7 + $0x8c] ss:$16 sps:$4 sm:$0xff]   ;;  %v5877_v18 = vld [vmem:[#allocation7 + $0x80] ss:$16 sps:$4 sm:$0xff]   ;;  %v5878_v19 = vld [vmem:[#allocation7 + $0x88] ss:$16 sps:$4 sm:$0xff]  }
  0xdf   : > { %1301 = vmatprep.subr.bf16.mxu0 %v5861_v8  ;;  %1383 = vmatprep.subr.bf16.mxu1 %v5863_v9  ;;  %v5879_v20 = vld [vmem:[#allocation7 + $0xa4] ss:$16 sps:$4 sm:$0xff]   ;;  %v5881_v21 = vld [vmem:[#allocation7 + $0xac] ss:$16 sps:$4 sm:$0xff]   ;;  %v5883_v22 = vld [vmem:[#allocation7 + $0xa0] ss:$16 sps:$4 sm:$0xff]  }
  0xe0   : > { %v5884_v23 = vld [vmem:[#allocation7 + $0xa8] ss:$16 sps:$4 sm:$0xff]   ;;  %v5885_v24 = vld [vmem:[#allocation7 + $0xc4] ss:$16 sps:$4 sm:$0xff]   ;;  %v5887_v25 = vld [vmem:[#allocation7 + $0xcc] ss:$16 sps:$4 sm:$0xff]  }
  0xe1   : > { %v5889_v26 = vld [vmem:[#allocation7 + $0xc0] ss:$16 sps:$4 sm:$0xff]   ;;  %v5890_v27 = vld [vmem:[#allocation7 + $0xc8] ss:$16 sps:$4 sm:$0xff]   ;;  %v5891_v28 = vld [vmem:[#allocation7 + $0xe4] ss:$16 sps:$4 sm:$0xff]  }
  0xe2   : > { %1302 = vmatpush1.bf16.msra.mxu0 %v5865_v10  ;;  %1384 = vmatpush1.bf16.msra.mxu1 %v5866_v11  ;;  %v5893_v29 = vld [vmem:[#allocation7 + $0xec] ss:$16 sps:$4 sm:$0xff]   ;;  %v5895_v30 = vld [vmem:[#allocation7 + $0xe0] ss:$16 sps:$4 sm:$0xff]   ;;  %v5896_v31 = vld [vmem:[#allocation7 + $0xe8] ss:$16 sps:$4 sm:$0xff]  }
  0xe3   : > { %1303 = vmatprep.subr.bf16.mxu0 %v5867_v12  ;;  %1385 = vmatprep.subr.bf16.mxu1 %v5869_v13  ;;  %v5897_v32 = vld [vmem:[#allocation7 + $0x104] ss:$16 sps:$4 sm:$0xff]   ;;  %v5899_v33 = vld [vmem:[#allocation7 + $0x10c] ss:$16 sps:$4 sm:$0xff]   ;;  %v5901_v34 = vld [vmem:[#allocation7 + $0x100] ss:$16 sps:$4 sm:$0xff]  }
  0xe4   : > { %v5902_v35 = vld [vmem:[#allocation7 + $0x108] ss:$16 sps:$4 sm:$0xff]   ;;  %v5903_v36 = vld [vmem:[#allocation7 + $0x124] ss:$16 sps:$4 sm:$0xff]   ;;  %v5905_v37 = vld [vmem:[#allocation7 + $0x12c] ss:$16 sps:$4 sm:$0xff]  }
  0xe5   : > { %v5907_v38 = vld [vmem:[#allocation7 + $0x120] ss:$16 sps:$4 sm:$0xff]   ;;  %v5908_v39 = vld [vmem:[#allocation7 + $0x128] ss:$16 sps:$4 sm:$0xff]   ;;  %v5909_v40 = vld [vmem:[#allocation7 + $0x144] ss:$16 sps:$4 sm:$0xff]  }
  0xe6   : > { %1304 = vmatpush1.bf16.msra.mxu0 %v5871_v14  ;;  %1386 = vmatpush1.bf16.msra.mxu1 %v5872_v15  ;;  %v5911_v41 = vld [vmem:[#allocation7 + $0x14c] ss:$16 sps:$4 sm:$0xff]   ;;  %v5913_v42 = vld [vmem:[#allocation7 + $0x140] ss:$16 sps:$4 sm:$0xff]   ;;  %v5914_v43 = vld [vmem:[#allocation7 + $0x148] ss:$16 sps:$4 sm:$0xff]  }
  0xe7   : > { %1305 = vmatprep.subr.bf16.mxu0 %v5873_v16  ;;  %1387 = vmatprep.subr.bf16.mxu1 %v5875_v17  ;;  %v5915_v44 = vld [vmem:[#allocation7 + $0x164] ss:$16 sps:$4 sm:$0xff]   ;;  %v5917_v45 = vld [vmem:[#allocation7 + $0x16c] ss:$16 sps:$4 sm:$0xff]   ;;  %v5919_v47 = vld [vmem:[#allocation7 + $0x160] ss:$16 sps:$4 sm:$0xff]  }
  0xe8   : > { %v500_v46 = vld [vmem:[%s7355_s27 + $0x8] sm:$0xff]  ;;  %v5921_v50 = vld [vmem:[#allocation7 + $0x184] ss:$16 sps:$4 sm:$0xff]   ;;  %v5925_v52 = vld [vmem:[#allocation7 + $0x180] ss:$16 sps:$4 sm:$0xff]   ;;  %s8799_s13 = sld [smem:[#allocation132_spill]] }
  0xe9   : > { %v504_v48 = vpack.c.bf16 %v500_v46, %v500_v46  ;;  %v5920_v49 = vld [vmem:[#allocation7 + $0x168] ss:$16 sps:$4 sm:$0xff]   ;;  %v5923_v51 = vld [vmem:[#allocation7 + $0x18c] ss:$16 sps:$4 sm:$0xff]   ;;  %v5927_v54 = vld [vmem:[#allocation7 + $0x1a4] ss:$16 sps:$4 sm:$0xff]  }
  0xea   : > { %1306 = vmatpush1.bf16.msra.mxu0 %v5877_v18  ;;  %1388 = vmatpush1.bf16.msra.mxu1 %v5878_v19  ;;  %v5926_v53 = vld [vmem:[#allocation7 + $0x188] ss:$16 sps:$4 sm:$0xff]   ;;  %v5929_v55 = vld [vmem:[#allocation7 + $0x1ac] ss:$16 sps:$4 sm:$0xff]   ;;  %v5931_v56 = vld [vmem:[#allocation7 + $0x1a0] ss:$16 sps:$4 sm:$0xff]  }
  0xeb   : > { %1307 = vmatprep.subr.bf16.mxu0 %v5879_v20  ;;  %1389 = vmatprep.subr.bf16.mxu1 %v5881_v21  ;;  %v5932_v57 = vld [vmem:[#allocation7 + $0x1a8] ss:$16 sps:$4 sm:$0xff]   ;;  %v5933_v58 = vld [vmem:[#allocation7 + $0x1c4] ss:$16 sps:$4 sm:$0xff]   ;;  %v5935_v59 = vld [vmem:[#allocation7 + $0x1cc] ss:$16 sps:$4 sm:$0xff]  }
  0xec   : > { %1329 = vmatprep.mubr.bf16.mxu0 %v504_v48  ;;  %1411 = vmatprep.mubr.bf16.mxu1 %v504_v48  ;;  %v5937_v60 = vld [vmem:[#allocation7 + $0x1c0] ss:$16 sps:$4 sm:$0xff]   ;;  %v5938_v61 = vld [vmem:[#allocation7 + $0x1c8] ss:$16 sps:$4 sm:$0xff]   ;;  %v5939_v62 = vld [vmem:[#allocation7 + $0x1e4] ss:$16 sps:$4 sm:$0xff]  }
  0xed   : > { %v5941_v63 = vld [vmem:[#allocation7 + $0x1ec] ss:$16 sps:$4 sm:$0xff]   ;;  %v5943_v0 = vld [vmem:[#allocation7 + $0x1e0] ss:$16 sps:$4 sm:$0xff]   ;;  %v5944_v1 = vld [vmem:[#allocation7 + $0x1e8] ss:$16 sps:$4 sm:$0xff]  }
  0xee   : > { %1308 = vmatpush1.bf16.msra.mxu0 %v5883_v22  ;;  %1390 = vmatpush1.bf16.msra.mxu1 %v5884_v23  ;;  %v499_v2 = vld [vmem:[%s7355_s27] sm:$0xff]  ;;  %v5950_v4 = vld [vmem:[#allocation7 + $0x20c] ss:$16 sps:$4 sm:$0xff]   ;;  %v5948_v7 = vld [vmem:[#allocation7 + $0x208] ss:$16 sps:$4 sm:$0xff]   ;;  %s8800_s24 = sld [smem:[#allocation131_spill]] }
  0xef   : > { %1309 = vmatprep.subr.bf16.mxu0 %v5885_v24  ;;  %1391 = vmatprep.subr.bf16.mxu1 %v5887_v25  ;;  %v5947_v3 = vld [vmem:[#allocation7 + $0x204] ss:$16 sps:$4 sm:$0xff]   ;;  %v503_v5 = vpack.c.bf16 %v499_v2, %v499_v2  ;;  %v5945_v6 = vld [vmem:[#allocation7 + $0x200] ss:$16 sps:$4 sm:$0xff]   ;;  %v5956_v9 = vld [vmem:[#allocation7 + $0x22c] ss:$16 sps:$4 sm:$0xff]  }
  0xf0   : > { %v5953_v8 = vld [vmem:[#allocation7 + $0x224] ss:$16 sps:$4 sm:$0xff]   ;;  %v5951_v10 = vld [vmem:[#allocation7 + $0x220] ss:$16 sps:$4 sm:$0xff]   ;;  %v5954_v11 = vld [vmem:[#allocation7 + $0x228] ss:$16 sps:$4 sm:$0xff]  }
  0xf1   : > { %v5959_v12 = vld [vmem:[#allocation7 + $0x244] ss:$16 sps:$4 sm:$0xff]   ;;  %v5962_v13 = vld [vmem:[#allocation7 + $0x24c] ss:$16 sps:$4 sm:$0xff]   ;;  %v5957_v14 = vld [vmem:[#allocation7 + $0x240] ss:$16 sps:$4 sm:$0xff]  }
  0xf2   : > { %1310 = vmatpush1.bf16.msra.mxu0 %v5889_v26  ;;  %1392 = vmatpush1.bf16.msra.mxu1 %v5890_v27  ;;  %v5960_v15 = vld [vmem:[#allocation7 + $0x248] ss:$16 sps:$4 sm:$0xff]   ;;  %v5965_v16 = vld [vmem:[#allocation7 + $0x264] ss:$16 sps:$4 sm:$0xff]   ;;  %v5968_v17 = vld [vmem:[#allocation7 + $0x26c] ss:$16 sps:$4 sm:$0xff]  }
  0xf3   : > { %1311 = vmatprep.subr.bf16.mxu0 %v5891_v28  ;;  %1393 = vmatprep.subr.bf16.mxu1 %v5893_v29  ;;  %v5963_v18 = vld [vmem:[#allocation7 + $0x260] ss:$16 sps:$4 sm:$0xff]   ;;  %v5966_v19 = vld [vmem:[#allocation7 + $0x268] ss:$16 sps:$4 sm:$0xff]   ;;  %v5971_v20 = vld [vmem:[#allocation7 + $0x284] ss:$16 sps:$4 sm:$0xff]  }
  0xf4   : > { %v5974_v21 = vld [vmem:[#allocation7 + $0x28c] ss:$16 sps:$4 sm:$0xff]   ;;  %v5969_v22 = vld [vmem:[#allocation7 + $0x280] ss:$16 sps:$4 sm:$0xff]   ;;  %v5972_v23 = vld [vmem:[#allocation7 + $0x288] ss:$16 sps:$4 sm:$0xff]  }
  0xf5   : > { %v5977_v24 = vld [vmem:[#allocation7 + $0x2a4] ss:$16 sps:$4 sm:$0xff]   ;;  %v5980_v25 = vld [vmem:[#allocation7 + $0x2ac] ss:$16 sps:$4 sm:$0xff]   ;;  %v5975_v26 = vld [vmem:[#allocation7 + $0x2a0] ss:$16 sps:$4 sm:$0xff]  }
  0xf6   : > { %1312 = vmatpush1.bf16.msra.mxu0 %v5895_v30  ;;  %1394 = vmatpush1.bf16.msra.mxu1 %v5896_v31  ;;  %v5978_v27 = vld [vmem:[#allocation7 + $0x2a8] ss:$16 sps:$4 sm:$0xff]   ;;  %v5983_v28 = vld [vmem:[#allocation7 + $0x2c4] ss:$16 sps:$4 sm:$0xff]   ;;  %v5986_v29 = vld [vmem:[#allocation7 + $0x2cc] ss:$16 sps:$4 sm:$0xff]  }
  0xf7   : > { %1313 = vmatprep.subr.bf16.mxu0 %v5897_v32  ;;  %1395 = vmatprep.subr.bf16.mxu1 %v5899_v33  ;;  %v502_v30 = vld [vmem:[%s7355_s27 + $0x18] sm:$0xff]  ;;  %v5981_v31 = vld [vmem:[#allocation7 + $0x2c0] ss:$16 sps:$4 sm:$0xff]   ;;  %v6007_v46 = vld [vmem:[#allocation7 + $0x344] ss:$16 sps:$4 sm:$0xff]   ;;  %s498_s10 = scalar_lea.vmem [#allocation13], %s5176_s4 }
  0xf8   : > { %v5984_v32 = vld [vmem:[#allocation7 + $0x2c8] ss:$16 sps:$4 sm:$0xff]   ;;  %v506_v33 = vpack.c.bf16 %v502_v30, %v502_v30  ;;  %v6005_v48 = vld [vmem:[#allocation7 + $0x340] ss:$16 sps:$4 sm:$0xff]   ;;  %v6037_v2 = vld [vmem:[#allocation7 + $0x3e4] ss:$16 sps:$4 sm:$0xff]  }
  0xf9   : > { %v6071_v30 = vld [vmem:[#allocation8 + $0xa0] ss:$16 sps:$4 sm:$0xff]   ;;  %s5702_s4 = sshll.u32 %s7107_s23, 9  ;;  %s8801_s26 = sld [smem:[#allocation133_spill]] }
  0xfa   : > { %1314 = vmatpush1.bf16.msra.mxu0 %v5901_v34  ;;  %1396 = vmatpush1.bf16.msra.mxu1 %v5902_v35  ;;  %v5989_v34 = vld [vmem:[#allocation7 + $0x2e4] ss:$16 sps:$4 sm:$0xff]   ;;  %v5992_v35 = vld [vmem:[#allocation7 + $0x2ec] ss:$16 sps:$4 sm:$0xff]   ;;  %s5017_s28 = scalar_lea.sflag [#allocation4], %s7349_s5  ;;  %p8802_p2 = scmp.ne.s32.totalorder %s8527_s11, 0 }
  0xfb   : > { %1315 = vmatprep.subr.bf16.mxu0 %v5903_v36  ;;  %1397 = vmatprep.subr.bf16.mxu1 %v5905_v37  ;;  %v5987_v36 = vld [vmem:[#allocation7 + $0x2e0] ss:$16 sps:$4 sm:$0xff]   ;;  %v5990_v37 = vld [vmem:[#allocation7 + $0x2e8] ss:$16 sps:$4 sm:$0xff]  }
  0xfe   : > { %1316 = vmatpush1.bf16.msra.mxu0 %v5907_v38  ;;  %1398 = vmatpush1.bf16.msra.mxu1 %v5908_v39  ;;  %v5995_v38 = vld [vmem:[#allocation7 + $0x304] ss:$16 sps:$4 sm:$0xff]   ;;  %v5998_v39 = vld [vmem:[#allocation7 + $0x30c] ss:$16 sps:$4 sm:$0xff]  }
  0xff   : > { %1317 = vmatprep.subr.bf16.mxu0 %v5909_v40  ;;  %1399 = vmatprep.subr.bf16.mxu1 %v5911_v41  ;;  %v5993_v40 = vld [vmem:[#allocation7 + $0x300] ss:$16 sps:$4 sm:$0xff]   ;;  %v5996_v41 = vld [vmem:[#allocation7 + $0x308] ss:$16 sps:$4 sm:$0xff]   ;;  %s8269_s12 = scalar_lea.hbm %s8801_s26, %s5702_s4 }
 0x102   : > { %1318 = vmatpush1.bf16.msra.mxu0 %v5913_v42  ;;  %1400 = vmatpush1.bf16.msra.mxu1 %v5914_v43  ;;  %v6001_v42 = vld [vmem:[#allocation7 + $0x324] ss:$16 sps:$4 sm:$0xff]   ;;  %v6004_v43 = vld [vmem:[#allocation7 + $0x32c] ss:$16 sps:$4 sm:$0xff]  }
 0x103   : > { %1319 = vmatprep.subr.bf16.mxu0 %v5915_v44  ;;  %1401 = vmatprep.subr.bf16.mxu1 %v5917_v45  ;;  %v5999_v44 = vld [vmem:[#allocation7 + $0x320] ss:$16 sps:$4 sm:$0xff]   ;;  %v6002_v45 = vld [vmem:[#allocation7 + $0x328] ss:$16 sps:$4 sm:$0xff]  }
 0x106   : > { %1320 = vmatpush1.bf16.msra.mxu0 %v5919_v47  ;;  %1402 = vmatpush1.bf16.msra.mxu1 %v5920_v49  ;;  %v6010_v47 = vld [vmem:[#allocation7 + $0x34c] ss:$16 sps:$4 sm:$0xff]   ;;  %v6008_v49 = vld [vmem:[#allocation7 + $0x348] ss:$16 sps:$4 sm:$0xff]  }
 0x107   : > { %1321 = vmatprep.subr.bf16.mxu0 %v5921_v50  ;;  %1403 = vmatprep.subr.bf16.mxu1 %v5923_v51  ;;  %v6013_v50 = vld [vmem:[#allocation7 + $0x364] ss:$16 sps:$4 sm:$0xff]   ;;  %v6016_v51 = vld [vmem:[#allocation7 + $0x36c] ss:$16 sps:$4 sm:$0xff]  }
 0x10a   : > { %1322 = vmatpush1.bf16.msra.mxu0 %v5925_v52  ;;  %1404 = vmatpush1.bf16.msra.mxu1 %v5926_v53  ;;  %v6011_v52 = vld [vmem:[#allocation7 + $0x360] ss:$16 sps:$4 sm:$0xff]   ;;  %v6014_v53 = vld [vmem:[#allocation7 + $0x368] ss:$16 sps:$4 sm:$0xff]  }
 0x10b   : > { %1323 = vmatprep.subr.bf16.mxu0 %v5927_v54  ;;  %1405 = vmatprep.subr.bf16.mxu1 %v5929_v55  ;;  %v6019_v54 = vld [vmem:[#allocation7 + $0x384] ss:$16 sps:$4 sm:$0xff]   ;;  %v6022_v55 = vld [vmem:[#allocation7 + $0x38c] ss:$16 sps:$4 sm:$0xff]  }
 0x10e   : > { %1324 = vmatpush1.bf16.msra.mxu0 %v5931_v56  ;;  %1406 = vmatpush1.bf16.msra.mxu1 %v5932_v57  ;;  %v6017_v56 = vld [vmem:[#allocation7 + $0x380] ss:$16 sps:$4 sm:$0xff]   ;;  %v6020_v57 = vld [vmem:[#allocation7 + $0x388] ss:$16 sps:$4 sm:$0xff]  }
 0x10f   : > { %1325 = vmatprep.subr.bf16.mxu0 %v5933_v58  ;;  %1407 = vmatprep.subr.bf16.mxu1 %v5935_v59  ;;  %v6025_v58 = vld [vmem:[#allocation7 + $0x3a4] ss:$16 sps:$4 sm:$0xff]   ;;  %v6028_v59 = vld [vmem:[#allocation7 + $0x3ac] ss:$16 sps:$4 sm:$0xff]  }
 0x112   : > { %1326 = vmatpush1.bf16.msra.mxu0 %v5937_v60  ;;  %1408 = vmatpush1.bf16.msra.mxu1 %v5938_v61  ;;  %v6023_v60 = vld [vmem:[#allocation7 + $0x3a0] ss:$16 sps:$4 sm:$0xff]   ;;  %v6026_v61 = vld [vmem:[#allocation7 + $0x3a8] ss:$16 sps:$4 sm:$0xff]  }
 0x113   : > { %1327 = vmatprep.subr.bf16.mxu0 %v5939_v62  ;;  %1409 = vmatprep.subr.bf16.mxu1 %v5941_v63  ;;  %v6031_v62 = vld [vmem:[#allocation7 + $0x3c4] ss:$16 sps:$4 sm:$0xff]   ;;  %v6034_v63 = vld [vmem:[#allocation7 + $0x3cc] ss:$16 sps:$4 sm:$0xff]  }
 0x116   : > { %1328 = vmatpush1.bf16.msra.mxu0 %v5943_v0  ;;  %1410 = vmatpush1.bf16.msra.mxu1 %v5944_v1  ;;  %v6029_v0 = vld [vmem:[#allocation7 + $0x3c0] ss:$16 sps:$4 sm:$0xff]   ;;  %v6032_v1 = vld [vmem:[#allocation7 + $0x3c8] ss:$16 sps:$4 sm:$0xff]  }
 0x117   : > { %1338 = vmatprep.subr.bf16.mxu0 %v5947_v3  ;;  %1420 = vmatprep.subr.bf16.mxu1 %v5950_v4  ;;  %v6040_v3 = vld [vmem:[#allocation7 + $0x3ec] ss:$16 sps:$4 sm:$0xff]   ;;  %v6035_v4 = vld [vmem:[#allocation7 + $0x3e0] ss:$16 sps:$4 sm:$0xff]  }
 0x119   : > { %1330 = vmatmul.mubr.bf16.vlgmr.msra.gmra.mrb[0].mxu0 %v503_v5  ;;  %1412 = vmatmul.mubr.bf16.vlgmr.msra.gmra.mrb[0].mxu1 %v503_v5  ;;  %v6038_v5 = vld [vmem:[#allocation7 + $0x3e8] ss:$16 sps:$4 sm:$0xff]  }
 0x11a   : > { %1339 = vmatpush1.bf16.msra.mxu0 %v5945_v6  ;;  %1421 = vmatpush1.bf16.msra.mxu1 %v5948_v7  ;;  %v501_v6 = vld [vmem:[%s7355_s27 + $0x10] sm:$0xff] }
 0x11b   : > { %1340 = vmatprep.subr.bf16.mxu0 %v5953_v8  ;;  %1422 = vmatprep.subr.bf16.mxu1 %v5956_v9  ;;  %v6043_v7 = vld [vmem:[#allocation8 + $0x4] ss:$16 sps:$4 sm:$0xff]   ;;  %v6046_v8 = vld [vmem:[#allocation8 + $0xc] ss:$16 sps:$4 sm:$0xff]   ;;  %v6041_v9 = vld [vmem:[#allocation8] ss:$16 sps:$4 sm:$0xff]  }
 0x11c   : > { %1370 = vmatprep.mubr.bf16.mxu0 %v506_v33  ;;  %1452 = vmatprep.mubr.bf16.mxu1 %v506_v33  ;;  %v6082_v33 = vld [vmem:[#allocation8 + $0xcc] ss:$16 sps:$4 sm:$0xff]  }
 0x11e   : > { %1341 = vmatpush1.bf16.msra.mxu0 %v5951_v10  ;;  %1423 = vmatpush1.bf16.msra.mxu1 %v5954_v11  ;;  %v6044_v10 = vld [vmem:[#allocation8 + $0x8] ss:$16 sps:$4 sm:$0xff]   ;;  %v505_v11 = vpack.c.bf16 %v501_v6, %v501_v6  ;;  %v6131_v6 = vld [vmem:[#allocation8 + $0x1e0] ss:$16 sps:$4 sm:$0xff]  }
 0x11f   : > { %1342 = vmatprep.subr.bf16.mxu0 %v5959_v12  ;;  %1424 = vmatprep.subr.bf16.mxu1 %v5962_v13  ;;  %v6049_v12 = vld [vmem:[#allocation8 + $0x24] ss:$16 sps:$4 sm:$0xff]   ;;  %v6052_v13 = vld [vmem:[#allocation8 + $0x2c] ss:$16 sps:$4 sm:$0xff]  }
 0x122   : > { %1343 = vmatpush1.bf16.msra.mxu0 %v5957_v14  ;;  %1425 = vmatpush1.bf16.msra.mxu1 %v5960_v15  ;;  %v6047_v14 = vld [vmem:[#allocation8 + $0x20] ss:$16 sps:$4 sm:$0xff]   ;;  %v6050_v15 = vld [vmem:[#allocation8 + $0x28] ss:$16 sps:$4 sm:$0xff]  }
 0x123   : > { %1344 = vmatprep.subr.bf16.mxu0 %v5965_v16  ;;  %1426 = vmatprep.subr.bf16.mxu1 %v5968_v17  ;;  %v6055_v16 = vld [vmem:[#allocation8 + $0x44] ss:$16 sps:$4 sm:$0xff]   ;;  %v6058_v17 = vld [vmem:[#allocation8 + $0x4c] ss:$16 sps:$4 sm:$0xff]  }
 0x126   : > { %1345 = vmatpush1.bf16.msra.mxu0 %v5963_v18  ;;  %1427 = vmatpush1.bf16.msra.mxu1 %v5966_v19  ;;  %v6053_v18 = vld [vmem:[#allocation8 + $0x40] ss:$16 sps:$4 sm:$0xff]   ;;  %v6056_v19 = vld [vmem:[#allocation8 + $0x48] ss:$16 sps:$4 sm:$0xff]  }
 0x127   : > { %1346 = vmatprep.subr.bf16.mxu0 %v5971_v20  ;;  %1428 = vmatprep.subr.bf16.mxu1 %v5974_v21  ;;  %v6061_v20 = vld [vmem:[#allocation8 + $0x64] ss:$16 sps:$4 sm:$0xff]   ;;  %v6064_v21 = vld [vmem:[#allocation8 + $0x6c] ss:$16 sps:$4 sm:$0xff]  }
 0x12a   : > { %1347 = vmatpush1.bf16.msra.mxu0 %v5969_v22  ;;  %1429 = vmatpush1.bf16.msra.mxu1 %v5972_v23  ;;  %v6059_v22 = vld [vmem:[#allocation8 + $0x60] ss:$16 sps:$4 sm:$0xff]   ;;  %v6062_v23 = vld [vmem:[#allocation8 + $0x68] ss:$16 sps:$4 sm:$0xff]  }
 0x12b   : > { %1348 = vmatprep.subr.bf16.mxu0 %v5977_v24  ;;  %1430 = vmatprep.subr.bf16.mxu1 %v5980_v25  ;;  %v6067_v24 = vld [vmem:[#allocation8 + $0x84] ss:$16 sps:$4 sm:$0xff]   ;;  %v6070_v25 = vld [vmem:[#allocation8 + $0x8c] ss:$16 sps:$4 sm:$0xff]  }
 0x12e   : > { %1349 = vmatpush1.bf16.msra.mxu0 %v5975_v26  ;;  %1431 = vmatpush1.bf16.msra.mxu1 %v5978_v27  ;;  %v6065_v26 = vld [vmem:[#allocation8 + $0x80] ss:$16 sps:$4 sm:$0xff]   ;;  %v6068_v27 = vld [vmem:[#allocation8 + $0x88] ss:$16 sps:$4 sm:$0xff]  }
 0x12f   : > { %1350 = vmatprep.subr.bf16.mxu0 %v5983_v28  ;;  %1432 = vmatprep.subr.bf16.mxu1 %v5986_v29  ;;  %v6073_v28 = vld [vmem:[#allocation8 + $0xa4] ss:$16 sps:$4 sm:$0xff]   ;;  %v6076_v29 = vld [vmem:[#allocation8 + $0xac] ss:$16 sps:$4 sm:$0xff]  }
 0x132   : > { %1351 = vmatpush1.bf16.msra.mxu0 %v5981_v31  ;;  %1433 = vmatpush1.bf16.msra.mxu1 %v5984_v32  ;;  %v6074_v31 = vld [vmem:[#allocation8 + $0xa8] ss:$16 sps:$4 sm:$0xff]   ;;  %v6079_v32 = vld [vmem:[#allocation8 + $0xc4] ss:$16 sps:$4 sm:$0xff]  }
 0x133   : > { %1352 = vmatprep.subr.bf16.mxu0 %v5989_v34  ;;  %1434 = vmatprep.subr.bf16.mxu1 %v5992_v35  ;;  %v6077_v34 = vld [vmem:[#allocation8 + $0xc0] ss:$16 sps:$4 sm:$0xff]   ;;  %v6080_v35 = vld [vmem:[#allocation8 + $0xc8] ss:$16 sps:$4 sm:$0xff]  }
 0x136   : > { %1353 = vmatpush1.bf16.msra.mxu0 %v5987_v36  ;;  %1435 = vmatpush1.bf16.msra.mxu1 %v5990_v37  ;;  %v6085_v36 = vld [vmem:[#allocation8 + $0xe4] ss:$16 sps:$4 sm:$0xff]   ;;  %v6088_v37 = vld [vmem:[#allocation8 + $0xec] ss:$16 sps:$4 sm:$0xff]  }
 0x137   : > { %1354 = vmatprep.subr.bf16.mxu0 %v5995_v38  ;;  %1436 = vmatprep.subr.bf16.mxu1 %v5998_v39  ;;  %v6083_v38 = vld [vmem:[#allocation8 + $0xe0] ss:$16 sps:$4 sm:$0xff]   ;;  %v6086_v39 = vld [vmem:[#allocation8 + $0xe8] ss:$16 sps:$4 sm:$0xff]  }
 0x13a   : > { %1355 = vmatpush1.bf16.msra.mxu0 %v5993_v40  ;;  %1437 = vmatpush1.bf16.msra.mxu1 %v5996_v41  ;;  %v6091_v40 = vld [vmem:[#allocation8 + $0x104] ss:$16 sps:$4 sm:$0xff]   ;;  %v6094_v41 = vld [vmem:[#allocation8 + $0x10c] ss:$16 sps:$4 sm:$0xff]  }
 0x13b   : > { %1356 = vmatprep.subr.bf16.mxu0 %v6001_v42  ;;  %1438 = vmatprep.subr.bf16.mxu1 %v6004_v43  ;;  %v6089_v42 = vld [vmem:[#allocation8 + $0x100] ss:$16 sps:$4 sm:$0xff]   ;;  %v6092_v43 = vld [vmem:[#allocation8 + $0x108] ss:$16 sps:$4 sm:$0xff]  }
 0x13e   : > { %1357 = vmatpush1.bf16.msra.mxu0 %v5999_v44  ;;  %1439 = vmatpush1.bf16.msra.mxu1 %v6002_v45  ;;  %v6097_v44 = vld [vmem:[#allocation8 + $0x124] ss:$16 sps:$4 sm:$0xff]   ;;  %v6100_v45 = vld [vmem:[#allocation8 + $0x12c] ss:$16 sps:$4 sm:$0xff]  }
 0x13f   : > { %1358 = vmatprep.subr.bf16.mxu0 %v6007_v46  ;;  %1440 = vmatprep.subr.bf16.mxu1 %v6010_v47  ;;  %v6095_v46 = vld [vmem:[#allocation8 + $0x120] ss:$16 sps:$4 sm:$0xff]   ;;  %v6098_v47 = vld [vmem:[#allocation8 + $0x128] ss:$16 sps:$4 sm:$0xff]  }
 0x142   : > { %1359 = vmatpush1.bf16.msra.mxu0 %v6005_v48  ;;  %1441 = vmatpush1.bf16.msra.mxu1 %v6008_v49  ;;  %v6103_v48 = vld [vmem:[#allocation8 + $0x144] ss:$16 sps:$4 sm:$0xff]   ;;  %v6106_v49 = vld [vmem:[#allocation8 + $0x14c] ss:$16 sps:$4 sm:$0xff]  }
 0x143   : > { %1360 = vmatprep.subr.bf16.mxu0 %v6013_v50  ;;  %1442 = vmatprep.subr.bf16.mxu1 %v6016_v51  ;;  %v6101_v50 = vld [vmem:[#allocation8 + $0x140] ss:$16 sps:$4 sm:$0xff]   ;;  %v6104_v51 = vld [vmem:[#allocation8 + $0x148] ss:$16 sps:$4 sm:$0xff]  }
 0x146   : > { %1361 = vmatpush1.bf16.msra.mxu0 %v6011_v52  ;;  %1443 = vmatpush1.bf16.msra.mxu1 %v6014_v53  ;;  %v6109_v52 = vld [vmem:[#allocation8 + $0x164] ss:$16 sps:$4 sm:$0xff]   ;;  %v6112_v53 = vld [vmem:[#allocation8 + $0x16c] ss:$16 sps:$4 sm:$0xff]  }
 0x147   : > { %1362 = vmatprep.subr.bf16.mxu0 %v6019_v54  ;;  %1444 = vmatprep.subr.bf16.mxu1 %v6022_v55  ;;  %v6107_v54 = vld [vmem:[#allocation8 + $0x160] ss:$16 sps:$4 sm:$0xff]   ;;  %v6110_v55 = vld [vmem:[#allocation8 + $0x168] ss:$16 sps:$4 sm:$0xff]  }
 0x14a   : > { %1363 = vmatpush1.bf16.msra.mxu0 %v6017_v56  ;;  %1445 = vmatpush1.bf16.msra.mxu1 %v6020_v57  ;;  %v6115_v56 = vld [vmem:[#allocation8 + $0x184] ss:$16 sps:$4 sm:$0xff]   ;;  %v6118_v57 = vld [vmem:[#allocation8 + $0x18c] ss:$16 sps:$4 sm:$0xff]  }
 0x14b   : > { %1364 = vmatprep.subr.bf16.mxu0 %v6025_v58  ;;  %1446 = vmatprep.subr.bf16.mxu1 %v6028_v59  ;;  %v6113_v58 = vld [vmem:[#allocation8 + $0x180] ss:$16 sps:$4 sm:$0xff]   ;;  %v6116_v59 = vld [vmem:[#allocation8 + $0x188] ss:$16 sps:$4 sm:$0xff]  }
 0x14e   : > { %1365 = vmatpush1.bf16.msra.mxu0 %v6023_v60  ;;  %1447 = vmatpush1.bf16.msra.mxu1 %v6026_v61  ;;  %v6121_v60 = vld [vmem:[#allocation8 + $0x1a4] ss:$16 sps:$4 sm:$0xff]   ;;  %v6124_v61 = vld [vmem:[#allocation8 + $0x1ac] ss:$16 sps:$4 sm:$0xff]  }
 0x14f   : > { %1366 = vmatprep.subr.bf16.mxu0 %v6031_v62  ;;  %1448 = vmatprep.subr.bf16.mxu1 %v6034_v63  ;;  %v6119_v62 = vld [vmem:[#allocation8 + $0x1a0] ss:$16 sps:$4 sm:$0xff]   ;;  %v6122_v63 = vld [vmem:[#allocation8 + $0x1a8] ss:$16 sps:$4 sm:$0xff]  }
 0x152   : > { %1367 = vmatpush1.bf16.msra.mxu0 %v6029_v0  ;;  %1449 = vmatpush1.bf16.msra.mxu1 %v6032_v1  ;;  %v6127_v0 = vld [vmem:[#allocation8 + $0x1c4] ss:$16 sps:$4 sm:$0xff]   ;;  %v6130_v1 = vld [vmem:[#allocation8 + $0x1cc] ss:$16 sps:$4 sm:$0xff]  }
 0x153   : > { %1368 = vmatprep.subr.bf16.mxu0 %v6037_v2  ;;  %1450 = vmatprep.subr.bf16.mxu1 %v6040_v3  ;;  %v6125_v2 = vld [vmem:[#allocation8 + $0x1c0] ss:$16 sps:$4 sm:$0xff]   ;;  %v6128_v3 = vld [vmem:[#allocation8 + $0x1c8] ss:$16 sps:$4 sm:$0xff]  }
 0x156   : > { %1369 = vmatpush1.bf16.msra.mxu0 %v6035_v4  ;;  %1451 = vmatpush1.bf16.msra.mxu1 %v6038_v5  ;;  %v6133_v4 = vld [vmem:[#allocation8 + $0x1e4] ss:$16 sps:$4 sm:$0xff]   ;;  %v6136_v5 = vld [vmem:[#allocation8 + $0x1ec] ss:$16 sps:$4 sm:$0xff]  }
 0x157   : > { %2233 = vmatprep.subr.bf16.mxu0 %v6043_v7  ;;  %2315 = vmatprep.subr.bf16.mxu1 %v6046_v8  ;;  %v6134_v7 = vld [vmem:[#allocation8 + $0x1e8] ss:$16 sps:$4 sm:$0xff]   ;;  %v6139_v8 = vld [vmem:[#allocation8 + $0x204] ss:$16 sps:$4 sm:$0xff]  }
 0x159   : > { %1371 = vmatmul.mubr.bf16.vlgmr.msra.gmra.mrb[0].mxu0 %v505_v11  ;;  %1453 = vmatmul.mubr.bf16.vlgmr.msra.gmra.mrb[0].mxu1 %v505_v11 }
 0x15a   : > { %2234 = vmatpush1.bf16.msra.mxu0 %v6041_v9  ;;  %2316 = vmatpush1.bf16.msra.mxu1 %v6044_v10  ;;  %v6142_v9 = vld [vmem:[#allocation8 + $0x20c] ss:$16 sps:$4 sm:$0xff]   ;;  %v637_v10 = vlaneseq }
 0x15b   : > { %2235 = vmatprep.subr.bf16.mxu0 %v6049_v12  ;;  %2317 = vmatprep.subr.bf16.mxu1 %v6052_v13  ;;  %v7393_v13 = vld [vmem:[%s8316_s3] sm:$0xf] }
 0x15c   : > { %v7385_v11 = vshrl.u32 %v637_v10, 7  ;;  %v6200_v10 = vld [vmem:[#allocation8 + $0x348] ss:$16 sps:$4 sm:$0xff]  }
 0x15e   : > { %2236 = vmatpush1.bf16.msra.mxu0 %v6047_v14  ;;  %2318 = vmatpush1.bf16.msra.mxu1 %v6050_v15  ;;  %v7388_v12 = vsub.s32 0, %v7385_v11  ;;  %v7396_v14 = vsub.s32 1, %v7385_v11  ;;  %v7399_v15 = vsub.s32 3, %v7385_v11 }
 0x15f   : > { %2237 = vmatprep.subr.bf16.mxu0 %v6055_v16  ;;  %2319 = vmatprep.subr.bf16.mxu1 %v6058_v17 }
 0x160   : > { %8540 = vst [vmem:[#allocation20_spill] sm:$0xff] %v7388_v12  ;;  %8541 = vst [vmem:[#allocation21_spill] sm:$0xff] %v7396_v14  ;;  %v640_v16 = vrot.slane %v7393_v13, %v7388_v12  ;;  %v644_v17 = vrot.slane %v7393_v13, %v7396_v14  ;;  %v7600_v14 = vld [vmem:[#allocation10 + $0x1ec] ss:$16 sps:$4 sm:$0xff]   ;;  %v7604_v12 = vld [vmem:[#allocation10 + $0x1e0] ss:$16 sps:$4 sm:$0xff]  }
 0x161   : > { %8542 = vst [vmem:[#allocation22_spill] sm:$0xff] %v7399_v15  ;;  %8579 = vst [vmem:[#allocation59_spill] sm:$0xff] %v7600_v14 }
 0x162   : > { %2238 = vmatpush1.bf16.msra.mxu0 %v6053_v18  ;;  %2320 = vmatpush1.bf16.msra.mxu1 %v6056_v19  ;;  %v652_v18 = vrot.slane %v7393_v13, %v7399_v15  ;;  %v7594_v15 = vld [vmem:[#allocation10 + $0x1c8] ss:$16 sps:$4 sm:$0xff]   ;;  %8580 = vst [vmem:[#allocation60_spill] sm:$0xff] %v7604_v12 }
 0x163   : > { %2239 = vmatprep.subr.bf16.mxu0 %v6061_v20  ;;  %2321 = vmatprep.subr.bf16.mxu1 %v6064_v21  ;;  %8577 = vst [vmem:[#allocation57_spill] sm:$0xff] %v7594_v15 }
 0x166   : > { %2240 = vmatpush1.bf16.msra.mxu0 %v6059_v22  ;;  %2322 = vmatpush1.bf16.msra.mxu1 %v6062_v23 }
 0x167   : > { %2241 = vmatprep.subr.bf16.mxu0 %v6067_v24  ;;  %2323 = vmatprep.subr.bf16.mxu1 %v6070_v25 }
 0x16a   : > { %2242 = vmatpush1.bf16.msra.mxu0 %v6065_v26  ;;  %2324 = vmatpush1.bf16.msra.mxu1 %v6068_v27 }
 0x16b   : > { %2243 = vmatprep.subr.bf16.mxu0 %v6073_v28  ;;  %2325 = vmatprep.subr.bf16.mxu1 %v6076_v29 }
 0x16e   : > { %2244 = vmatpush1.bf16.msra.mxu0 %v6071_v30  ;;  %2326 = vmatpush1.bf16.msra.mxu1 %v6074_v31  ;;  %v6137_v31 = vld [vmem:[#allocation8 + $0x200] ss:$16 sps:$4 sm:$0xff]  }
 0x16f   : > { %2245 = vmatprep.subr.bf16.mxu0 %v6079_v32  ;;  %2327 = vmatprep.subr.bf16.mxu1 %v6082_v33  ;;  %v6140_v32 = vld [vmem:[#allocation8 + $0x208] ss:$16 sps:$4 sm:$0xff]  }
 0x172   : > { %2246 = vmatpush1.bf16.msra.mxu0 %v6077_v34  ;;  %2328 = vmatpush1.bf16.msra.mxu1 %v6080_v35  ;;  %v6145_v34 = vld [vmem:[#allocation8 + $0x224] ss:$16 sps:$4 sm:$0xff]   ;;  %v6148_v35 = vld [vmem:[#allocation8 + $0x22c] ss:$16 sps:$4 sm:$0xff]  }
 0x173   : > { %2247 = vmatprep.subr.bf16.mxu0 %v6085_v36  ;;  %2329 = vmatprep.subr.bf16.mxu1 %v6088_v37  ;;  %v6143_v37 = vld [vmem:[#allocation8 + $0x220] ss:$16 sps:$4 sm:$0xff]  }
 0x176   : > { %2248 = vmatpush1.bf16.msra.mxu0 %v6083_v38  ;;  %2330 = vmatpush1.bf16.msra.mxu1 %v6086_v39  ;;  %v6146_v38 = vld [vmem:[#allocation8 + $0x228] ss:$16 sps:$4 sm:$0xff]   ;;  %v6151_v39 = vld [vmem:[#allocation8 + $0x244] ss:$16 sps:$4 sm:$0xff]  }
 0x177   : > { %2249 = vmatprep.subr.bf16.mxu0 %v6091_v40  ;;  %2331 = vmatprep.subr.bf16.mxu1 %v6094_v41  ;;  %v6154_v40 = vld [vmem:[#allocation8 + $0x24c] ss:$16 sps:$4 sm:$0xff]   ;;  %v6149_v41 = vld [vmem:[#allocation8 + $0x240] ss:$16 sps:$4 sm:$0xff]  }
 0x17a   : > { %2250 = vmatpush1.bf16.msra.mxu0 %v6089_v42  ;;  %2332 = vmatpush1.bf16.msra.mxu1 %v6092_v43  ;;  %v6152_v42 = vld [vmem:[#allocation8 + $0x248] ss:$16 sps:$4 sm:$0xff]   ;;  %v6157_v43 = vld [vmem:[#allocation8 + $0x264] ss:$16 sps:$4 sm:$0xff]  }
 0x17b   : > { %2251 = vmatprep.subr.bf16.mxu0 %v6097_v44  ;;  %2333 = vmatprep.subr.bf16.mxu1 %v6100_v45  ;;  %v6160_v44 = vld [vmem:[#allocation8 + $0x26c] ss:$16 sps:$4 sm:$0xff]   ;;  %v6155_v45 = vld [vmem:[#allocation8 + $0x260] ss:$16 sps:$4 sm:$0xff]  }
 0x17e   : > { %2252 = vmatpush1.bf16.msra.mxu0 %v6095_v46  ;;  %2334 = vmatpush1.bf16.msra.mxu1 %v6098_v47  ;;  %v6158_v46 = vld [vmem:[#allocation8 + $0x268] ss:$16 sps:$4 sm:$0xff]   ;;  %v6163_v47 = vld [vmem:[#allocation8 + $0x284] ss:$16 sps:$4 sm:$0xff]  }
 0x17f   : > { %2253 = vmatprep.subr.bf16.mxu0 %v6103_v48  ;;  %2335 = vmatprep.subr.bf16.mxu1 %v6106_v49  ;;  %v6166_v48 = vld [vmem:[#allocation8 + $0x28c] ss:$16 sps:$4 sm:$0xff]   ;;  %v6161_v49 = vld [vmem:[#allocation8 + $0x280] ss:$16 sps:$4 sm:$0xff]  }
 0x182   : > { %2254 = vmatpush1.bf16.msra.mxu0 %v6101_v50  ;;  %2336 = vmatpush1.bf16.msra.mxu1 %v6104_v51  ;;  %v6164_v50 = vld [vmem:[#allocation8 + $0x288] ss:$16 sps:$4 sm:$0xff]   ;;  %v6169_v51 = vld [vmem:[#allocation8 + $0x2a4] ss:$16 sps:$4 sm:$0xff]  }
 0x183   : > { %2255 = vmatprep.subr.bf16.mxu0 %v6109_v52  ;;  %2337 = vmatprep.subr.bf16.mxu1 %v6112_v53  ;;  %v6172_v52 = vld [vmem:[#allocation8 + $0x2ac] ss:$16 sps:$4 sm:$0xff]   ;;  %v6167_v53 = vld [vmem:[#allocation8 + $0x2a0] ss:$16 sps:$4 sm:$0xff]  }
 0x186   : > { %2256 = vmatpush1.bf16.msra.mxu0 %v6107_v54  ;;  %2338 = vmatpush1.bf16.msra.mxu1 %v6110_v55  ;;  %v6170_v54 = vld [vmem:[#allocation8 + $0x2a8] ss:$16 sps:$4 sm:$0xff]   ;;  %v6175_v55 = vld [vmem:[#allocation8 + $0x2c4] ss:$16 sps:$4 sm:$0xff]  }
 0x187   : > { %2257 = vmatprep.subr.bf16.mxu0 %v6115_v56  ;;  %2339 = vmatprep.subr.bf16.mxu1 %v6118_v57  ;;  %v6178_v56 = vld [vmem:[#allocation8 + $0x2cc] ss:$16 sps:$4 sm:$0xff]   ;;  %v6173_v57 = vld [vmem:[#allocation8 + $0x2c0] ss:$16 sps:$4 sm:$0xff]  }
 0x18a   : > { %2258 = vmatpush1.bf16.msra.mxu0 %v6113_v58  ;;  %2340 = vmatpush1.bf16.msra.mxu1 %v6116_v59  ;;  %v6176_v58 = vld [vmem:[#allocation8 + $0x2c8] ss:$16 sps:$4 sm:$0xff]   ;;  %v6181_v59 = vld [vmem:[#allocation8 + $0x2e4] ss:$16 sps:$4 sm:$0xff]  }
 0x18b   : > { %2259 = vmatprep.subr.bf16.mxu0 %v6121_v60  ;;  %2341 = vmatprep.subr.bf16.mxu1 %v6124_v61  ;;  %v6184_v60 = vld [vmem:[#allocation8 + $0x2ec] ss:$16 sps:$4 sm:$0xff]   ;;  %v6179_v61 = vld [vmem:[#allocation8 + $0x2e0] ss:$16 sps:$4 sm:$0xff]  }
 0x18e   : > { %2260 = vmatpush1.bf16.msra.mxu0 %v6119_v62  ;;  %2342 = vmatpush1.bf16.msra.mxu1 %v6122_v63  ;;  %v6182_v62 = vld [vmem:[#allocation8 + $0x2e8] ss:$16 sps:$4 sm:$0xff]   ;;  %v6187_v63 = vld [vmem:[#allocation8 + $0x304] ss:$16 sps:$4 sm:$0xff]  }
 0x18f   : > { %2261 = vmatprep.subr.bf16.mxu0 %v6127_v0  ;;  %2343 = vmatprep.subr.bf16.mxu1 %v6130_v1  ;;  %v6190_v0 = vld [vmem:[#allocation8 + $0x30c] ss:$16 sps:$4 sm:$0xff]   ;;  %v6185_v1 = vld [vmem:[#allocation8 + $0x300] ss:$16 sps:$4 sm:$0xff]  }
 0x192   : > { %2262 = vmatpush1.bf16.msra.mxu0 %v6125_v2  ;;  %2344 = vmatpush1.bf16.msra.mxu1 %v6128_v3  ;;  %v6188_v2 = vld [vmem:[#allocation8 + $0x308] ss:$16 sps:$4 sm:$0xff]   ;;  %v6193_v3 = vld [vmem:[#allocation8 + $0x324] ss:$16 sps:$4 sm:$0xff]  }
 0x193   : > { %2263 = vmatprep.subr.bf16.mxu0 %v6133_v4  ;;  %2345 = vmatprep.subr.bf16.mxu1 %v6136_v5  ;;  %v6196_v4 = vld [vmem:[#allocation8 + $0x32c] ss:$16 sps:$4 sm:$0xff]   ;;  %v6191_v5 = vld [vmem:[#allocation8 + $0x320] ss:$16 sps:$4 sm:$0xff]  }
 0x196   : > { %2264 = vmatpush1.bf16.msra.mxu0 %v6131_v6  ;;  %2346 = vmatpush1.bf16.msra.mxu1 %v6134_v7  ;;  %v6194_v6 = vld [vmem:[#allocation8 + $0x328] ss:$16 sps:$4 sm:$0xff]   ;;  %v6199_v7 = vld [vmem:[#allocation8 + $0x344] ss:$16 sps:$4 sm:$0xff]  }
 0x197   : > { %2274 = vmatprep.subr.bf16.mxu0 %v6139_v8  ;;  %2356 = vmatprep.subr.bf16.mxu1 %v6142_v9  ;;  %v6202_v8 = vld [vmem:[#allocation8 + $0x34c] ss:$16 sps:$4 sm:$0xff]   ;;  %v6197_v9 = vld [vmem:[#allocation8 + $0x340] ss:$16 sps:$4 sm:$0xff]  }
 0x22c   : > { %v1372_v19 = vpop.f32.mrb[0].mxu0  ;;  %v7407_v20 = vpop.f32.mrb[0].mxu1 }
 0x22d   : > { %v5703_v21 = vadd.f32 %v1372_v19, %v640_v16  ;;  %v1374_v22 = vpop.f32.mrb[1].mxu0  ;;  %v1456_v23 = vpop.f32.mrb[1].mxu1  ;;  %v6205_v16 = vld [vmem:[#allocation8 + $0x364] ss:$16 sps:$4 sm:$0xff]   ;;  %v6206_v19 = vld [vmem:[#allocation8 + $0x368] ss:$16 sps:$4 sm:$0xff]  }
 0x22e   : > { %v5704_v24 = vadd.f32 %v1374_v22, %v644_v17  ;;  %v1376_v25 = vpop.f32.mrb[2].mxu0  ;;  %v1458_v26 = vpop.f32.mrb[2].mxu1  ;;  %v5706_v27 = vadd.f32 %v1456_v23, %v652_v18  ;;  %v6208_v17 = vld [vmem:[#allocation8 + $0x36c] ss:$16 sps:$4 sm:$0xff]   ;;  %v6203_v18 = vld [vmem:[#allocation8 + $0x360] ss:$16 sps:$4 sm:$0xff]  }
 0x22f   : > { %v1377_v28 = vpop.f32.mrb[3].mxu0  ;;  %v1459_v29 = vpop.f32.mrb[3].mxu1  ;;  %v1461_v33 = vpack.c.bf16 %v5703_v21, %v5703_v21  ;;  %v6211_v21 = vld [vmem:[#allocation8 + $0x384] ss:$16 sps:$4 sm:$0xff]   ;;  %v6214_v22 = vld [vmem:[#allocation8 + $0x38c] ss:$16 sps:$4 sm:$0xff]  }
 0x230   : > { %v1462_v30 = vpack.c.bf16 %v5704_v24, %v5704_v24  ;;  %v1464_v36 = vpack.c.bf16 %v5706_v27, %v5706_v27  ;;  %v6209_v23 = vld [vmem:[#allocation8 + $0x380] ss:$16 sps:$4 sm:$0xff]   ;;  %v6212_v24 = vld [vmem:[#allocation8 + $0x388] ss:$16 sps:$4 sm:$0xff]   ;;  %v6217_v25 = vld [vmem:[#allocation8 + $0x3a4] ss:$16 sps:$4 sm:$0xff]  }
 0x231   : > { %v6220_v26 = vld [vmem:[#allocation8 + $0x3ac] ss:$16 sps:$4 sm:$0xff]   ;;  %v6215_v27 = vld [vmem:[#allocation8 + $0x3a0] ss:$16 sps:$4 sm:$0xff]   ;;  %v6218_v28 = vld [vmem:[#allocation8 + $0x3a8] ss:$16 sps:$4 sm:$0xff]  }
 0x232   : > { %2265 = vmatprep.mubr.bf16.mxu0 %v1462_v30  ;;  %2347 = vmatprep.mubr.bf16.mxu1 %v1462_v30  ;;  %v7410_v29 = vsub.s32 2, %v7385_v11  ;;  %v6223_v30 = vld [vmem:[#allocation8 + $0x3c4] ss:$16 sps:$4 sm:$0xff]   ;;  %v6227_v11 = vld [vmem:[#allocation8 + $0x3e0] ss:$16 sps:$4 sm:$0xff]  }
 0x233   : > { %2266 = vmatmul.mubr.bf16.vlgmr.msra.gmra.mrb[4].mxu0 %v1461_v33  ;;  %2348 = vmatmul.mubr.bf16.vlgmr.msra.gmra.mrb[4].mxu1 %v1461_v33  ;;  %v6224_v33 = vld [vmem:[#allocation8 + $0x3c8] ss:$16 sps:$4 sm:$0xff]  }
 0x234   : > { %2275 = vmatpush1.bf16.msra.mxu0 %v6137_v31  ;;  %2357 = vmatpush1.bf16.msra.mxu1 %v6140_v32  ;;  %8543 = vst [vmem:[#allocation23_spill] sm:$0xff] %v7410_v29  ;;  %v6226_v31 = vld [vmem:[#allocation8 + $0x3cc] ss:$16 sps:$4 sm:$0xff]   ;;  %v6221_v32 = vld [vmem:[#allocation8 + $0x3c0] ss:$16 sps:$4 sm:$0xff]  }
 0x235   : > { %2306 = vmatprep.mubr.bf16.mxu0 %v1464_v36  ;;  %2388 = vmatprep.mubr.bf16.mxu1 %v1464_v36  ;;  %v6232_v36 = vld [vmem:[#allocation8 + $0x3ec] ss:$16 sps:$4 sm:$0xff]  }
 0x236   : > { %2276 = vmatprep.subr.bf16.mxu0 %v6145_v34  ;;  %2358 = vmatprep.subr.bf16.mxu1 %v6148_v35  ;;  %v648_v34 = vrot.slane %v7393_v13, %v7410_v29  ;;  %v6229_v35 = vld [vmem:[#allocation8 + $0x3e4] ss:$16 sps:$4 sm:$0xff]   ;;  %v7422_v13 = vld [vmem:[#allocation10] ss:$16 sps:$4 sm:$0xff]  }
 0x237   : > { %v7598_v29 = vld [vmem:[#allocation10 + $0x1e4] ss:$16 sps:$4 sm:$0xff]  }
 0x238   : > { %2277 = vmatpush1.bf16.msra.mxu0 %v6143_v37  ;;  %2359 = vmatpush1.bf16.msra.mxu1 %v6146_v38  ;;  %v6230_v37 = vld [vmem:[#allocation8 + $0x3e8] ss:$16 sps:$4 sm:$0xff]   ;;  %v5705_v38 = vadd.f32 %v7407_v20, %v648_v34  ;;  %v7428_v20 = vld [vmem:[#allocation10 + $0x24] ss:$16 sps:$4 sm:$0xff]   ;;  %8578 = vst [vmem:[#allocation58_spill] sm:$0xff] %v7598_v29 }
 0x239   : > { %2278 = vmatprep.subr.bf16.mxu0 %v6151_v39  ;;  %2360 = vmatprep.subr.bf16.mxu1 %v6154_v40  ;;  %v7415_v39 = vld [vmem:[#allocation10 + $0x4] ss:$16 sps:$4 sm:$0xff]   ;;  %v7417_v40 = vld [vmem:[#allocation10 + $0xc] ss:$16 sps:$4 sm:$0xff]   ;;  %v7570_v34 = vld [vmem:[#allocation10 + $0x188] ss:$16 sps:$4 sm:$0xff]  }
 0x23a   : > { %8569 = vst [vmem:[#allocation49_spill] sm:$0xff] %v7570_v34 }
 0x23c   : > { %2279 = vmatpush1.bf16.msra.mxu0 %v6149_v41  ;;  %2361 = vmatpush1.bf16.msra.mxu1 %v6152_v42  ;;  %v7420_v41 = vld [vmem:[%s7363_s25 + $0x8] sm:$0xff] }
 0x23d   : > { %2280 = vmatprep.subr.bf16.mxu0 %v6157_v43  ;;  %2362 = vmatprep.subr.bf16.mxu1 %v6160_v44  ;;  %8544 = vst [vmem:[#allocation24_spill] sm:$0xff] %v7420_v41  ;;  %v7424_v42 = vld [vmem:[#allocation10 + $0x8] ss:$16 sps:$4 sm:$0xff]   ;;  %v1463_v43 = vpack.c.bf16 %v5705_v38, %v5705_v38  ;;  %v7430_v44 = vld [vmem:[#allocation10 + $0x2c] ss:$16 sps:$4 sm:$0xff]  }
 0x23e   : > { %v7586_v38 = vld [vmem:[#allocation10 + $0x1c4] ss:$16 sps:$4 sm:$0xff]  }
 0x23f   : > { %8574 = vst [vmem:[#allocation54_spill] sm:$0xff] %v7586_v38 }
 0x240   : > { %2281 = vmatpush1.bf16.msra.mxu0 %v6155_v45  ;;  %2363 = vmatpush1.bf16.msra.mxu1 %v6158_v46  ;;  %v2602_v45 = vpack.c.bf16 %v7420_v41, %v7420_v41  ;;  %v7436_v46 = vld [vmem:[#allocation10 + $0x20] ss:$16 sps:$4 sm:$0xff]   ;;  %v7606_v41 = vld [vmem:[#allocation10 + $0x1e8] ss:$16 sps:$4 sm:$0xff]  }
 0x241   : > { %2282 = vmatprep.subr.bf16.mxu0 %v6163_v47  ;;  %2364 = vmatprep.subr.bf16.mxu1 %v6166_v48  ;;  %v7438_v47 = vld [vmem:[#allocation10 + $0x28] ss:$16 sps:$4 sm:$0xff]   ;;  %v7442_v48 = vld [vmem:[#allocation10 + $0x44] ss:$16 sps:$4 sm:$0xff]   ;;  %8581 = vst [vmem:[#allocation61_spill] sm:$0xff] %v7606_v41 }
 0x244   : > { %2283 = vmatpush1.bf16.msra.mxu0 %v6161_v49  ;;  %2365 = vmatpush1.bf16.msra.mxu1 %v6164_v50  ;;  %v7444_v49 = vld [vmem:[#allocation10 + $0x4c] ss:$16 sps:$4 sm:$0xff]   ;;  %v7448_v50 = vld [vmem:[#allocation10 + $0x40] ss:$16 sps:$4 sm:$0xff]  }
 0x245   : > { %2284 = vmatprep.subr.bf16.mxu0 %v6169_v51  ;;  %2366 = vmatprep.subr.bf16.mxu1 %v6172_v52  ;;  %v7450_v51 = vld [vmem:[#allocation10 + $0x48] ss:$16 sps:$4 sm:$0xff]   ;;  %v7454_v52 = vld [vmem:[#allocation10 + $0x64] ss:$16 sps:$4 sm:$0xff]  }
 0x248   : > { %2285 = vmatpush1.bf16.msra.mxu0 %v6167_v53  ;;  %2367 = vmatpush1.bf16.msra.mxu1 %v6170_v54  ;;  %v7456_v53 = vld [vmem:[#allocation10 + $0x6c] ss:$16 sps:$4 sm:$0xff]   ;;  %v7460_v54 = vld [vmem:[#allocation10 + $0x60] ss:$16 sps:$4 sm:$0xff]  }
 0x249   : > { %2286 = vmatprep.subr.bf16.mxu0 %v6175_v55  ;;  %2368 = vmatprep.subr.bf16.mxu1 %v6178_v56  ;;  %v7462_v55 = vld [vmem:[#allocation10 + $0x68] ss:$16 sps:$4 sm:$0xff]   ;;  %v7466_v56 = vld [vmem:[#allocation10 + $0x84] ss:$16 sps:$4 sm:$0xff]  }
 0x24c   : > { %2287 = vmatpush1.bf16.msra.mxu0 %v6173_v57  ;;  %2369 = vmatpush1.bf16.msra.mxu1 %v6176_v58  ;;  %v7468_v57 = vld [vmem:[#allocation10 + $0x8c] ss:$16 sps:$4 sm:$0xff]   ;;  %v7472_v58 = vld [vmem:[#allocation10 + $0x80] ss:$16 sps:$4 sm:$0xff]  }
 0x24d   : > { %2288 = vmatprep.subr.bf16.mxu0 %v6181_v59  ;;  %2370 = vmatprep.subr.bf16.mxu1 %v6184_v60  ;;  %v7474_v59 = vld [vmem:[#allocation10 + $0x88] ss:$16 sps:$4 sm:$0xff]   ;;  %v7478_v60 = vld [vmem:[#allocation10 + $0xa4] ss:$16 sps:$4 sm:$0xff]  }
 0x250   : > { %2289 = vmatpush1.bf16.msra.mxu0 %v6179_v61  ;;  %2371 = vmatpush1.bf16.msra.mxu1 %v6182_v62  ;;  %v7480_v61 = vld [vmem:[#allocation10 + $0xac] ss:$16 sps:$4 sm:$0xff]   ;;  %v7484_v62 = vld [vmem:[#allocation10 + $0xa0] ss:$16 sps:$4 sm:$0xff]  }
 0x251   : > { %2290 = vmatprep.subr.bf16.mxu0 %v6187_v63  ;;  %2372 = vmatprep.subr.bf16.mxu1 %v6190_v0  ;;  %v7486_v63 = vld [vmem:[#allocation10 + $0xa8] ss:$16 sps:$4 sm:$0xff]   ;;  %v7490_v0 = vld [vmem:[#allocation10 + $0xc4] ss:$16 sps:$4 sm:$0xff]  }
 0x254   : > { %2291 = vmatpush1.bf16.msra.mxu0 %v6185_v1  ;;  %2373 = vmatpush1.bf16.msra.mxu1 %v6188_v2  ;;  %v7492_v1 = vld [vmem:[#allocation10 + $0xcc] ss:$16 sps:$4 sm:$0xff]   ;;  %v7496_v2 = vld [vmem:[#allocation10 + $0xc0] ss:$16 sps:$4 sm:$0xff]  }
 0x255   : > { %2292 = vmatprep.subr.bf16.mxu0 %v6193_v3  ;;  %2374 = vmatprep.subr.bf16.mxu1 %v6196_v4  ;;  %v7498_v3 = vld [vmem:[#allocation10 + $0xc8] ss:$16 sps:$4 sm:$0xff]   ;;  %v7502_v4 = vld [vmem:[#allocation10 + $0xe4] ss:$16 sps:$4 sm:$0xff]  }
 0x256   : > { %8545 = vst [vmem:[#allocation25_spill] sm:$0xff] %v7498_v3  ;;  %8546 = vst [vmem:[#allocation26_spill] sm:$0xff] %v7502_v4 }
 0x258   : > { %2293 = vmatpush1.bf16.msra.mxu0 %v6191_v5  ;;  %2375 = vmatpush1.bf16.msra.mxu1 %v6194_v6  ;;  %v7504_v5 = vld [vmem:[#allocation10 + $0xec] ss:$16 sps:$4 sm:$0xff]   ;;  %v7508_v6 = vld [vmem:[#allocation10 + $0xe0] ss:$16 sps:$4 sm:$0xff]  }
 0x259   : > { %2294 = vmatprep.subr.bf16.mxu0 %v6199_v7  ;;  %2376 = vmatprep.subr.bf16.mxu1 %v6202_v8  ;;  %8547 = vst [vmem:[#allocation27_spill] sm:$0xff] %v7504_v5  ;;  %8548 = vst [vmem:[#allocation28_spill] sm:$0xff] %v7508_v6  ;;  %v7510_v7 = vld [vmem:[#allocation10 + $0xe8] ss:$16 sps:$4 sm:$0xff]   ;;  %v7514_v8 = vld [vmem:[#allocation10 + $0x104] ss:$16 sps:$4 sm:$0xff]  }
 0x25a   : > { %8549 = vst [vmem:[#allocation29_spill] sm:$0xff] %v7510_v7  ;;  %8550 = vst [vmem:[#allocation30_spill] sm:$0xff] %v7514_v8 }
 0x25c   : > { %2295 = vmatpush1.bf16.msra.mxu0 %v6197_v9  ;;  %2377 = vmatpush1.bf16.msra.mxu1 %v6200_v10  ;;  %v7516_v9 = vld [vmem:[#allocation10 + $0x10c] ss:$16 sps:$4 sm:$0xff]   ;;  %v7520_v10 = vld [vmem:[#allocation10 + $0x100] ss:$16 sps:$4 sm:$0xff]  }
 0x25d   : > { %2296 = vmatprep.subr.bf16.mxu0 %v6205_v16  ;;  %2378 = vmatprep.subr.bf16.mxu1 %v6208_v17  ;;  %8551 = vst [vmem:[#allocation31_spill] sm:$0xff] %v7516_v9  ;;  %8552 = vst [vmem:[#allocation32_spill] sm:$0xff] %v7520_v10  ;;  %v7522_v16 = vld [vmem:[#allocation10 + $0x108] ss:$16 sps:$4 sm:$0xff]   ;;  %v7526_v17 = vld [vmem:[#allocation10 + $0x124] ss:$16 sps:$4 sm:$0xff]  }
 0x25e   : > { %8553 = vst [vmem:[#allocation33_spill] sm:$0xff] %v7522_v16  ;;  %8554 = vst [vmem:[#allocation34_spill] sm:$0xff] %v7526_v17 }
 0x260   : > { %2297 = vmatpush1.bf16.msra.mxu0 %v6203_v18  ;;  %2379 = vmatpush1.bf16.msra.mxu1 %v6206_v19  ;;  %v7528_v18 = vld [vmem:[#allocation10 + $0x12c] ss:$16 sps:$4 sm:$0xff]   ;;  %v7532_v19 = vld [vmem:[#allocation10 + $0x120] ss:$16 sps:$4 sm:$0xff]  }
 0x261   : > { %2298 = vmatprep.subr.bf16.mxu0 %v6211_v21  ;;  %2380 = vmatprep.subr.bf16.mxu1 %v6214_v22  ;;  %8555 = vst [vmem:[#allocation35_spill] sm:$0xff] %v7528_v18  ;;  %8556 = vst [vmem:[#allocation36_spill] sm:$0xff] %v7532_v19  ;;  %v7534_v21 = vld [vmem:[#allocation10 + $0x128] ss:$16 sps:$4 sm:$0xff]   ;;  %v7538_v22 = vld [vmem:[#allocation10 + $0x144] ss:$16 sps:$4 sm:$0xff]  }
 0x262   : > { %8557 = vst [vmem:[#allocation37_spill] sm:$0xff] %v7534_v21  ;;  %8558 = vst [vmem:[#allocation38_spill] sm:$0xff] %v7538_v22 }
 0x264   : > { %2299 = vmatpush1.bf16.msra.mxu0 %v6209_v23  ;;  %2381 = vmatpush1.bf16.msra.mxu1 %v6212_v24  ;;  %v7540_v23 = vld [vmem:[#allocation10 + $0x14c] ss:$16 sps:$4 sm:$0xff]   ;;  %v7544_v24 = vld [vmem:[#allocation10 + $0x140] ss:$16 sps:$4 sm:$0xff]  }
 0x265   : > { %2300 = vmatprep.subr.bf16.mxu0 %v6217_v25  ;;  %2382 = vmatprep.subr.bf16.mxu1 %v6220_v26  ;;  %8559 = vst [vmem:[#allocation39_spill] sm:$0xff] %v7540_v23  ;;  %8560 = vst [vmem:[#allocation40_spill] sm:$0xff] %v7544_v24  ;;  %v7546_v25 = vld [vmem:[#allocation10 + $0x148] ss:$16 sps:$4 sm:$0xff]   ;;  %v7550_v26 = vld [vmem:[#allocation10 + $0x164] ss:$16 sps:$4 sm:$0xff]  }
 0x266   : > { %8561 = vst [vmem:[#allocation41_spill] sm:$0xff] %v7546_v25  ;;  %8562 = vst [vmem:[#allocation42_spill] sm:$0xff] %v7550_v26 }
 0x268   : > { %2301 = vmatpush1.bf16.msra.mxu0 %v6215_v27  ;;  %2383 = vmatpush1.bf16.msra.mxu1 %v6218_v28  ;;  %v7552_v27 = vld [vmem:[#allocation10 + $0x16c] ss:$16 sps:$4 sm:$0xff]   ;;  %v7556_v28 = vld [vmem:[#allocation10 + $0x160] ss:$16 sps:$4 sm:$0xff]  }
 0x269   : > { %2302 = vmatprep.subr.bf16.mxu0 %v6223_v30  ;;  %2384 = vmatprep.subr.bf16.mxu1 %v6226_v31  ;;  %8563 = vst [vmem:[#allocation43_spill] sm:$0xff] %v7552_v27  ;;  %8564 = vst [vmem:[#allocation44_spill] sm:$0xff] %v7556_v28  ;;  %v7558_v30 = vld [vmem:[#allocation10 + $0x168] ss:$16 sps:$4 sm:$0xff]   ;;  %v7562_v31 = vld [vmem:[#allocation10 + $0x184] ss:$16 sps:$4 sm:$0xff]  }
 0x26a   : > { %8565 = vst [vmem:[#allocation45_spill] sm:$0xff] %v7558_v30  ;;  %8566 = vst [vmem:[#allocation46_spill] sm:$0xff] %v7562_v31 }
 0x26c   : > { %2303 = vmatpush1.bf16.msra.mxu0 %v6221_v32  ;;  %2385 = vmatpush1.bf16.msra.mxu1 %v6224_v33  ;;  %v7564_v32 = vld [vmem:[#allocation10 + $0x18c] ss:$16 sps:$4 sm:$0xff]   ;;  %v7568_v33 = vld [vmem:[#allocation10 + $0x180] ss:$16 sps:$4 sm:$0xff]  }
 0x26d   : > { %2304 = vmatprep.subr.bf16.mxu0 %v6229_v35  ;;  %2386 = vmatprep.subr.bf16.mxu1 %v6232_v36  ;;  %8567 = vst [vmem:[#allocation47_spill] sm:$0xff] %v7564_v32  ;;  %8568 = vst [vmem:[#allocation48_spill] sm:$0xff] %v7568_v33  ;;  %v7574_v35 = vld [vmem:[#allocation10 + $0x1a4] ss:$16 sps:$4 sm:$0xff]   ;;  %v7576_v36 = vld [vmem:[#allocation10 + $0x1ac] ss:$16 sps:$4 sm:$0xff]  }
 0x26e   : > { %8570 = vst [vmem:[#allocation50_spill] sm:$0xff] %v7574_v35  ;;  %8571 = vst [vmem:[#allocation51_spill] sm:$0xff] %v7576_v36 }
 0x270   : > { %2305 = vmatpush1.bf16.msra.mxu0 %v6227_v11  ;;  %2387 = vmatpush1.bf16.msra.mxu1 %v6230_v37  ;;  %v7580_v11 = vld [vmem:[#allocation10 + $0x1a0] ss:$16 sps:$4 sm:$0xff]   ;;  %v7582_v37 = vld [vmem:[#allocation10 + $0x1a8] ss:$16 sps:$4 sm:$0xff]  }
 0x271   : > { %3245 = vmatprep.subr.bf16.mxu0 %v7415_v39  ;;  %3327 = vmatprep.subr.bf16.mxu1 %v7417_v40  ;;  %8572 = vst [vmem:[#allocation52_spill] sm:$0xff] %v7580_v11  ;;  %8573 = vst [vmem:[#allocation53_spill] sm:$0xff] %v7582_v37 }
 0x273   : > { %2307 = vmatmul.mubr.bf16.vlgmr.msra.gmra.mrb[4].mxu0 %v1463_v43  ;;  %2389 = vmatmul.mubr.bf16.vlgmr.msra.gmra.mrb[4].mxu1 %v1463_v43  ;;  %v7588_v43 = vld [vmem:[#allocation10 + $0x1cc] ss:$16 sps:$4 sm:$0xff]  }
 0x274   : > { %3246 = vmatpush1.bf16.msra.mxu0 %v7422_v13  ;;  %3328 = vmatpush1.bf16.msra.mxu1 %v7424_v42  ;;  %8575 = vst [vmem:[#allocation55_spill] sm:$0xff] %v7588_v43 }
 0x275   : > { %3247 = vmatprep.subr.bf16.mxu0 %v7428_v20  ;;  %3329 = vmatprep.subr.bf16.mxu1 %v7430_v44 }
 0x276   : > { %3277 = vmatprep.mubr.bf16.mxu0 %v2602_v45  ;;  %3359 = vmatprep.mubr.bf16.mxu1 %v2602_v45  ;;  %v7592_v45 = vld [vmem:[#allocation10 + $0x1c0] ss:$16 sps:$4 sm:$0xff]  }
 0x277   : > { %8576 = vst [vmem:[#allocation56_spill] sm:$0xff] %v7592_v45 }
 0x278   : > { %3248 = vmatpush1.bf16.msra.mxu0 %v7436_v46  ;;  %3330 = vmatpush1.bf16.msra.mxu1 %v7438_v47 }
 0x279   : > { %3249 = vmatprep.subr.bf16.mxu0 %v7442_v48  ;;  %3331 = vmatprep.subr.bf16.mxu1 %v7444_v49 }
 0x27c   : > { %3250 = vmatpush1.bf16.msra.mxu0 %v7448_v50  ;;  %3332 = vmatpush1.bf16.msra.mxu1 %v7450_v51 }
 0x27d   : > { %3251 = vmatprep.subr.bf16.mxu0 %v7454_v52  ;;  %3333 = vmatprep.subr.bf16.mxu1 %v7456_v53 }
 0x280   : > { %3252 = vmatpush1.bf16.msra.mxu0 %v7460_v54  ;;  %3334 = vmatpush1.bf16.msra.mxu1 %v7462_v55 }
 0x281   : > { %3253 = vmatprep.subr.bf16.mxu0 %v7466_v56  ;;  %3335 = vmatprep.subr.bf16.mxu1 %v7468_v57 }
 0x284   : > { %3254 = vmatpush1.bf16.msra.mxu0 %v7472_v58  ;;  %3336 = vmatpush1.bf16.msra.mxu1 %v7474_v59 }
 0x285   : > { %3255 = vmatprep.subr.bf16.mxu0 %v7478_v60  ;;  %3337 = vmatprep.subr.bf16.mxu1 %v7480_v61 }
 0x288   : > { %3256 = vmatpush1.bf16.msra.mxu0 %v7484_v62  ;;  %3338 = vmatpush1.bf16.msra.mxu1 %v7486_v63 }
 0x289   : > { %3257 = vmatprep.subr.bf16.mxu0 %v7490_v0  ;;  %3339 = vmatprep.subr.bf16.mxu1 %v7492_v1 }
 0x28c   : > { %3258 = vmatpush1.bf16.msra.mxu0 %v7496_v2  ;;  %3340 = vmatpush1.bf16.msra.mxu1 %v7498_v3 }
 0x28d   : > { %3259 = vmatprep.subr.bf16.mxu0 %v7502_v4  ;;  %3341 = vmatprep.subr.bf16.mxu1 %v7504_v5 }
 0x290   : > { %3260 = vmatpush1.bf16.msra.mxu0 %v7508_v6  ;;  %3342 = vmatpush1.bf16.msra.mxu1 %v7510_v7 }
 0x291   : > { %3261 = vmatprep.subr.bf16.mxu0 %v7514_v8  ;;  %3343 = vmatprep.subr.bf16.mxu1 %v7516_v9 }
 0x294   : > { %3262 = vmatpush1.bf16.msra.mxu0 %v7520_v10  ;;  %3344 = vmatpush1.bf16.msra.mxu1 %v7522_v16 }
 0x295   : > { %3263 = vmatprep.subr.bf16.mxu0 %v7526_v17  ;;  %3345 = vmatprep.subr.bf16.mxu1 %v7528_v18 }
 0x298   : > { %3264 = vmatpush1.bf16.msra.mxu0 %v7532_v19  ;;  %3346 = vmatpush1.bf16.msra.mxu1 %v7534_v21 }
 0x299   : > { %3265 = vmatprep.subr.bf16.mxu0 %v7538_v22  ;;  %3347 = vmatprep.subr.bf16.mxu1 %v7540_v23 }
 0x29c   : > { %3266 = vmatpush1.bf16.msra.mxu0 %v7544_v24  ;;  %3348 = vmatpush1.bf16.msra.mxu1 %v7546_v25 }
 0x29d   : > { %3267 = vmatprep.subr.bf16.mxu0 %v7550_v26  ;;  %3349 = vmatprep.subr.bf16.mxu1 %v7552_v27 }
 0x2a0   : > { %3268 = vmatpush1.bf16.msra.mxu0 %v7556_v28  ;;  %3350 = vmatpush1.bf16.msra.mxu1 %v7558_v30 }
 0x2a1   : > { %3269 = vmatprep.subr.bf16.mxu0 %v7562_v31  ;;  %3351 = vmatprep.subr.bf16.mxu1 %v7564_v32 }
 0x2a4   : > { %3270 = vmatpush1.bf16.msra.mxu0 %v7568_v33  ;;  %3352 = vmatpush1.bf16.msra.mxu1 %v7570_v34 }
 0x2a5   : > { %3271 = vmatprep.subr.bf16.mxu0 %v7574_v35  ;;  %3353 = vmatprep.subr.bf16.mxu1 %v7576_v36  ;;  %v7626_v36 = vld [vmem:[#allocation10 + $0x208] ss:$16 sps:$4 sm:$0xff]  }
 0x2a6   : > { %8587 = vst [vmem:[#allocation67_spill] sm:$0xff] %v7626_v36 }
 0x2a8   : > { %3272 = vmatpush1.bf16.msra.mxu0 %v7580_v11  ;;  %3354 = vmatpush1.bf16.msra.mxu1 %v7582_v37  ;;  %v7609_v37 = vld [vmem:[%s7363_s25] sm:$0xff] }
 0x2a9   : > { %3273 = vmatprep.subr.bf16.mxu0 %v7586_v38  ;;  %3355 = vmatprep.subr.bf16.mxu1 %v7588_v43  ;;  %8582 = vst [vmem:[#allocation62_spill] sm:$0xff] %v7609_v37  ;;  %v7613_v38 = vld [vmem:[#allocation10 + $0x204] ss:$16 sps:$4 sm:$0xff]   ;;  %v7615_v43 = vld [vmem:[#allocation10 + $0x20c] ss:$16 sps:$4 sm:$0xff]   ;;  %v2601_v11 = vpack.c.bf16 %v7609_v37, %v7609_v37 }
 0x2aa   : > { %8583 = vst [vmem:[#allocation63_spill] sm:$0xff] %v7613_v38  ;;  %8584 = vst [vmem:[#allocation64_spill] sm:$0xff] %v7615_v43 }
 0x2ac   : > { %3274 = vmatpush1.bf16.msra.mxu0 %v7592_v45  ;;  %3356 = vmatpush1.bf16.msra.mxu1 %v7594_v15  ;;  %v7620_v45 = vld [vmem:[%s7363_s25 + $0x18] sm:$0xff]  ;;  %v7624_v15 = vld [vmem:[#allocation10 + $0x200] ss:$16 sps:$4 sm:$0xff]  }
 0x2ad   : > { %3275 = vmatprep.subr.bf16.mxu0 %v7598_v29  ;;  %3357 = vmatprep.subr.bf16.mxu1 %v7600_v14  ;;  %8585 = vst [vmem:[#allocation65_spill] sm:$0xff] %v7620_v45  ;;  %8586 = vst [vmem:[#allocation66_spill] sm:$0xff] %v7624_v15  ;;  %v7630_v14 = vld [vmem:[#allocation10 + $0x224] ss:$16 sps:$4 sm:$0xff]   ;;  %v7632_v29 = vld [vmem:[#allocation10 + $0x22c] ss:$16 sps:$4 sm:$0xff]   ;;  %v2604_v37 = vpack.c.bf16 %v7620_v45, %v7620_v45 }
 0x2ae   : > { %8588 = vst [vmem:[#allocation68_spill] sm:$0xff] %v7630_v14  ;;  %8589 = vst [vmem:[#allocation69_spill] sm:$0xff] %v7632_v29  ;;  %v7652_v45 = vld [vmem:[#allocation10 + $0x248] ss:$16 sps:$4 sm:$0xff]  }
 0x2af   : > { %8595 = vst [vmem:[#allocation75_spill] sm:$0xff] %v7652_v45 }
 0x2b0   : > { %3276 = vmatpush1.bf16.msra.mxu0 %v7604_v12  ;;  %3358 = vmatpush1.bf16.msra.mxu1 %v7606_v41  ;;  %v7638_v41 = vld [vmem:[#allocation10 + $0x220] ss:$16 sps:$4 sm:$0xff]   ;;  %v7640_v12 = vld [vmem:[#allocation10 + $0x228] ss:$16 sps:$4 sm:$0xff]  }
 0x2b1   : > { %3286 = vmatprep.subr.bf16.mxu0 %v7613_v38  ;;  %3368 = vmatprep.subr.bf16.mxu1 %v7615_v43  ;;  %8590 = vst [vmem:[#allocation70_spill] sm:$0xff] %v7638_v41  ;;  %8591 = vst [vmem:[#allocation71_spill] sm:$0xff] %v7640_v12  ;;  %v7644_v43 = vld [vmem:[#allocation10 + $0x244] ss:$16 sps:$4 sm:$0xff]   ;;  %v7646_v38 = vld [vmem:[#allocation10 + $0x24c] ss:$16 sps:$4 sm:$0xff]  }
 0x2b2   : > { %8592 = vst [vmem:[#allocation72_spill] sm:$0xff] %v7644_v43  ;;  %8593 = vst [vmem:[#allocation73_spill] sm:$0xff] %v7646_v38 }
 0x2b3   : > { %3278 = vmatmul.mubr.bf16.vlgmr.msra.gmra.mrb[8].mxu0 %v2601_v11  ;;  %3360 = vmatmul.mubr.bf16.vlgmr.msra.gmra.mrb[8].mxu1 %v2601_v11  ;;  %v7650_v11 = vld [vmem:[#allocation10 + $0x240] ss:$16 sps:$4 sm:$0xff]  }
 0x2b4   : > { %3287 = vmatpush1.bf16.msra.mxu0 %v7624_v15  ;;  %3369 = vmatpush1.bf16.msra.mxu1 %v7626_v36  ;;  %8594 = vst [vmem:[#allocation74_spill] sm:$0xff] %v7650_v11 }
 0x2b5   : > { %3288 = vmatprep.subr.bf16.mxu0 %v7630_v14  ;;  %3370 = vmatprep.subr.bf16.mxu1 %v7632_v29  ;;  %v7656_v14 = vld [vmem:[#allocation10 + $0x264] ss:$16 sps:$4 sm:$0xff]   ;;  %v7658_v29 = vld [vmem:[#allocation10 + $0x26c] ss:$16 sps:$4 sm:$0xff]  }
 0x2b6   : > { %3318 = vmatprep.mubr.bf16.mxu0 %v2604_v37  ;;  %3400 = vmatprep.mubr.bf16.mxu1 %v2604_v37  ;;  %8596 = vst [vmem:[#allocation76_spill] sm:$0xff] %v7656_v14  ;;  %8597 = vst [vmem:[#allocation77_spill] sm:$0xff] %v7658_v29  ;;  %v7662_v37 = vld [vmem:[#allocation10 + $0x260] ss:$16 sps:$4 sm:$0xff]  }
 0x2b7   : > { %8598 = vst [vmem:[#allocation78_spill] sm:$0xff] %v7662_v37 }
 0x2b8   : > { %3289 = vmatpush1.bf16.msra.mxu0 %v7638_v41  ;;  %3371 = vmatpush1.bf16.msra.mxu1 %v7640_v12  ;;  %v7664_v41 = vld [vmem:[#allocation10 + $0x268] ss:$16 sps:$4 sm:$0xff]   ;;  %v7668_v12 = vld [vmem:[#allocation10 + $0x284] ss:$16 sps:$4 sm:$0xff]  }
 0x2b9   : > { %3290 = vmatprep.subr.bf16.mxu0 %v7644_v43  ;;  %3372 = vmatprep.subr.bf16.mxu1 %v7646_v38  ;;  %8599 = vst [vmem:[#allocation79_spill] sm:$0xff] %v7664_v41  ;;  %8600 = vst [vmem:[#allocation80_spill] sm:$0xff] %v7668_v12  ;;  %v7670_v43 = vld [vmem:[#allocation10 + $0x28c] ss:$16 sps:$4 sm:$0xff]   ;;  %v7674_v38 = vld [vmem:[#allocation10 + $0x280] ss:$16 sps:$4 sm:$0xff]  }
 0x2ba   : > { %8601 = vst [vmem:[#allocation81_spill] sm:$0xff] %v7670_v43  ;;  %8602 = vst [vmem:[#allocation82_spill] sm:$0xff] %v7674_v38 }
 0x2bc   : > { %3291 = vmatpush1.bf16.msra.mxu0 %v7650_v11  ;;  %3373 = vmatpush1.bf16.msra.mxu1 %v7652_v45  ;;  %v7676_v11 = vld [vmem:[#allocation10 + $0x288] ss:$16 sps:$4 sm:$0xff]   ;;  %v7680_v45 = vld [vmem:[#allocation10 + $0x2a4] ss:$16 sps:$4 sm:$0xff]  }
 0x2bd   : > { %3292 = vmatprep.subr.bf16.mxu0 %v7656_v14  ;;  %3374 = vmatprep.subr.bf16.mxu1 %v7658_v29  ;;  %8603 = vst [vmem:[#allocation83_spill] sm:$0xff] %v7676_v11  ;;  %8604 = vst [vmem:[#allocation84_spill] sm:$0xff] %v7680_v45  ;;  %v7682_v14 = vld [vmem:[#allocation10 + $0x2ac] ss:$16 sps:$4 sm:$0xff]   ;;  %v7686_v29 = vld [vmem:[#allocation10 + $0x2a0] ss:$16 sps:$4 sm:$0xff]  }
 0x2be   : > { %8605 = vst [vmem:[#allocation85_spill] sm:$0xff] %v7682_v14  ;;  %8606 = vst [vmem:[#allocation86_spill] sm:$0xff] %v7686_v29 }
 0x2c0   : > { %3293 = vmatpush1.bf16.msra.mxu0 %v7662_v37  ;;  %3375 = vmatpush1.bf16.msra.mxu1 %v7664_v41  ;;  %v7688_v37 = vld [vmem:[#allocation10 + $0x2a8] ss:$16 sps:$4 sm:$0xff]   ;;  %v7692_v41 = vld [vmem:[#allocation10 + $0x2c4] ss:$16 sps:$4 sm:$0xff]  }
 0x2c1   : > { %3294 = vmatprep.subr.bf16.mxu0 %v7668_v12  ;;  %3376 = vmatprep.subr.bf16.mxu1 %v7670_v43  ;;  %8607 = vst [vmem:[#allocation87_spill] sm:$0xff] %v7688_v37  ;;  %8608 = vst [vmem:[#allocation88_spill] sm:$0xff] %v7692_v41  ;;  %v7694_v12 = vld [vmem:[#allocation10 + $0x2cc] ss:$16 sps:$4 sm:$0xff]   ;;  %v7698_v43 = vld [vmem:[#allocation10 + $0x2c0] ss:$16 sps:$4 sm:$0xff]  }
 0x2c2   : > { %8609 = vst [vmem:[#allocation89_spill] sm:$0xff] %v7694_v12  ;;  %8610 = vst [vmem:[#allocation90_spill] sm:$0xff] %v7698_v43 }
 0x2c4   : > { %3295 = vmatpush1.bf16.msra.mxu0 %v7674_v38  ;;  %3377 = vmatpush1.bf16.msra.mxu1 %v7676_v11  ;;  %v7700_v38 = vld [vmem:[#allocation10 + $0x2c8] ss:$16 sps:$4 sm:$0xff]   ;;  %v7704_v11 = vld [vmem:[#allocation10 + $0x2e4] ss:$16 sps:$4 sm:$0xff]  }
 0x2c5   : > { %3296 = vmatprep.subr.bf16.mxu0 %v7680_v45  ;;  %3378 = vmatprep.subr.bf16.mxu1 %v7682_v14  ;;  %8611 = vst [vmem:[#allocation91_spill] sm:$0xff] %v7700_v38  ;;  %8612 = vst [vmem:[#allocation92_spill] sm:$0xff] %v7704_v11  ;;  %v7706_v45 = vld [vmem:[#allocation10 + $0x2ec] ss:$16 sps:$4 sm:$0xff]   ;;  %v7710_v14 = vld [vmem:[#allocation10 + $0x2e0] ss:$16 sps:$4 sm:$0xff]  }
 0x2c6   : > { %8613 = vst [vmem:[#allocation93_spill] sm:$0xff] %v7706_v45  ;;  %8614 = vst [vmem:[#allocation94_spill] sm:$0xff] %v7710_v14 }
 0x2c8   : > { %3297 = vmatpush1.bf16.msra.mxu0 %v7686_v29  ;;  %3379 = vmatpush1.bf16.msra.mxu1 %v7688_v37  ;;  %v7712_v29 = vld [vmem:[#allocation10 + $0x2e8] ss:$16 sps:$4 sm:$0xff]   ;;  %v7716_v37 = vld [vmem:[#allocation10 + $0x304] ss:$16 sps:$4 sm:$0xff]  }
 0x2c9   : > { %3298 = vmatprep.subr.bf16.mxu0 %v7692_v41  ;;  %3380 = vmatprep.subr.bf16.mxu1 %v7694_v12  ;;  %8615 = vst [vmem:[#allocation95_spill] sm:$0xff] %v7712_v29  ;;  %8616 = vst [vmem:[#allocation96_spill] sm:$0xff] %v7716_v37  ;;  %v7718_v41 = vld [vmem:[#allocation10 + $0x30c] ss:$16 sps:$4 sm:$0xff]   ;;  %v7722_v12 = vld [vmem:[#allocation10 + $0x300] ss:$16 sps:$4 sm:$0xff]  }
 0x2ca   : > { %8617 = vst [vmem:[#allocation97_spill] sm:$0xff] %v7718_v41  ;;  %8618 = vst [vmem:[#allocation98_spill] sm:$0xff] %v7722_v12 }
 0x2cc   : > { %3299 = vmatpush1.bf16.msra.mxu0 %v7698_v43  ;;  %3381 = vmatpush1.bf16.msra.mxu1 %v7700_v38  ;;  %v7724_v43 = vld [vmem:[#allocation10 + $0x308] ss:$16 sps:$4 sm:$0xff]   ;;  %v7728_v38 = vld [vmem:[#allocation10 + $0x324] ss:$16 sps:$4 sm:$0xff]  }
 0x2cd   : > { %3300 = vmatprep.subr.bf16.mxu0 %v7704_v11  ;;  %3382 = vmatprep.subr.bf16.mxu1 %v7706_v45  ;;  %8619 = vst [vmem:[#allocation99_spill] sm:$0xff] %v7724_v43  ;;  %8620 = vst [vmem:[#allocation100_spill] sm:$0xff] %v7728_v38  ;;  %v7730_v11 = vld [vmem:[#allocation10 + $0x32c] ss:$16 sps:$4 sm:$0xff]   ;;  %v7734_v45 = vld [vmem:[#allocation10 + $0x320] ss:$16 sps:$4 sm:$0xff]  }
 0x2ce   : > { %8621 = vst [vmem:[#allocation101_spill] sm:$0xff] %v7730_v11  ;;  %8622 = vst [vmem:[#allocation102_spill] sm:$0xff] %v7734_v45 }
 0x2d0   : > { %3301 = vmatpush1.bf16.msra.mxu0 %v7710_v14  ;;  %3383 = vmatpush1.bf16.msra.mxu1 %v7712_v29  ;;  %v7736_v14 = vld [vmem:[#allocation10 + $0x328] ss:$16 sps:$4 sm:$0xff]   ;;  %v7740_v29 = vld [vmem:[#allocation10 + $0x344] ss:$16 sps:$4 sm:$0xff]  }
 0x2d1   : > { %3302 = vmatprep.subr.bf16.mxu0 %v7716_v37  ;;  %3384 = vmatprep.subr.bf16.mxu1 %v7718_v41  ;;  %8623 = vst [vmem:[#allocation103_spill] sm:$0xff] %v7736_v14  ;;  %8624 = vst [vmem:[#allocation104_spill] sm:$0xff] %v7740_v29  ;;  %v7742_v37 = vld [vmem:[#allocation10 + $0x34c] ss:$16 sps:$4 sm:$0xff]   ;;  %v7746_v41 = vld [vmem:[#allocation10 + $0x340] ss:$16 sps:$4 sm:$0xff]  }
 0x2d2   : > { %8625 = vst [vmem:[#allocation105_spill] sm:$0xff] %v7742_v37  ;;  %8626 = vst [vmem:[#allocation106_spill] sm:$0xff] %v7746_v41 }
 0x2d4   : > { %3303 = vmatpush1.bf16.msra.mxu0 %v7722_v12  ;;  %3385 = vmatpush1.bf16.msra.mxu1 %v7724_v43  ;;  %v7748_v12 = vld [vmem:[#allocation10 + $0x348] ss:$16 sps:$4 sm:$0xff]   ;;  %v7752_v43 = vld [vmem:[#allocation10 + $0x364] ss:$16 sps:$4 sm:$0xff]  }
 0x2d5   : > { %3304 = vmatprep.subr.bf16.mxu0 %v7728_v38  ;;  %3386 = vmatprep.subr.bf16.mxu1 %v7730_v11  ;;  %8627 = vst [vmem:[#allocation107_spill] sm:$0xff] %v7748_v12  ;;  %8628 = vst [vmem:[#allocation108_spill] sm:$0xff] %v7752_v43  ;;  %v7754_v38 = vld [vmem:[#allocation10 + $0x36c] ss:$16 sps:$4 sm:$0xff]   ;;  %v7758_v11 = vld [vmem:[#allocation10 + $0x360] ss:$16 sps:$4 sm:$0xff]  }
 0x2d6   : > { %8629 = vst [vmem:[#allocation109_spill] sm:$0xff] %v7754_v38  ;;  %8630 = vst [vmem:[#allocation110_spill] sm:$0xff] %v7758_v11 }
 0x2d8   : > { %3305 = vmatpush1.bf16.msra.mxu0 %v7734_v45  ;;  %3387 = vmatpush1.bf16.msra.mxu1 %v7736_v14  ;;  %v7760_v45 = vld [vmem:[#allocation10 + $0x368] ss:$16 sps:$4 sm:$0xff]   ;;  %v7764_v14 = vld [vmem:[#allocation10 + $0x384] ss:$16 sps:$4 sm:$0xff]  }
 0x2d9   : > { %3306 = vmatprep.subr.bf16.mxu0 %v7740_v29  ;;  %3388 = vmatprep.subr.bf16.mxu1 %v7742_v37  ;;  %8631 = vst [vmem:[#allocation111_spill] sm:$0xff] %v7760_v45  ;;  %8632 = vst [vmem:[#allocation112_spill] sm:$0xff] %v7764_v14  ;;  %v7766_v29 = vld [vmem:[#allocation10 + $0x38c] ss:$16 sps:$4 sm:$0xff]   ;;  %v7770_v37 = vld [vmem:[#allocation10 + $0x380] ss:$16 sps:$4 sm:$0xff]  }
 0x2da   : > { %8633 = vst [vmem:[#allocation113_spill] sm:$0xff] %v7766_v29  ;;  %8634 = vst [vmem:[#allocation114_spill] sm:$0xff] %v7770_v37 }
 0x2dc   : > { %3307 = vmatpush1.bf16.msra.mxu0 %v7746_v41  ;;  %3389 = vmatpush1.bf16.msra.mxu1 %v7748_v12  ;;  %v7772_v41 = vld [vmem:[#allocation10 + $0x388] ss:$16 sps:$4 sm:$0xff]   ;;  %v7776_v12 = vld [vmem:[#allocation10 + $0x3a4] ss:$16 sps:$4 sm:$0xff]  }
 0x2dd   : > { %3308 = vmatprep.subr.bf16.mxu0 %v7752_v43  ;;  %3390 = vmatprep.subr.bf16.mxu1 %v7754_v38  ;;  %8635 = vst [vmem:[#allocation115_spill] sm:$0xff] %v7772_v41  ;;  %8636 = vst [vmem:[#allocation116_spill] sm:$0xff] %v7776_v12  ;;  %v7778_v43 = vld [vmem:[#allocation10 + $0x3ac] ss:$16 sps:$4 sm:$0xff]   ;;  %v7782_v38 = vld [vmem:[#allocation10 + $0x3a0] ss:$16 sps:$4 sm:$0xff]  }
 0x2de   : > { %8637 = vst [vmem:[#allocation117_spill] sm:$0xff] %v7778_v43  ;;  %8638 = vst [vmem:[#allocation118_spill] sm:$0xff] %v7782_v38 }
 0x2e0   : > { %3309 = vmatpush1.bf16.msra.mxu0 %v7758_v11  ;;  %3391 = vmatpush1.bf16.msra.mxu1 %v7760_v45  ;;  %v7784_v11 = vld [vmem:[#allocation10 + $0x3a8] ss:$16 sps:$4 sm:$0xff]  }
 0x2e1   : > { %3310 = vmatprep.subr.bf16.mxu0 %v7764_v14  ;;  %3392 = vmatprep.subr.bf16.mxu1 %v7766_v29  ;;  %8639 = vst [vmem:[#allocation119_spill] sm:$0xff] %v7784_v11  ;;  %v7788_v14 = vld [vmem:[#allocation10 + $0x3c4] ss:$16 sps:$4 sm:$0xff]   ;;  %v7790_v29 = vld [vmem:[#allocation10 + $0x3cc] ss:$16 sps:$4 sm:$0xff]  }
 0x2e2   : > { %8640 = vst [vmem:[#allocation120_spill] sm:$0xff] %v7788_v14  ;;  %8641 = vst [vmem:[#allocation121_spill] sm:$0xff] %v7790_v29  ;;  %v7808_v45 = vld [vmem:[#allocation10 + $0x3e8] ss:$16 sps:$4 sm:$0xff]  }
 0x2e4   : > { %3311 = vmatpush1.bf16.msra.mxu0 %v7770_v37  ;;  %3393 = vmatpush1.bf16.msra.mxu1 %v7772_v41  ;;  %v7794_v37 = vld [vmem:[#allocation10 + $0x3c0] ss:$16 sps:$4 sm:$0xff]   ;;  %v7796_v41 = vld [vmem:[#allocation10 + $0x3c8] ss:$16 sps:$4 sm:$0xff]  }
 0x2e5   : > { %3312 = vmatprep.subr.bf16.mxu0 %v7776_v12  ;;  %3394 = vmatprep.subr.bf16.mxu1 %v7778_v43  ;;  %8642 = vst [vmem:[#allocation122_spill] sm:$0xff] %v7796_v41  ;;  %v7800_v12 = vld [vmem:[#allocation10 + $0x3e4] ss:$16 sps:$4 sm:$0xff]   ;;  %v7802_v43 = vld [vmem:[#allocation10 + $0x3ec] ss:$16 sps:$4 sm:$0xff]  }
 0x2e8   : > { %3313 = vmatpush1.bf16.msra.mxu0 %v7782_v38  ;;  %3395 = vmatpush1.bf16.msra.mxu1 %v7784_v11  ;;  %v7806_v38 = vld [vmem:[#allocation10 + $0x3e0] ss:$16 sps:$4 sm:$0xff]  }
 0x2e9   : > { %3314 = vmatprep.subr.bf16.mxu0 %v7788_v14  ;;  %3396 = vmatprep.subr.bf16.mxu1 %v7790_v29  ;;  %v7811_v11 = vld [vmem:[%s7363_s25 + $0x10] sm:$0xff]  ;;  %v7818_v14 = vld [vmem:[%s7363_s25 + $0x28] sm:$0xff] }
 0x2ea   : > { %v2603_v29 = vpack.c.bf16 %v7811_v11, %v7811_v11 }
 0x2ec   : > { %3315 = vmatpush1.bf16.msra.mxu0 %v7794_v37  ;;  %3397 = vmatpush1.bf16.msra.mxu1 %v7796_v41  ;;  %v3414_v41 = vpack.c.bf16 %v7818_v14, %v7818_v14 }
 0x2ed   : > { %3316 = vmatprep.subr.bf16.mxu0 %v7800_v12  ;;  %3398 = vmatprep.subr.bf16.mxu1 %v7802_v43 }
 0x2f0   : > { %3317 = vmatpush1.bf16.msra.mxu0 %v7806_v38  ;;  %3399 = vmatpush1.bf16.msra.mxu1 %v7808_v45 }
 0x2f1   : > { %3417 = vmatprep.subr.bf16.mxu0 %v7415_v39  ;;  %3499 = vmatprep.subr.bf16.mxu1 %v7417_v40 }
 0x2f3   : > { %3319 = vmatmul.mubr.bf16.vlgmr.msra.gmra.mrb[8].mxu0 %v2603_v29  ;;  %3401 = vmatmul.mubr.bf16.vlgmr.msra.gmra.mrb[8].mxu1 %v2603_v29  ;;  %v8643_v29 = vld [vmem:[#allocation51_spill] sm:$0xff] }
 0x2f4   : > { %3418 = vmatpush1.bf16.msra.mxu0 %v7422_v13  ;;  %3500 = vmatpush1.bf16.msra.mxu1 %v7424_v42 }
 0x2f5   : > { %3419 = vmatprep.subr.bf16.mxu0 %v7428_v20  ;;  %3501 = vmatprep.subr.bf16.mxu1 %v7430_v44 }
 0x2f6   : > { %3449 = vmatprep.mubr.bf16.mxu0 %v3414_v41  ;;  %3531 = vmatprep.mubr.bf16.mxu1 %v3414_v41  ;;  %v8644_v41 = vld [vmem:[#allocation52_spill] sm:$0xff] }
 0x2f8   : > { %3420 = vmatpush1.bf16.msra.mxu0 %v7436_v46  ;;  %3502 = vmatpush1.bf16.msra.mxu1 %v7438_v47 }
 0x2f9   : > { %3421 = vmatprep.subr.bf16.mxu0 %v7442_v48  ;;  %3503 = vmatprep.subr.bf16.mxu1 %v7444_v49 }
 0x2fc   : > { %3422 = vmatpush1.bf16.msra.mxu0 %v7448_v50  ;;  %3504 = vmatpush1.bf16.msra.mxu1 %v7450_v51 }
 0x2fd   : > { %3423 = vmatprep.subr.bf16.mxu0 %v7454_v52  ;;  %3505 = vmatprep.subr.bf16.mxu1 %v7456_v53 }
 0x300   : > { %3424 = vmatpush1.bf16.msra.mxu0 %v7460_v54  ;;  %3506 = vmatpush1.bf16.msra.mxu1 %v7462_v55 }
 0x301   : > { %3425 = vmatprep.subr.bf16.mxu0 %v7466_v56  ;;  %3507 = vmatprep.subr.bf16.mxu1 %v7468_v57 }
 0x304   : > { %3426 = vmatpush1.bf16.msra.mxu0 %v7472_v58  ;;  %3508 = vmatpush1.bf16.msra.mxu1 %v7474_v59 }
 0x305   : > { %3427 = vmatprep.subr.bf16.mxu0 %v7478_v60  ;;  %3509 = vmatprep.subr.bf16.mxu1 %v7480_v61 }
 0x308   : > { %3428 = vmatpush1.bf16.msra.mxu0 %v7484_v62  ;;  %3510 = vmatpush1.bf16.msra.mxu1 %v7486_v63 }
 0x309   : > { %3429 = vmatprep.subr.bf16.mxu0 %v7490_v0  ;;  %3511 = vmatprep.subr.bf16.mxu1 %v7492_v1 }
 0x30c   : > { %3430 = vmatpush1.bf16.msra.mxu0 %v7496_v2  ;;  %3512 = vmatpush1.bf16.msra.mxu1 %v7498_v3 }
 0x30d   : > { %3431 = vmatprep.subr.bf16.mxu0 %v7502_v4  ;;  %3513 = vmatprep.subr.bf16.mxu1 %v7504_v5 }
 0x310   : > { %3432 = vmatpush1.bf16.msra.mxu0 %v7508_v6  ;;  %3514 = vmatpush1.bf16.msra.mxu1 %v7510_v7  ;;  %v8686_v6 = vld [vmem:[#allocation65_spill] sm:$0xff] }
 0x311   : > { %3433 = vmatprep.subr.bf16.mxu0 %v7514_v8  ;;  %3515 = vmatprep.subr.bf16.mxu1 %v7516_v9  ;;  %v8684_v8 = vld [vmem:[#allocation89_spill] sm:$0xff] }
 0x314   : > { %3434 = vmatpush1.bf16.msra.mxu0 %v7520_v10  ;;  %3516 = vmatpush1.bf16.msra.mxu1 %v7522_v16  ;;  %v8680_v16 = vld [vmem:[#allocation86_spill] sm:$0xff] }
 0x315   : > { %3435 = vmatprep.subr.bf16.mxu0 %v7526_v17  ;;  %3517 = vmatprep.subr.bf16.mxu1 %v7528_v18 }
 0x318   : > { %3436 = vmatpush1.bf16.msra.mxu0 %v7532_v19  ;;  %3518 = vmatpush1.bf16.msra.mxu1 %v7534_v21  ;;  %v7932_v21 = vld [vmem:[%s7363_s25 + $0x50] sm:$0xff]  ;;  %v8679_v19 = vld [vmem:[#allocation24_spill] sm:$0xff] }
 0x319   : > { %3437 = vmatprep.subr.bf16.mxu0 %v7538_v22  ;;  %3519 = vmatprep.subr.bf16.mxu1 %v7540_v23 }
 0x31c   : > { %3438 = vmatpush1.bf16.msra.mxu0 %v7544_v24  ;;  %3520 = vmatpush1.bf16.msra.mxu1 %v7546_v25  ;;  %v8652_v25 = vld [vmem:[#allocation60_spill] sm:$0xff] }
 0x31d   : > { %3439 = vmatprep.subr.bf16.mxu0 %v7550_v26  ;;  %3521 = vmatprep.subr.bf16.mxu1 %v7552_v27  ;;  %v8645_v27 = vld [vmem:[#allocation53_spill] sm:$0xff]  ;;  %v8650_v26 = vld [vmem:[#allocation58_spill] sm:$0xff] }
 0x320   : > { %3440 = vmatpush1.bf16.msra.mxu0 %v7556_v28  ;;  %3522 = vmatpush1.bf16.msra.mxu1 %v7558_v30  ;;  %v8646_v28 = vld [vmem:[#allocation54_spill] sm:$0xff]  ;;  %v8647_v30 = vld [vmem:[#allocation55_spill] sm:$0xff] }
 0x321   : > { %3441 = vmatprep.subr.bf16.mxu0 %v7562_v31  ;;  %3523 = vmatprep.subr.bf16.mxu1 %v7564_v32  ;;  %v8648_v31 = vld [vmem:[#allocation56_spill] sm:$0xff]  ;;  %v8649_v32 = vld [vmem:[#allocation57_spill] sm:$0xff] }
 0x324   : > { %3442 = vmatpush1.bf16.msra.mxu0 %v7568_v33  ;;  %3524 = vmatpush1.bf16.msra.mxu1 %v7570_v34  ;;  %v2410_v33 = vld [vmem:[%s7363_s25 + $0x20] sm:$0xff]  ;;  %v8651_v34 = vld [vmem:[#allocation59_spill] sm:$0xff] }
 0x325   : > { %3443 = vmatprep.subr.bf16.mxu0 %v7574_v35  ;;  %3525 = vmatprep.subr.bf16.mxu1 %v8643_v29  ;;  %v3413_v35 = vpack.c.bf16 %v2410_v33, %v2410_v33  ;;  %v8653_v29 = vld [vmem:[#allocation61_spill] sm:$0xff] }
 0x328   : > { %3444 = vmatpush1.bf16.msra.mxu0 %v8644_v41  ;;  %3526 = vmatpush1.bf16.msra.mxu1 %v8645_v27  ;;  %v8654_v41 = vld [vmem:[#allocation63_spill] sm:$0xff]  ;;  %v8655_v27 = vld [vmem:[#allocation64_spill] sm:$0xff] }
 0x329   : > { %3445 = vmatprep.subr.bf16.mxu0 %v8646_v28  ;;  %3527 = vmatprep.subr.bf16.mxu1 %v8647_v30  ;;  %v7892_v28 = vld [vmem:[%s7363_s25 + $0x38] sm:$0xff] }
 0x32c   : > { %3446 = vmatpush1.bf16.msra.mxu0 %v8648_v31  ;;  %3528 = vmatpush1.bf16.msra.mxu1 %v8649_v32  ;;  %v3416_v31 = vpack.c.bf16 %v7892_v28, %v7892_v28  ;;  %v8670_v32 = vld [vmem:[#allocation82_spill] sm:$0xff] }
 0x32d   : > { %3447 = vmatprep.subr.bf16.mxu0 %v8650_v26  ;;  %3529 = vmatprep.subr.bf16.mxu1 %v8651_v34  ;;  %v8656_v34 = vld [vmem:[#allocation68_spill] sm:$0xff]  ;;  %v8667_v26 = vld [vmem:[#allocation79_spill] sm:$0xff] }
 0x330   : > { %3448 = vmatpush1.bf16.msra.mxu0 %v8652_v25  ;;  %3530 = vmatpush1.bf16.msra.mxu1 %v8653_v29  ;;  %v8657_v25 = vld [vmem:[#allocation69_spill] sm:$0xff]  ;;  %v8660_v29 = vld [vmem:[#allocation72_spill] sm:$0xff] }
 0x331   : > { %3458 = vmatprep.subr.bf16.mxu0 %v8654_v41  ;;  %3540 = vmatprep.subr.bf16.mxu1 %v8655_v27  ;;  %v8658_v41 = vld [vmem:[#allocation70_spill] sm:$0xff]  ;;  %v8659_v27 = vld [vmem:[#allocation71_spill] sm:$0xff] }
 0x333   : > { %3450 = vmatmul.mubr.bf16.vlgmr.msra.gmra.mrb[12].mxu0 %v3413_v35  ;;  %3532 = vmatmul.mubr.bf16.vlgmr.msra.gmra.mrb[12].mxu1 %v3413_v35  ;;  %v8661_v35 = vld [vmem:[#allocation73_spill] sm:$0xff] }
 0x334   : > { %3459 = vmatpush1.bf16.msra.mxu0 %v7624_v15  ;;  %3541 = vmatpush1.bf16.msra.mxu1 %v7626_v36  ;;  %v8662_v15 = vld [vmem:[#allocation74_spill] sm:$0xff]  ;;  %v8663_v36 = vld [vmem:[#allocation75_spill] sm:$0xff] }
 0x335   : > { %3460 = vmatprep.subr.bf16.mxu0 %v8656_v34  ;;  %3542 = vmatprep.subr.bf16.mxu1 %v8657_v25  ;;  %v8664_v34 = vld [vmem:[#allocation76_spill] sm:$0xff]  ;;  %v8665_v25 = vld [vmem:[#allocation77_spill] sm:$0xff] }
 0x336   : > { %3490 = vmatprep.mubr.bf16.mxu0 %v3416_v31  ;;  %3572 = vmatprep.mubr.bf16.mxu1 %v3416_v31  ;;  %v8666_v31 = vld [vmem:[#allocation78_spill] sm:$0xff] }
 0x338   : > { %3461 = vmatpush1.bf16.msra.mxu0 %v8658_v41  ;;  %3543 = vmatpush1.bf16.msra.mxu1 %v8659_v27  ;;  %v8668_v41 = vld [vmem:[#allocation80_spill] sm:$0xff]  ;;  %v8669_v27 = vld [vmem:[#allocation81_spill] sm:$0xff] }
 0x339   : > { %3462 = vmatprep.subr.bf16.mxu0 %v8660_v29  ;;  %3544 = vmatprep.subr.bf16.mxu1 %v8661_v35  ;;  %v8671_v29 = vld [vmem:[#allocation83_spill] sm:$0xff]  ;;  %v8677_v35 = vld [vmem:[#allocation62_spill] sm:$0xff] }
 0x33a   : > { %8678 = vst [vmem:[#allocation62_spill] sm:$0xff] %v7932_v21 }
 0x33c   : > { %3463 = vmatpush1.bf16.msra.mxu0 %v8662_v15  ;;  %3545 = vmatpush1.bf16.msra.mxu1 %v8663_v36  ;;  %v7915_v15 = vld [vmem:[%s7363_s25 + $0x40] sm:$0xff] }
 0x33d   : > { %3464 = vmatprep.subr.bf16.mxu0 %v8664_v34  ;;  %3546 = vmatprep.subr.bf16.mxu1 %v8665_v25  ;;  %8672 = vst [vmem:[#allocation123_spill] sm:$0xff] %v7915_v15  ;;  %v7918_v36 = vld [vmem:[%s7363_s25 + $0x60] sm:$0xff]  ;;  %v7921_v34 = vld [vmem:[%s7363_s25 + $0x48] sm:$0xff] }
 0x33e   : > { %8673 = vst [vmem:[#allocation124_spill] sm:$0xff] %v7918_v36  ;;  %v7924_v25 = vld [vmem:[%s7363_s25 + $0x68] sm:$0xff] }
 0x33f   : > { %8674 = vst [vmem:[#allocation125_spill] sm:$0xff] %v7924_v25 }
 0x340   : > { %3465 = vmatpush1.bf16.msra.mxu0 %v8666_v31  ;;  %3547 = vmatpush1.bf16.msra.mxu1 %v8667_v26  ;;  %v8675_v31 = vld [vmem:[#allocation84_spill] sm:$0xff]  ;;  %v8676_v26 = vld [vmem:[#allocation85_spill] sm:$0xff] }
 0x341   : > { %3466 = vmatprep.subr.bf16.mxu0 %v8668_v41  ;;  %3548 = vmatprep.subr.bf16.mxu1 %v8669_v27 }
 0x344   : > { %3467 = vmatpush1.bf16.msra.mxu0 %v8670_v32  ;;  %3549 = vmatpush1.bf16.msra.mxu1 %v8671_v29 }
 0x345   : > { %3468 = vmatprep.subr.bf16.mxu0 %v8675_v31  ;;  %3550 = vmatprep.subr.bf16.mxu1 %v8676_v26 }
 0x346   : > { %v2308_v41 = vpop.f32.mrb[4].mxu0  ;;  %v2390_v27 = vpop.f32.mrb[4].mxu1 }
 0x347   : > { %v2401_v32 = vmul.f32 %v8677_v35, %v2308_v41  ;;  %v2414_v30 = vmul.f32 %v2410_v33, %v2308_v41  ;;  %v2427_v29 = vmul.f32 %v7915_v15, %v2308_v41  ;;  %v2440_v24 = vmul.f32 %v7918_v36, %v2308_v41  ;;  %v2310_v23 = vpop.f32.mrb[5].mxu0  ;;  %v2392_v22 = vpop.f32.mrb[5].mxu1  ;;  %v7940_v15 = vld [vmem:[%s7363_s25 + $0x58] sm:$0xff]  ;;  %v7943_v41 = vld [vmem:[%s7363_s25 + $0x70] sm:$0xff] }
 0x348   : > { %v2402_v31 = vmul.f32 %v8679_v19, %v2310_v23  ;;  %v2415_v26 = vmul.f32 %v7818_v14, %v2310_v23  ;;  %v2428_v18 = vmul.f32 %v7921_v34, %v2310_v23  ;;  %v2441_v17 = vmul.f32 %v7924_v25, %v2310_v23  ;;  %v2312_v35 = vpop.f32.mrb[6].mxu0  ;;  %v2394_v33 = vpop.f32.mrb[6].mxu1  ;;  %3469 = vmatpush1.bf16.msra.mxu0 %v8680_v16  ;;  %v8682_v36 = vld [vmem:[#allocation87_spill] sm:$0xff]  ;;  %v8683_v19 = vld [vmem:[#allocation88_spill] sm:$0xff]  ;;  %v2412_v14 = vld [vmem:[%s7363_s25 + $0x30] sm:$0xff] }
 0x349   : > { %8681 = vst [vmem:[#allocation24_spill] sm:$0xff] %v7943_v41  ;;  %3551 = vmatpush1.bf16.msra.mxu1 %v8682_v36  ;;  %v2313_v10 = vpop.f32.mrb[7].mxu0  ;;  %v2395_v9 = vpop.f32.mrb[7].mxu1  ;;  %3470 = vmatprep.subr.bf16.mxu0 %v8683_v19  ;;  %v2429_v23 = vmul.f32 %v7932_v21, %v2390_v27  ;;  %v2403_v35 = vmul.f32 %v7811_v11, %v2390_v27  ;;  %v7952_v16 = vld [vmem:[%s7363_s25 + $0x78] sm:$0xff]  ;;  %v8687_v36 = vld [vmem:[#allocation90_spill] sm:$0xff]  ;;  %s5031_s25 = sshll.u32 %s498_s10, 4  ;;  %s8271_s25 = int_to_ptr.vmem [resolvable:$true] %s5031_s25 }
 0x34a   : > { %3552 = vmatprep.subr.bf16.mxu1 %v8684_v8  ;;  %v2431_v25 = vadd.f32 %v2428_v18, %v2427_v29  ;;  %v2405_v33 = vadd.f32 %v2402_v31, %v2401_v32  ;;  %8685 = vst [vmem:[#allocation126_spill] sm:$0xff] %v7952_v16  ;;  %v2430_v7 = vmul.f32 %v7940_v15, %v2392_v22  ;;  %v8688_v21 = vld [vmem:[#allocation91_spill] sm:$0xff]  ;;  %v8689_v18 = vld [vmem:[#allocation92_spill] sm:$0xff]  ;;  %v8690_v29 = vld [vmem:[#allocation93_spill] sm:$0xff]  ;;  %s6933_s23 = scalar_lea.vmem %s8271_s25, 512 }
 0x34b   : > { %v2404_v5 = vmul.f32 %v8686_v6, %v2392_v22  ;;  %v2442_v10 = vmul.f32 %v7943_v41, %v2390_v27  ;;  %v2444_v9 = vadd.f32 %v2441_v17, %v2440_v24  ;;  %v2416_v8 = vmul.f32 %v2412_v14, %v2390_v27  ;;  %v8693_v27 = vld [vmem:[#allocation96_spill] sm:$0xff]  ;;  %p6934_p0 = scmp.ne.s32.totalorder %s8271_s25, %s6933_s23 }
 0x34c   : > { %3471 = vmatpush1.bf16.msra.mxu0 %v8687_v36  ;;  %v2432_v19 = vadd.f32 %v2431_v25, %v2429_v23  ;;  %v2406_v4 = vadd.f32 %v2405_v33, %v2403_v35  ;;  %v2418_v3 = vadd.f32 %v2415_v26, %v2414_v30  ;;  %v2443_v32 = vmul.f32 %v7952_v16, %v2392_v22  ;;  %v8691_v36 = vld [vmem:[#allocation94_spill] sm:$0xff]  ;;  %v8692_v26 = vld [vmem:[#allocation95_spill] sm:$0xff]  ;;  %v8694_v30 = vld [vmem:[#allocation97_spill] sm:$0xff] }
 0x34d   : > { %3553 = vmatpush1.bf16.msra.mxu1 %v8688_v21  ;;  %3472 = vmatprep.subr.bf16.mxu0 %v8689_v18  ;;  %v2445_v11 = vadd.f32 %v2444_v9, %v2442_v10  ;;  %v2417_v41 = vmul.f32 %v7892_v28, %v2392_v22  ;;  %v8695_v23 = vld [vmem:[#allocation98_spill] sm:$0xff]  ;;  %v8701_v22 = vld [vmem:[#allocation104_spill] sm:$0xff]  ;;  %v8702_v28 = vld [vmem:[#allocation105_spill] sm:$0xff]  ;;  %p6935_p4 = pnand %p6934_p0, %p8802_p2 }
 0x34e   : > { %3554 = vmatprep.subr.bf16.mxu1 %v8690_v29  ;;  %v2433_v31 = vadd.f32 %v2432_v19, %v2430_v7  ;;  %v2407_v6 = vadd.f32 %v2406_v4, %v2404_v5  ;;  %v2419_v17 = vadd.f32 %v2418_v3, %v2416_v8  ;;  %v8696_v7 = vld [vmem:[#allocation99_spill] sm:$0xff]  ;;  %v8697_v4 = vld [vmem:[#allocation100_spill] sm:$0xff]  ;;  %v8698_v3 = vld [vmem:[#allocation101_spill] sm:$0xff] }
 0x34f   : > { %v2446_v24 = vadd.f32 %v2445_v11, %v2443_v32  ;;  %v8699_v5 = vld [vmem:[#allocation102_spill] sm:$0xff]  ;;  %v8700_v8 = vld [vmem:[#allocation103_spill] sm:$0xff]  ;;  %v8705_v35 = vld [vmem:[#allocation108_spill] sm:$0xff]  ;;  %p6936_p10 = pneg %p6935_p4 }
 0x350   : > { %3473 = vmatpush1.bf16.msra.mxu0 %v8691_v36  ;;  %2434 = vadd.xlane.f32.xlu1 %v2433_v31  ;;  %v2420_v25 = vadd.f32 %v2419_v17, %v2417_v41  ;;  %v8703_v41 = vld [vmem:[#allocation106_spill] sm:$0xff]  ;;  %v8704_v19 = vld [vmem:[#allocation107_spill] sm:$0xff]  ;;  %v8706_v33 = vld [vmem:[#allocation109_spill] sm:$0xff] }
 0x351   : > { %3555 = vmatpush1.bf16.msra.mxu1 %v8692_v26  ;;  %2408 = vadd.xlane.f32.xlu0 %v2407_v6  ;;  %v8707_v10 = vld [vmem:[#allocation110_spill] sm:$0xff]  ;;  %v8708_v9 = vld [vmem:[#allocation111_spill] sm:$0xff]  ;;  %v8709_v32 = vld [vmem:[#allocation112_spill] sm:$0xff] }
 0x352   : > { %3474 = vmatprep.subr.bf16.mxu0 %v8693_v27  ;;  %3556 = vmatprep.subr.bf16.mxu1 %v8694_v30  ;;  %v8710_v11 = vld [vmem:[#allocation113_spill] sm:$0xff]  ;;  %v8711_v31 = vld [vmem:[#allocation114_spill] sm:$0xff]  ;;  %v8712_v6 = vld [vmem:[#allocation115_spill] sm:$0xff] }
 0x353   : > { %v8713_v17 = vld [vmem:[#allocation116_spill] sm:$0xff]  ;;  %v8716_v16 = vld [vmem:[#allocation119_spill] sm:$0xff] }
 0x354   : > { %3475 = vmatpush1.bf16.msra.mxu0 %v8695_v23  ;;  %2447 = vadd.xlane.f32.xlu1 %v2446_v24  ;;  %v8714_v24 = vld [vmem:[#allocation117_spill] sm:$0xff] }
 0x355   : > { %3557 = vmatpush1.bf16.msra.mxu1 %v8696_v7  ;;  %2421 = vadd.xlane.f32.xlu0 %v2420_v25  ;;  %v8715_v25 = vld [vmem:[#allocation118_spill] sm:$0xff] }
 0x356   : > { %3476 = vmatprep.subr.bf16.mxu0 %v8697_v4  ;;  %3558 = vmatprep.subr.bf16.mxu1 %v8698_v3 }
 0x358   : > { %3477 = vmatpush1.bf16.msra.mxu0 %v8699_v5 }
 0x359   : > { %3559 = vmatpush1.bf16.msra.mxu1 %v8700_v8  ;;  %3478 = vmatprep.subr.bf16.mxu0 %v8701_v22 }
 0x35a   : > { %3560 = vmatprep.subr.bf16.mxu1 %v8702_v28 }
 0x35c   : > { %3479 = vmatpush1.bf16.msra.mxu0 %v8703_v41 }
 0x35d   : > { %3561 = vmatpush1.bf16.msra.mxu1 %v8704_v19  ;;  %3480 = vmatprep.subr.bf16.mxu0 %v8705_v35 }
 0x35e   : > { %3562 = vmatprep.subr.bf16.mxu1 %v8706_v33  ;;  %v8717_v33 = vld [vmem:[#allocation120_spill] sm:$0xff] }
 0x360   : > { %3481 = vmatpush1.bf16.msra.mxu0 %v8707_v10  ;;  %v8718_v10 = vld [vmem:[#allocation121_spill] sm:$0xff] }
 0x361   : > { %3563 = vmatpush1.bf16.msra.mxu1 %v8708_v9  ;;  %3482 = vmatprep.subr.bf16.mxu0 %v8709_v32  ;;  %v8719_v32 = vld [vmem:[#allocation122_spill] sm:$0xff] }
 0x362   : > { %3564 = vmatprep.subr.bf16.mxu1 %v8710_v11 }
 0x364   : > { %3483 = vmatpush1.bf16.msra.mxu0 %v8711_v31 }
 0x365   : > { %3565 = vmatpush1.bf16.msra.mxu1 %v8712_v6  ;;  %3484 = vmatprep.subr.bf16.mxu0 %v8713_v17  ;;  %v3415_v6 = vpack.c.bf16 %v2412_v14, %v2412_v14  ;;  %v8748_v14 = vld [vmem:[#allocation53_spill] sm:$0xff] }
 0x366   : > { %3566 = vmatprep.subr.bf16.mxu1 %v8714_v24 }
 0x368   : > { %3485 = vmatpush1.bf16.msra.mxu0 %v8715_v25 }
 0x369   : > { %3567 = vmatpush1.bf16.msra.mxu1 %v8716_v16  ;;  %3486 = vmatprep.subr.bf16.mxu0 %v8717_v33 }
 0x36a   : > { %3568 = vmatprep.subr.bf16.mxu1 %v8718_v10  ;;  %v3590_v10 = vpack.c.bf16 %v7921_v34, %v7921_v34  ;;  %v8747_v34 = vld [vmem:[#allocation52_spill] sm:$0xff] }
 0x36c   : > { %3487 = vmatpush1.bf16.msra.mxu0 %v7794_v37 }
 0x36d   : > { %3569 = vmatpush1.bf16.msra.mxu1 %v8719_v32  ;;  %3488 = vmatprep.subr.bf16.mxu0 %v7800_v12 }
 0x36e   : > { %3570 = vmatprep.subr.bf16.mxu1 %v7802_v43 }
 0x370   : > { %3489 = vmatpush1.bf16.msra.mxu0 %v7806_v38 }
 0x371   : > { %3571 = vmatpush1.bf16.msra.mxu1 %v7808_v45  ;;  %3593 = vmatprep.subr.bf16.mxu0 %v7415_v39  ;;  %v8720_v39 = vld [vmem:[#allocation25_spill] sm:$0xff] }
 0x372   : > { %3675 = vmatprep.subr.bf16.mxu1 %v7417_v40  ;;  %v8721_v40 = vld [vmem:[#allocation26_spill] sm:$0xff] }
 0x373   : > { %3491 = vmatmul.mubr.bf16.vlgmr.msra.gmra.mrb[12].mxu0 %v3415_v6 }
 0x374   : > { %3573 = vmatmul.mubr.bf16.vlgmr.msra.gmra.mrb[12].mxu1 %v3415_v6  ;;  %3594 = vmatpush1.bf16.msra.mxu0 %v7422_v13  ;;  %v8722_v13 = vld [vmem:[#allocation27_spill] sm:$0xff] }
 0x375   : > { %3676 = vmatpush1.bf16.msra.mxu1 %v7424_v42  ;;  %3595 = vmatprep.subr.bf16.mxu0 %v7428_v20  ;;  %v8723_v42 = vld [vmem:[#allocation28_spill] sm:$0xff]  ;;  %v8724_v20 = vld [vmem:[#allocation29_spill] sm:$0xff]  ;;  %v8750_v6 = vld [vmem:[#allocation55_spill] sm:$0xff] }
 0x376   : > { %3677 = vmatprep.subr.bf16.mxu1 %v7430_v44  ;;  %3625 = vmatprep.mubr.bf16.mxu0 %v3590_v10  ;;  %v8725_v44 = vld [vmem:[#allocation30_spill] sm:$0xff] }
 0x377   : > { %3707 = vmatprep.mubr.bf16.mxu1 %v3590_v10  ;;  %v8749_v10 = vld [vmem:[#allocation54_spill] sm:$0xff] }
 0x378   : > { %3596 = vmatpush1.bf16.msra.mxu0 %v7436_v46  ;;  %v8726_v46 = vld [vmem:[#allocation31_spill] sm:$0xff] }
 0x379   : > { %3678 = vmatpush1.bf16.msra.mxu1 %v7438_v47  ;;  %3597 = vmatprep.subr.bf16.mxu0 %v7442_v48  ;;  %v8727_v47 = vld [vmem:[#allocation32_spill] sm:$0xff]  ;;  %v8728_v48 = vld [vmem:[#allocation33_spill] sm:$0xff] }
 0x37a   : > { %3679 = vmatprep.subr.bf16.mxu1 %v7444_v49  ;;  %v8729_v49 = vld [vmem:[#allocation34_spill] sm:$0xff] }
 0x37c   : > { %3598 = vmatpush1.bf16.msra.mxu0 %v7448_v50  ;;  %v8730_v50 = vld [vmem:[#allocation35_spill] sm:$0xff] }
 0x37d   : > { %3680 = vmatpush1.bf16.msra.mxu1 %v7450_v51  ;;  %3599 = vmatprep.subr.bf16.mxu0 %v7454_v52  ;;  %v8731_v51 = vld [vmem:[#allocation36_spill] sm:$0xff]  ;;  %v8732_v52 = vld [vmem:[#allocation37_spill] sm:$0xff] }
 0x37e   : > { %3681 = vmatprep.subr.bf16.mxu1 %v7456_v53  ;;  %v8733_v53 = vld [vmem:[#allocation38_spill] sm:$0xff] }
 0x380   : > { %3600 = vmatpush1.bf16.msra.mxu0 %v7460_v54  ;;  %v8734_v54 = vld [vmem:[#allocation39_spill] sm:$0xff] }
 0x381   : > { %3682 = vmatpush1.bf16.msra.mxu1 %v7462_v55  ;;  %3601 = vmatprep.subr.bf16.mxu0 %v7466_v56  ;;  %v8735_v55 = vld [vmem:[#allocation40_spill] sm:$0xff]  ;;  %v8736_v56 = vld [vmem:[#allocation41_spill] sm:$0xff] }
 0x382   : > { %3683 = vmatprep.subr.bf16.mxu1 %v7468_v57  ;;  %v8737_v57 = vld [vmem:[#allocation42_spill] sm:$0xff] }
 0x384   : > { %3602 = vmatpush1.bf16.msra.mxu0 %v7472_v58  ;;  %v8738_v58 = vld [vmem:[#allocation43_spill] sm:$0xff] }
 0x385   : > { %3684 = vmatpush1.bf16.msra.mxu1 %v7474_v59  ;;  %3603 = vmatprep.subr.bf16.mxu0 %v7478_v60  ;;  %v8739_v59 = vld [vmem:[#allocation44_spill] sm:$0xff]  ;;  %v8740_v60 = vld [vmem:[#allocation45_spill] sm:$0xff] }
 0x386   : > { %3685 = vmatprep.subr.bf16.mxu1 %v7480_v61  ;;  %v8741_v61 = vld [vmem:[#allocation46_spill] sm:$0xff] }
 0x388   : > { %3604 = vmatpush1.bf16.msra.mxu0 %v7484_v62  ;;  %v8742_v62 = vld [vmem:[#allocation47_spill] sm:$0xff] }
 0x389   : > { %3686 = vmatpush1.bf16.msra.mxu1 %v7486_v63  ;;  %3605 = vmatprep.subr.bf16.mxu0 %v7490_v0  ;;  %v8743_v63 = vld [vmem:[#allocation48_spill] sm:$0xff]  ;;  %v8744_v0 = vld [vmem:[#allocation49_spill] sm:$0xff] }
 0x38a   : > { %3687 = vmatprep.subr.bf16.mxu1 %v7492_v1  ;;  %v8745_v1 = vld [vmem:[#allocation50_spill] sm:$0xff] }
 0x38c   : > { %3606 = vmatpush1.bf16.msra.mxu0 %v7496_v2  ;;  %v8746_v2 = vld [vmem:[#allocation51_spill] sm:$0xff] }
 0x38d   : > { %3688 = vmatpush1.bf16.msra.mxu1 %v8720_v39  ;;  %3607 = vmatprep.subr.bf16.mxu0 %v8721_v40  ;;  %v8751_v39 = vld [vmem:[#allocation56_spill] sm:$0xff]  ;;  %v8752_v40 = vld [vmem:[#allocation57_spill] sm:$0xff] }
 0x38e   : > { %3689 = vmatprep.subr.bf16.mxu1 %v8722_v13  ;;  %v8753_v13 = vld [vmem:[#allocation58_spill] sm:$0xff] }
 0x390   : > { %3608 = vmatpush1.bf16.msra.mxu0 %v8723_v42  ;;  %v8754_v42 = vld [vmem:[#allocation59_spill] sm:$0xff] }
 0x391   : > { %3690 = vmatpush1.bf16.msra.mxu1 %v8724_v20  ;;  %3609 = vmatprep.subr.bf16.mxu0 %v8725_v44  ;;  %v8755_v20 = vld [vmem:[#allocation123_spill] sm:$0xff] }
 0x392   : > { %3691 = vmatprep.subr.bf16.mxu1 %v8726_v46  ;;  %v3589_v44 = vpack.c.bf16 %v8755_v20, %v8755_v20  ;;  %v8756_v46 = vld [vmem:[#allocation60_spill] sm:$0xff] }
 0x394   : > { %3610 = vmatpush1.bf16.msra.mxu0 %v8727_v47  ;;  %v8757_v47 = vld [vmem:[#allocation61_spill] sm:$0xff] }
 0x395   : > { %3692 = vmatpush1.bf16.msra.mxu1 %v8728_v48  ;;  %3611 = vmatprep.subr.bf16.mxu0 %v8729_v49  ;;  %v8758_v48 = vld [vmem:[#allocation63_spill] sm:$0xff]  ;;  %v8759_v49 = vld [vmem:[#allocation64_spill] sm:$0xff] }
 0x396   : > { %3693 = vmatprep.subr.bf16.mxu1 %v8730_v50  ;;  %v3592_v50 = vpack.c.bf16 %v7940_v15, %v7940_v15  ;;  %v8768_v15 = vld [vmem:[#allocation74_spill] sm:$0xff] }
 0x398   : > { %3612 = vmatpush1.bf16.msra.mxu0 %v8731_v51  ;;  %v8760_v51 = vld [vmem:[#allocation66_spill] sm:$0xff] }
 0x399   : > { %3694 = vmatpush1.bf16.msra.mxu1 %v8732_v52  ;;  %3613 = vmatprep.subr.bf16.mxu0 %v8733_v53  ;;  %v8761_v52 = vld [vmem:[#allocation67_spill] sm:$0xff]  ;;  %v8762_v53 = vld [vmem:[#allocation68_spill] sm:$0xff] }
 0x39a   : > { %3695 = vmatprep.subr.bf16.mxu1 %v8734_v54  ;;  %v8763_v54 = vld [vmem:[#allocation69_spill] sm:$0xff] }
 0x39c   : > { %3614 = vmatpush1.bf16.msra.mxu0 %v8735_v55  ;;  %v8764_v55 = vld [vmem:[#allocation70_spill] sm:$0xff] }
 0x39d   : > { %3696 = vmatpush1.bf16.msra.mxu1 %v8736_v56  ;;  %3615 = vmatprep.subr.bf16.mxu0 %v8737_v57  ;;  %v8765_v56 = vld [vmem:[#allocation71_spill] sm:$0xff]  ;;  %v8766_v57 = vld [vmem:[#allocation72_spill] sm:$0xff] }
 0x39e   : > { %3697 = vmatprep.subr.bf16.mxu1 %v8738_v58  ;;  %v8767_v58 = vld [vmem:[#allocation73_spill] sm:$0xff] }
 0x3a0   : > { %3616 = vmatpush1.bf16.msra.mxu0 %v8739_v59  ;;  %v8769_v59 = vld [vmem:[#allocation75_spill] sm:$0xff] }
 0x3a1   : > { %3698 = vmatpush1.bf16.msra.mxu1 %v8740_v60  ;;  %3617 = vmatprep.subr.bf16.mxu0 %v8741_v61  ;;  %v8770_v60 = vld [vmem:[#allocation76_spill] sm:$0xff]  ;;  %v8771_v61 = vld [vmem:[#allocation77_spill] sm:$0xff] }
 0x3a2   : > { %3699 = vmatprep.subr.bf16.mxu1 %v8742_v62  ;;  %v8772_v62 = vld [vmem:[#allocation78_spill] sm:$0xff] }
 0x3a4   : > { %3618 = vmatpush1.bf16.msra.mxu0 %v8743_v63  ;;  %v8773_v63 = vld [vmem:[#allocation79_spill] sm:$0xff] }
 0x3a5   : > { %3700 = vmatpush1.bf16.msra.mxu1 %v8744_v0  ;;  %3619 = vmatprep.subr.bf16.mxu0 %v8745_v1  ;;  %v8774_v0 = vld [vmem:[#allocation80_spill] sm:$0xff]  ;;  %v8775_v1 = vld [vmem:[#allocation81_spill] sm:$0xff] }
 0x3a6   : > { %3701 = vmatprep.subr.bf16.mxu1 %v8746_v2  ;;  %v8776_v2 = vld [vmem:[#allocation82_spill] sm:$0xff] }
 0x3a8   : > { %3620 = vmatpush1.bf16.msra.mxu0 %v8747_v34  ;;  %v8777_v34 = vld [vmem:[#allocation83_spill] sm:$0xff] }
 0x3a9   : > { %3702 = vmatpush1.bf16.msra.mxu1 %v8748_v14  ;;  %3621 = vmatprep.subr.bf16.mxu0 %v8749_v10  ;;  %v8778_v14 = vld [vmem:[#allocation84_spill] sm:$0xff] }
 0x3aa   : > { %3703 = vmatprep.subr.bf16.mxu1 %v8750_v6 }
 0x3ac   : > { %3622 = vmatpush1.bf16.msra.mxu0 %v8751_v39  ;;  %v8779_v39 = vld [vmem:[#allocation85_spill] sm:$0xff] }
 0x3ad   : > { %3704 = vmatpush1.bf16.msra.mxu1 %v8752_v40  ;;  %3623 = vmatprep.subr.bf16.mxu0 %v8753_v13 }
 0x3ae   : > { %3705 = vmatprep.subr.bf16.mxu1 %v8754_v42 }
 0x3b0   : > { %3624 = vmatpush1.bf16.msra.mxu0 %v8756_v46  ;;  %v8781_v46 = vld [vmem:[#allocation87_spill] sm:$0xff] }
 0x3b1   : > { %3706 = vmatpush1.bf16.msra.mxu1 %v8757_v47  ;;  %3634 = vmatprep.subr.bf16.mxu0 %v8758_v48 }
 0x3b2   : > { %3716 = vmatprep.subr.bf16.mxu1 %v8759_v49  ;;  %v8782_v49 = vld [vmem:[#allocation88_spill] sm:$0xff] }
 0x3b3   : > { %3626 = vmatmul.mubr.bf16.vlgmr.msra.gmra.mrb[16].mxu0 %v3589_v44 }
 0x3b4   : > { %3635 = vmatpush1.bf16.msra.mxu0 %v8760_v51  ;;  %3708 = vmatmul.mubr.bf16.vlgmr.msra.gmra.mrb[16].mxu1 %v3589_v44  ;;  %v8780_v44 = vld [vmem:[#allocation86_spill] sm:$0xff] }
 0x3b5   : > { %3717 = vmatpush1.bf16.msra.mxu1 %v8761_v52  ;;  %3636 = vmatprep.subr.bf16.mxu0 %v8762_v53  ;;  %v8784_v51 = vld [vmem:[#allocation90_spill] sm:$0xff]  ;;  %v6650_v52 = vld [vmem:[#allocation10 + $0xac] ss:$16 sps:$4 sm:$0xff]  }
 0x3b6   : > { %3718 = vmatprep.subr.bf16.mxu1 %v8763_v54  ;;  %3666 = vmatprep.mubr.bf16.mxu0 %v3592_v50  ;;  %v6651_v54 = vld [vmem:[#allocation10 + $0xa0] ss:$16 sps:$4 sm:$0xff]  }
 0x3b7   : > { %3748 = vmatprep.mubr.bf16.mxu1 %v3592_v50  ;;  %v8783_v50 = vld [vmem:[#allocation89_spill] sm:$0xff] }
 0x3b8   : > { %3637 = vmatpush1.bf16.msra.mxu0 %v8764_v55 }
 0x3b9   : > { %3719 = vmatpush1.bf16.msra.mxu1 %v8765_v56  ;;  %3638 = vmatprep.subr.bf16.mxu0 %v8766_v57  ;;  %v6652_v56 = vld [vmem:[#allocation10 + $0xa8] ss:$16 sps:$4 sm:$0xff]   ;;  %v6653_v57 = vld [vmem:[#allocation10 + $0xc4] ss:$16 sps:$4 sm:$0xff]  }
 0x3ba   : > { %3720 = vmatprep.subr.bf16.mxu1 %v8767_v58  ;;  %v6654_v58 = vld [vmem:[#allocation10 + $0xcc] ss:$16 sps:$4 sm:$0xff]  }
 0x3bc   : > { %3639 = vmatpush1.bf16.msra.mxu0 %v8768_v15 }
 0x3bd   : > { %3721 = vmatpush1.bf16.msra.mxu1 %v8769_v59  ;;  %3640 = vmatprep.subr.bf16.mxu0 %v8770_v60  ;;  %v6655_v59 = vld [vmem:[#allocation10 + $0xc0] ss:$16 sps:$4 sm:$0xff]   ;;  %v6656_v60 = vld [vmem:[#allocation10 + $0xc8] ss:$16 sps:$4 sm:$0xff]  }
 0x3be   : > { %3722 = vmatprep.subr.bf16.mxu1 %v8771_v61  ;;  %v6657_v61 = vld [vmem:[#allocation10 + $0xe4] ss:$16 sps:$4 sm:$0xff]  }
 0x3c0   : > { %3641 = vmatpush1.bf16.msra.mxu0 %v8772_v62  ;;  %v6658_v62 = vld [vmem:[#allocation10 + $0xec] ss:$16 sps:$4 sm:$0xff]  }
 0x3c1   : > { %3723 = vmatpush1.bf16.msra.mxu1 %v8773_v63  ;;  %3642 = vmatprep.subr.bf16.mxu0 %v8774_v0 }
 0x3c2   : > { %3724 = vmatprep.subr.bf16.mxu1 %v8775_v1  ;;  %v6659_v1 = vld [vmem:[#allocation10 + $0xe0] ss:$16 sps:$4 sm:$0xff]  }
 0x3c4   : > { %3643 = vmatpush1.bf16.msra.mxu0 %v8776_v2  ;;  %v6660_v2 = vld [vmem:[#allocation10 + $0xe8] ss:$16 sps:$4 sm:$0xff]  }
 0x3c5   : > { %3725 = vmatpush1.bf16.msra.mxu1 %v8777_v34  ;;  %3644 = vmatprep.subr.bf16.mxu0 %v8778_v14  ;;  %v6661_v34 = vld [vmem:[#allocation10 + $0x104] ss:$16 sps:$4 sm:$0xff]   ;;  %v6662_v14 = vld [vmem:[#allocation10 + $0x10c] ss:$16 sps:$4 sm:$0xff]  }
 0x3c6   : > { %v8088_v10 = vpop.f32.mrb[8].mxu0  ;;  %v8090_v6 = vpop.f32.mrb[8].mxu1  ;;  %3726 = vmatprep.subr.bf16.mxu1 %v8779_v39 }
 0x3c7   : > { %v8093_v40 = vpop.f32.mrb[9].mxu0  ;;  %v8095_v13 = vpop.f32.mrb[9].mxu1 }
 0x3c8   : > { %v3324_v42 = vpop.f32.mrb[10].mxu0  ;;  %v3406_v20 = vpop.f32.mrb[10].mxu1  ;;  %3645 = vmatpush1.bf16.msra.mxu0 %v8780_v44  ;;  %v6664_v44 = vld [vmem:[#allocation10 + $0x108] ss:$16 sps:$4 sm:$0xff]  }
 0x3c9   : > { %3727 = vmatpush1.bf16.msra.mxu1 %v8781_v46  ;;  %v3325_v47 = vpop.f32.mrb[11].mxu0  ;;  %v3407_v48 = vpop.f32.mrb[11].mxu1  ;;  %3646 = vmatprep.subr.bf16.mxu0 %v8782_v49  ;;  %v6663_v42 = vld [vmem:[#allocation10 + $0x100] ss:$16 sps:$4 sm:$0xff]   ;;  %v6665_v46 = vld [vmem:[#allocation10 + $0x124] ss:$16 sps:$4 sm:$0xff]  }
 0x3ca   : > { %3728 = vmatprep.subr.bf16.mxu1 %v8783_v50  ;;  %v6666_v47 = vld [vmem:[#allocation10 + $0x12c] ss:$16 sps:$4 sm:$0xff]   ;;  %v6667_v49 = vld [vmem:[#allocation10 + $0x120] ss:$16 sps:$4 sm:$0xff]  }
 0x3cc   : > { %3647 = vmatpush1.bf16.msra.mxu0 %v8784_v51  ;;  %v6668_v51 = vld [vmem:[#allocation10 + $0x128] ss:$16 sps:$4 sm:$0xff]  }
 0x3cd   : > { %3729 = vmatpush1.bf16.msra.mxu1 %v8688_v21  ;;  %3648 = vmatprep.subr.bf16.mxu0 %v8689_v18  ;;  %v8785_v21 = vld [vmem:[#allocation109_spill] sm:$0xff]  ;;  %v8787_v18 = vld [vmem:[#allocation112_spill] sm:$0xff] }
 0x3ce   : > { %3730 = vmatprep.subr.bf16.mxu1 %v8690_v29  ;;  %v8788_v29 = vld [vmem:[#allocation115_spill] sm:$0xff] }
 0x3d0   : > { %3649 = vmatpush1.bf16.msra.mxu0 %v8691_v36  ;;  %v8786_v36 = vld [vmem:[#allocation110_spill] sm:$0xff] }
 0x3d1   : > { %3731 = vmatpush1.bf16.msra.mxu1 %v8692_v26  ;;  %3650 = vmatprep.subr.bf16.mxu0 %v8693_v27  ;;  %v8789_v26 = vld [vmem:[#allocation121_spill] sm:$0xff]  ;;  %v8790_v27 = vld [vmem:[#allocation62_spill] sm:$0xff] }
 0x3d2   : > { %3732 = vmatprep.subr.bf16.mxu1 %v8694_v30  ;;  %v3591_v30 = vpack.c.bf16 %v8790_v27, %v8790_v27  ;;  %v6673_v27 = vld [vmem:[#allocation10 + $0x164] ss:$16 sps:$4 sm:$0xff]  }
 0x3d4   : > { %3651 = vmatpush1.bf16.msra.mxu0 %v8695_v23  ;;  %v6630_v23 = vld [vmem:[#allocation10 + $0xc] ss:$16 sps:$4 sm:$0xff]  }
 0x3d5   : > { %3733 = vmatpush1.bf16.msra.mxu1 %v8696_v7  ;;  %3652 = vmatprep.subr.bf16.mxu0 %v8697_v4  ;;  %v8791_v7 = vld [vmem:[#allocation125_spill] sm:$0xff]  ;;  %v6631_v4 = vld [vmem:[#allocation10] ss:$16 sps:$4 sm:$0xff]  }
 0x3d6   : > { %3734 = vmatprep.subr.bf16.mxu1 %v8698_v3  ;;  %v6634_v3 = vld [vmem:[#allocation10 + $0x2c] ss:$16 sps:$4 sm:$0xff]  }
 0x3d8   : > { %3653 = vmatpush1.bf16.msra.mxu0 %v8699_v5  ;;  %v6637_v5 = vld [vmem:[#allocation10 + $0x44] ss:$16 sps:$4 sm:$0xff]  }
 0x3d9   : > { %3735 = vmatpush1.bf16.msra.mxu1 %v8700_v8  ;;  %3654 = vmatprep.subr.bf16.mxu0 %v8701_v22  ;;  %v6638_v8 = vld [vmem:[#allocation10 + $0x4c] ss:$16 sps:$4 sm:$0xff]   ;;  %v6639_v22 = vld [vmem:[#allocation10 + $0x40] ss:$16 sps:$4 sm:$0xff]  }
 0x3da   : > { %3736 = vmatprep.subr.bf16.mxu1 %v8702_v28  ;;  %v6640_v28 = vld [vmem:[#allocation10 + $0x48] ss:$16 sps:$4 sm:$0xff]  }
 0x3dc   : > { %3655 = vmatpush1.bf16.msra.mxu0 %v8703_v41  ;;  %v6641_v41 = vld [vmem:[#allocation10 + $0x64] ss:$16 sps:$4 sm:$0xff]  }
 0x3dd   : > { %3737 = vmatpush1.bf16.msra.mxu1 %v8704_v19  ;;  %3656 = vmatprep.subr.bf16.mxu0 %v8705_v35  ;;  %v6642_v19 = vld [vmem:[#allocation10 + $0x6c] ss:$16 sps:$4 sm:$0xff]   ;;  %v2435_v55 = vpop.xlane.xlu1 %2434 }
 0x3de   : > { %3738 = vmatprep.subr.bf16.mxu1 %v8785_v21  ;;  %v2409_v35 = vpop.xlane.xlu0 %2408  ;;  %v6669_v21 = vld [vmem:[#allocation10 + $0x144] ss:$16 sps:$4 sm:$0xff]  }
 0x3e0   : > { %3657 = vmatpush1.bf16.msra.mxu0 %v8786_v36  ;;  %v6670_v36 = vld [vmem:[#allocation10 + $0x14c] ss:$16 sps:$4 sm:$0xff]  }
 0x3e1   : > { %3739 = vmatpush1.bf16.msra.mxu1 %v8708_v9  ;;  %3658 = vmatprep.subr.bf16.mxu0 %v8787_v18  ;;  %v6644_v9 = vld [vmem:[#allocation10 + $0x68] ss:$16 sps:$4 sm:$0xff]   ;;  %v2448_v63 = vpop.xlane.xlu1 %2447 }
 0x3e2   : > { %3740 = vmatprep.subr.bf16.mxu1 %v8710_v11  ;;  %v6646_v11 = vld [vmem:[#allocation10 + $0x8c] ss:$16 sps:$4 sm:$0xff]  }
 0x3e4   : > { %3659 = vmatpush1.bf16.msra.mxu0 %v8711_v31  ;;  %v6647_v31 = vld [vmem:[#allocation10 + $0x80] ss:$16 sps:$4 sm:$0xff]  }
 0x3e5   : > { %3741 = vmatpush1.bf16.msra.mxu1 %v8788_v29  ;;  %3660 = vmatprep.subr.bf16.mxu0 %v8713_v17  ;;  %v2422_v17 = vpop.xlane.xlu0 %2421  ;;  %v6671_v29 = vld [vmem:[#allocation10 + $0x140] ss:$16 sps:$4 sm:$0xff]  }
 0x3e6   : > { %3742 = vmatprep.subr.bf16.mxu1 %v8714_v24  ;;  %v6648_v24 = vld [vmem:[#allocation10 + $0x88] ss:$16 sps:$4 sm:$0xff]   ;;  %v2449_v53 = vmax.f32 %v2409_v35, %v2422_v17 }
 0x3e8   : > { %3661 = vmatpush1.bf16.msra.mxu0 %v8715_v25  ;;  %v6649_v25 = vld [vmem:[#allocation10 + $0xa4] ss:$16 sps:$4 sm:$0xff]   ;;  %v2450_v15 = vmax.f32 %v2449_v53, %v2435_v55  ;;  %v6691_v53 = vld [vmem:[#allocation10 + $0x1e0] ss:$16 sps:$4 sm:$0xff]  }
 0x3e9   : > { %3743 = vmatpush1.bf16.msra.mxu1 %v8716_v16  ;;  %3662 = vmatprep.subr.bf16.mxu0 %v8717_v33  ;;  %v6629_v16 = vld [vmem:[#allocation10 + $0x4] ss:$16 sps:$4 sm:$0xff]   ;;  %v6643_v33 = vld [vmem:[#allocation10 + $0x60] ss:$16 sps:$4 sm:$0xff]  }
 0x3ea   : > { %3744 = vmatprep.subr.bf16.mxu1 %v8789_v26  ;;  %v2451_v0 = vmax.f32 %v2450_v15, %v2448_v63  ;;  %v6672_v26 = vld [vmem:[#allocation10 + $0x148] ss:$16 sps:$4 sm:$0xff]   ;;  %v8793_v15 = vld [vmem:[#allocation126_spill] sm:$0xff] }
 0x3ec   : > { %3663 = vmatpush1.bf16.msra.mxu0 %v7794_v37  ;;  %v3766_v37 = vpack.c.bf16 %v8791_v7, %v8791_v7  ;;  %v2452_v39 = vsub.f32 %v2409_v35, %v2451_v0  ;;  %v2455_v20 = vsub.f32 %v2422_v17, %v2451_v0  ;;  %v2458_v18 = vsub.f32 %v2435_v55, %v2451_v0  ;;  %v6675_v7 = vld [vmem:[#allocation10 + $0x160] ss:$16 sps:$4 sm:$0xff]   ;;  %v6692_v55 = vld [vmem:[#allocation10 + $0x1e8] ss:$16 sps:$4 sm:$0xff]  }
 0x3ed   : > { %3745 = vmatpush1.bf16.msra.mxu1 %v8719_v32  ;;  %3664 = vmatprep.subr.bf16.mxu0 %v7800_v12  ;;  %v6632_v12 = vld [vmem:[#allocation10 + $0x8] ss:$16 sps:$4 sm:$0xff]   ;;  %v6645_v32 = vld [vmem:[#allocation10 + $0x84] ss:$16 sps:$4 sm:$0xff]  }
 0x3ee   : > { %3746 = vmatprep.subr.bf16.mxu1 %v7802_v43  ;;  %v6633_v43 = vld [vmem:[#allocation10 + $0x24] ss:$16 sps:$4 sm:$0xff]   ;;  %v2453_v48 = vmul.f32 1.442695, %v2452_v39  ;;  %v2456_v50 = vmul.f32 1.442695, %v2455_v20 }
 0x3ef   : > { %v6704_v39 = vld [vmem:[#allocation10 + $0x248] ss:$16 sps:$4 sm:$0xff]   ;;  %v6706_v20 = vld [vmem:[#allocation10 + $0x26c] ss:$16 sps:$4 sm:$0xff]  }
 0x3f0   : > { %3665 = vmatpush1.bf16.msra.mxu0 %v7806_v38  ;;  %v6635_v38 = vld [vmem:[#allocation10 + $0x20] ss:$16 sps:$4 sm:$0xff]   ;;  %6617 = vpow2.f32 %v2453_v48  ;;  %v6709_v48 = vld [vmem:[#allocation10 + $0x284] ss:$16 sps:$4 sm:$0xff]  }
 0x3f1   : > { %3747 = vmatpush1.bf16.msra.mxu1 %v7808_v45  ;;  %3769 = vmatprep.subr.bf16.mxu0 %v6629_v16  ;;  %v6636_v45 = vld [vmem:[#allocation10 + $0x28] ss:$16 sps:$4 sm:$0xff]   ;;  %6619 = vpow2.f32 %v2456_v50  ;;  %v2459_v16 = vmul.f32 1.442695, %v2458_v18  ;;  %v6713_v18 = vld [vmem:[#allocation10 + $0x2a4] ss:$16 sps:$4 sm:$0xff]  }
 0x3f2   : > { %3851 = vmatprep.subr.bf16.mxu1 %v6630_v23  ;;  %v2461_v23 = vsub.f32 %v2448_v63, %v2451_v0  ;;  %v6698_v63 = vld [vmem:[#allocation10 + $0x22c] ss:$16 sps:$4 sm:$0xff]   ;;  %v6699_v0 = vld [vmem:[#allocation10 + $0x220] ss:$16 sps:$4 sm:$0xff]  }
 0x3f3   : > { %3667 = vmatmul.mubr.bf16.vlgmr.msra.gmra.mrb[16].mxu0 %v3591_v30  ;;  %6621 = vpow2.f32 %v2459_v16 }
 0x3f4   : > { %3749 = vmatmul.mubr.bf16.vlgmr.msra.gmra.mrb[16].mxu1 %v3591_v30  ;;  %3770 = vmatpush1.bf16.msra.mxu0 %v6631_v4  ;;  %v6674_v30 = vld [vmem:[#allocation10 + $0x16c] ss:$16 sps:$4 sm:$0xff]   ;;  %v6677_v4 = vld [vmem:[#allocation10 + $0x184] ss:$16 sps:$4 sm:$0xff]  }
 0x3f5   : > { %3852 = vmatpush1.bf16.msra.mxu1 %v6632_v12  ;;  %3771 = vmatprep.subr.bf16.mxu0 %v6633_v43  ;;  %v6678_v12 = vld [vmem:[#allocation10 + $0x18c] ss:$16 sps:$4 sm:$0xff]   ;;  %v2462_v43 = vmul.f32 1.442695, %v2461_v23 }
 0x3f6   : > { %3853 = vmatprep.subr.bf16.mxu1 %v6634_v3  ;;  %3801 = vmatprep.mubr.bf16.mxu0 %v3766_v37  ;;  %v6679_v3 = vld [vmem:[#allocation10 + $0x180] ss:$16 sps:$4 sm:$0xff]  }
 0x3f7   : > { %3883 = vmatprep.mubr.bf16.mxu1 %v3766_v37  ;;  %v6676_v37 = vld [vmem:[#allocation10 + $0x168] ss:$16 sps:$4 sm:$0xff]   ;;  %6623 = vpow2.f32 %v2462_v43 }
 0x3f8   : > { %3772 = vmatpush1.bf16.msra.mxu0 %v6635_v38  ;;  %v6680_v38 = vld [vmem:[#allocation10 + $0x188] ss:$16 sps:$4 sm:$0xff]  }
 0x3f9   : > { %3854 = vmatpush1.bf16.msra.mxu1 %v6636_v45  ;;  %3773 = vmatprep.subr.bf16.mxu0 %v6637_v5  ;;  %v6681_v45 = vld [vmem:[#allocation10 + $0x1a4] ss:$16 sps:$4 sm:$0xff]  }
 0x3fa   : > { %3855 = vmatprep.subr.bf16.mxu1 %v6638_v8  ;;  %v8143_v5 = vpop.eup %6617  ;;  %v6682_v8 = vld [vmem:[#allocation10 + $0x1ac] ss:$16 sps:$4 sm:$0xff]  }
 0x3fc   : > { %3774 = vmatpush1.bf16.msra.mxu0 %v6639_v22  ;;  %v8145_v22 = vpop.eup %6619 }
 0x3fd   : > { %3856 = vmatpush1.bf16.msra.mxu1 %v6640_v28  ;;  %3775 = vmatprep.subr.bf16.mxu0 %v6641_v41  ;;  %v6683_v28 = vld [vmem:[#allocation10 + $0x1a0] ss:$16 sps:$4 sm:$0xff]   ;;  %v6684_v41 = vld [vmem:[#allocation10 + $0x1a8] ss:$16 sps:$4 sm:$0xff]   ;;  %v2464_v35 = vadd.f32 %v8145_v22, %v8143_v5 }
 0x3fe   : > { %3857 = vmatprep.subr.bf16.mxu1 %v6642_v19  ;;  %v6685_v19 = vld [vmem:[#allocation10 + $0x1c4] ss:$16 sps:$4 sm:$0xff]  }
 0x400   : > { %3776 = vmatpush1.bf16.msra.mxu0 %v6643_v33  ;;  %v6686_v33 = vld [vmem:[#allocation10 + $0x1cc] ss:$16 sps:$4 sm:$0xff]  }
 0x401   : > { %3858 = vmatpush1.bf16.msra.mxu1 %v6644_v9  ;;  %3777 = vmatprep.subr.bf16.mxu0 %v6645_v32  ;;  %v6687_v9 = vld [vmem:[#allocation10 + $0x1c0] ss:$16 sps:$4 sm:$0xff]   ;;  %v8149_v32 = vpop.eup %6621 }
 0x402   : > { %3859 = vmatprep.subr.bf16.mxu1 %v6646_v11  ;;  %v6688_v11 = vld [vmem:[#allocation10 + $0x1c8] ss:$16 sps:$4 sm:$0xff]   ;;  %v2465_v17 = vadd.f32 %v8149_v32, %v2464_v35  ;;  %v6718_v35 = vld [vmem:[#allocation10 + $0x2cc] ss:$16 sps:$4 sm:$0xff]  }
 0x404   : > { %3778 = vmatpush1.bf16.msra.mxu0 %v6647_v31  ;;  %v6689_v31 = vld [vmem:[#allocation10 + $0x1e4] ss:$16 sps:$4 sm:$0xff]  }
 0x405   : > { %3860 = vmatpush1.bf16.msra.mxu1 %v6648_v24  ;;  %3779 = vmatprep.subr.bf16.mxu0 %v6649_v25  ;;  %v6690_v24 = vld [vmem:[#allocation10 + $0x1ec] ss:$16 sps:$4 sm:$0xff]   ;;  %v8792_v25 = vld [vmem:[#allocation124_spill] sm:$0xff] }
 0x406   : > { %3861 = vmatprep.subr.bf16.mxu1 %v6650_v52  ;;  %v3765_v52 = vpack.c.bf16 %v8792_v25, %v8792_v25  ;;  %v6725_v25 = vld [vmem:[#allocation10 + $0x304] ss:$16 sps:$4 sm:$0xff]  }
 0x408   : > { %3780 = vmatpush1.bf16.msra.mxu0 %v6651_v54  ;;  %v8154_v54 = vpop.eup %6623 }
 0x409   : > { %3862 = vmatpush1.bf16.msra.mxu1 %v6652_v56  ;;  %3781 = vmatprep.subr.bf16.mxu0 %v6653_v57  ;;  %v6693_v56 = vld [vmem:[#allocation10 + $0x204] ss:$16 sps:$4 sm:$0xff]   ;;  %v2466_v57 = vadd.f32 %v8154_v54, %v2465_v17  ;;  %v6723_v17 = vld [vmem:[#allocation10 + $0x2e0] ss:$16 sps:$4 sm:$0xff]  }
 0x40a   : > { %3863 = vmatprep.subr.bf16.mxu1 %v6654_v58  ;;  %v6694_v58 = vld [vmem:[#allocation10 + $0x20c] ss:$16 sps:$4 sm:$0xff]  }
 0x40b   : > { %6625 = vrcp.f32 %v2466_v57  ;;  %v6730_v57 = vld [vmem:[#allocation10 + $0x32c] ss:$16 sps:$4 sm:$0xff]  }
 0x40c   : > { %3782 = vmatpush1.bf16.msra.mxu0 %v6655_v59  ;;  %v3768_v59 = vpack.c.bf16 %v8793_v15, %v8793_v15  ;;  %v6732_v15 = vld [vmem:[#allocation10 + $0x328] ss:$16 sps:$4 sm:$0xff]  }
 0x40d   : > { %3864 = vmatpush1.bf16.msra.mxu1 %v6656_v60  ;;  %3783 = vmatprep.subr.bf16.mxu0 %v6657_v61  ;;  %v6695_v60 = vld [vmem:[#allocation10 + $0x200] ss:$16 sps:$4 sm:$0xff]   ;;  %v6696_v61 = vld [vmem:[#allocation10 + $0x208] ss:$16 sps:$4 sm:$0xff]  }
 0x40e   : > { %3865 = vmatprep.subr.bf16.mxu1 %v6658_v62  ;;  %v6697_v62 = vld [vmem:[#allocation10 + $0x224] ss:$16 sps:$4 sm:$0xff]  }
 0x410   : > { %3784 = vmatpush1.bf16.msra.mxu0 %v6659_v1  ;;  %v6700_v1 = vld [vmem:[#allocation10 + $0x228] ss:$16 sps:$4 sm:$0xff]  }
 0x411   : > { %3866 = vmatpush1.bf16.msra.mxu1 %v6660_v2  ;;  %3785 = vmatprep.subr.bf16.mxu0 %v6661_v34  ;;  %v6701_v2 = vld [vmem:[#allocation10 + $0x244] ss:$16 sps:$4 sm:$0xff]   ;;  %v6702_v34 = vld [vmem:[#allocation10 + $0x24c] ss:$16 sps:$4 sm:$0xff]  }
 0x412   : > { %3867 = vmatprep.subr.bf16.mxu1 %v6662_v14  ;;  %v6703_v14 = vld [vmem:[#allocation10 + $0x240] ss:$16 sps:$4 sm:$0xff]  }
 0x414   : > { %3786 = vmatpush1.bf16.msra.mxu0 %v6663_v42  ;;  %v6705_v42 = vld [vmem:[#allocation10 + $0x264] ss:$16 sps:$4 sm:$0xff]  }
 0x415   : > { %3868 = vmatpush1.bf16.msra.mxu1 %v6664_v44  ;;  %3787 = vmatprep.subr.bf16.mxu0 %v6665_v46  ;;  %v8159_v44 = vpop.eup %6625  ;;  %v6707_v46 = vld [vmem:[#allocation10 + $0x260] ss:$16 sps:$4 sm:$0xff]  }
 0x416   : > { %3869 = vmatprep.subr.bf16.mxu1 %v6666_v47  ;;  %v6708_v47 = vld [vmem:[#allocation10 + $0x268] ss:$16 sps:$4 sm:$0xff]   ;;  %v2469_v50 = vmul.f32 %v8159_v44, %v8143_v5 }
 0x418   : > { %3788 = vmatpush1.bf16.msra.mxu0 %v6667_v49  ;;  %v6710_v49 = vld [vmem:[#allocation10 + $0x28c] ss:$16 sps:$4 sm:$0xff]   ;;  %v3412_v5 = vmul.f32 %v8095_v13, %v2469_v50  ;;  %v6721_v13 = vld [vmem:[#allocation10 + $0x2e4] ss:$16 sps:$4 sm:$0xff]  }
 0x419   : > { %3870 = vmatpush1.bf16.msra.mxu1 %v6668_v51  ;;  %3789 = vmatprep.subr.bf16.mxu0 %v6669_v21  ;;  %v6711_v51 = vld [vmem:[#allocation10 + $0x280] ss:$16 sps:$4 sm:$0xff]   ;;  %v6712_v21 = vld [vmem:[#allocation10 + $0x288] ss:$16 sps:$4 sm:$0xff]  }
 0x41a   : > { %3871 = vmatprep.subr.bf16.mxu1 %v6670_v36  ;;  %v2470_v36 = vmul.f32 %v8159_v44, %v8145_v22 }
 0x41c   : > { %3790 = vmatpush1.bf16.msra.mxu0 %v6671_v29 }
 0x41d   : > { %3872 = vmatpush1.bf16.msra.mxu1 %v6672_v26  ;;  %3791 = vmatprep.subr.bf16.mxu0 %v6673_v27  ;;  %v6714_v26 = vld [vmem:[#allocation10 + $0x2ac] ss:$16 sps:$4 sm:$0xff]   ;;  %v3409_v27 = vmul.f32 %v8088_v10, %v2469_v50  ;;  %v6716_v10 = vld [vmem:[#allocation10 + $0x2a8] ss:$16 sps:$4 sm:$0xff]  }
 0x41e   : > { %3873 = vmatprep.subr.bf16.mxu1 %v6674_v30 }
 0x420   : > { %3792 = vmatpush1.bf16.msra.mxu0 %v6675_v7  ;;  %v3411_v7 = vmul.f32 %v8090_v6, %v2469_v50 }
 0x421   : > { %3874 = vmatpush1.bf16.msra.mxu1 %v6676_v37  ;;  %3793 = vmatprep.subr.bf16.mxu0 %v6677_v4  ;;  %v3410_v4 = vmul.f32 %v8093_v40, %v2469_v50  ;;  %v6750_v50 = vld [vmem:[#allocation10 + $0x3cc] ss:$16 sps:$4 sm:$0xff]  }
 0x422   : > { %3875 = vmatprep.subr.bf16.mxu1 %v6678_v12 }
 0x424   : > { %3794 = vmatpush1.bf16.msra.mxu0 %v6679_v3 }
 0x425   : > { %3876 = vmatpush1.bf16.msra.mxu1 %v6680_v38  ;;  %3795 = vmatprep.subr.bf16.mxu0 %v6681_v45  ;;  %v6715_v38 = vld [vmem:[#allocation10 + $0x2a0] ss:$16 sps:$4 sm:$0xff]  }
 0x426   : > { %3877 = vmatprep.subr.bf16.mxu1 %v6682_v8 }
 0x428   : > { %3796 = vmatpush1.bf16.msra.mxu0 %v6683_v28 }
 0x429   : > { %3878 = vmatpush1.bf16.msra.mxu1 %v6684_v41  ;;  %3797 = vmatprep.subr.bf16.mxu0 %v6685_v19  ;;  %v6717_v41 = vld [vmem:[#allocation10 + $0x2c4] ss:$16 sps:$4 sm:$0xff]  }
 0x42a   : > { %3879 = vmatprep.subr.bf16.mxu1 %v6686_v33 }
 0x42c   : > { %3798 = vmatpush1.bf16.msra.mxu0 %v6687_v9  ;;  %v6719_v9 = vld [vmem:[#allocation10 + $0x2c0] ss:$16 sps:$4 sm:$0xff]  }
 0x42d   : > { %3880 = vmatpush1.bf16.msra.mxu1 %v6688_v11  ;;  %3799 = vmatprep.subr.bf16.mxu0 %v6689_v31  ;;  %v6720_v11 = vld [vmem:[#allocation10 + $0x2c8] ss:$16 sps:$4 sm:$0xff]   ;;  %v6722_v31 = vld [vmem:[#allocation10 + $0x2ec] ss:$16 sps:$4 sm:$0xff]  }
 0x42e   : > { %3881 = vmatprep.subr.bf16.mxu1 %v6690_v24  ;;  %v6724_v24 = vld [vmem:[#allocation10 + $0x2e8] ss:$16 sps:$4 sm:$0xff]  }
 0x430   : > { %3800 = vmatpush1.bf16.msra.mxu0 %v6691_v53  ;;  %v6727_v53 = vld [vmem:[#allocation10 + $0x300] ss:$16 sps:$4 sm:$0xff]  }
 0x431   : > { %3882 = vmatpush1.bf16.msra.mxu1 %v6692_v55  ;;  %3810 = vmatprep.subr.bf16.mxu0 %v6693_v56  ;;  %v6728_v55 = vld [vmem:[#allocation10 + $0x308] ss:$16 sps:$4 sm:$0xff]   ;;  %v6729_v56 = vld [vmem:[#allocation10 + $0x324] ss:$16 sps:$4 sm:$0xff]  }
 0x432   : > { %3892 = vmatprep.subr.bf16.mxu1 %v6694_v58  ;;  %v6731_v58 = vld [vmem:[#allocation10 + $0x320] ss:$16 sps:$4 sm:$0xff]  }
 0x433   : > { %3802 = vmatmul.mubr.bf16.vlgmr.msra.gmra.mrb[20].mxu0 %v3765_v52 }
 0x434   : > { %3811 = vmatpush1.bf16.msra.mxu0 %v6695_v60  ;;  %3884 = vmatmul.mubr.bf16.vlgmr.msra.gmra.mrb[20].mxu1 %v3765_v52  ;;  %v6726_v52 = vld [vmem:[#allocation10 + $0x30c] ss:$16 sps:$4 sm:$0xff]  }
 0x435   : > { %3893 = vmatpush1.bf16.msra.mxu1 %v6696_v61  ;;  %3812 = vmatprep.subr.bf16.mxu0 %v6697_v62  ;;  %v6734_v60 = vld [vmem:[#allocation10 + $0x34c] ss:$16 sps:$4 sm:$0xff]   ;;  %v6735_v61 = vld [vmem:[#allocation10 + $0x340] ss:$16 sps:$4 sm:$0xff]   ;;  %v6736_v62 = vld [vmem:[#allocation10 + $0x348] ss:$16 sps:$4 sm:$0xff]  }
 0x436   : > { %3894 = vmatprep.subr.bf16.mxu1 %v6698_v63  ;;  %3842 = vmatprep.mubr.bf16.mxu0 %v3768_v59  ;;  %v6737_v63 = vld [vmem:[#allocation10 + $0x364] ss:$16 sps:$4 sm:$0xff]  }
 0x437   : > { %3924 = vmatprep.mubr.bf16.mxu1 %v3768_v59  ;;  %v6733_v59 = vld [vmem:[#allocation10 + $0x344] ss:$16 sps:$4 sm:$0xff]  }
 0x438   : > { %3813 = vmatpush1.bf16.msra.mxu0 %v6699_v0  ;;  %v6738_v0 = vld [vmem:[#allocation10 + $0x36c] ss:$16 sps:$4 sm:$0xff]  }
 0x439   : > { %3895 = vmatpush1.bf16.msra.mxu1 %v6700_v1  ;;  %3814 = vmatprep.subr.bf16.mxu0 %v6701_v2  ;;  %v6739_v1 = vld [vmem:[#allocation10 + $0x360] ss:$16 sps:$4 sm:$0xff]   ;;  %v6740_v2 = vld [vmem:[#allocation10 + $0x368] ss:$16 sps:$4 sm:$0xff]  }
 0x43a   : > { %3896 = vmatprep.subr.bf16.mxu1 %v6702_v34  ;;  %v6741_v34 = vld [vmem:[#allocation10 + $0x384] ss:$16 sps:$4 sm:$0xff]  }
 0x43c   : > { %3815 = vmatpush1.bf16.msra.mxu0 %v6703_v14  ;;  %v6742_v14 = vld [vmem:[#allocation10 + $0x38c] ss:$16 sps:$4 sm:$0xff]  }
 0x43d   : > { %3897 = vmatpush1.bf16.msra.mxu1 %v6704_v39  ;;  %3816 = vmatprep.subr.bf16.mxu0 %v6705_v42  ;;  %v6743_v39 = vld [vmem:[#allocation10 + $0x380] ss:$16 sps:$4 sm:$0xff]   ;;  %v6744_v42 = vld [vmem:[#allocation10 + $0x388] ss:$16 sps:$4 sm:$0xff]  }
 0x43e   : > { %3898 = vmatprep.subr.bf16.mxu1 %v6706_v20  ;;  %v6745_v20 = vld [vmem:[#allocation10 + $0x3a4] ss:$16 sps:$4 sm:$0xff]  }
 0x440   : > { %3817 = vmatpush1.bf16.msra.mxu0 %v6707_v46  ;;  %v6746_v46 = vld [vmem:[#allocation10 + $0x3ac] ss:$16 sps:$4 sm:$0xff]  }
 0x441   : > { %3899 = vmatpush1.bf16.msra.mxu1 %v6708_v47  ;;  %3818 = vmatprep.subr.bf16.mxu0 %v6709_v48  ;;  %v6747_v47 = vld [vmem:[#allocation10 + $0x3a0] ss:$16 sps:$4 sm:$0xff]   ;;  %v6748_v48 = vld [vmem:[#allocation10 + $0x3a8] ss:$16 sps:$4 sm:$0xff]  }
 0x442   : > { %3900 = vmatprep.subr.bf16.mxu1 %v6710_v49  ;;  %v6749_v49 = vld [vmem:[#allocation10 + $0x3c4] ss:$16 sps:$4 sm:$0xff]  }
 0x444   : > { %3819 = vmatpush1.bf16.msra.mxu0 %v6711_v51  ;;  %v6751_v51 = vld [vmem:[#allocation10 + $0x3c0] ss:$16 sps:$4 sm:$0xff]  }
 0x445   : > { %3901 = vmatpush1.bf16.msra.mxu1 %v6712_v21  ;;  %3820 = vmatprep.subr.bf16.mxu0 %v6713_v18  ;;  %v6752_v21 = vld [vmem:[#allocation10 + $0x3c8] ss:$16 sps:$4 sm:$0xff]   ;;  %v6754_v18 = vld [vmem:[#allocation10 + $0x3ec] ss:$16 sps:$4 sm:$0xff]  }
 0x446   : > { %v3492_v29 = vpop.f32.mrb[12].mxu0  ;;  %3902 = vmatprep.subr.bf16.mxu1 %v6714_v26 }
 0x447   : > { %v3581_v30 = vmul.f32 %v3492_v29, %v2470_v36  ;;  %v3574_v16 = vpop.f32.mrb[12].mxu1  ;;  %v3494_v23 = vpop.f32.mrb[13].mxu0  ;;  %v8794_v29 = vld [vmem:[#allocation24_spill] sm:$0xff] }
 0x448   : > { %v3583_v37 = vmul.f32 %v3574_v16, %v2470_v36  ;;  %v3582_v12 = vmul.f32 %v3494_v23, %v2470_v36  ;;  %v3576_v43 = vpop.f32.mrb[13].mxu1  ;;  %v3496_v3 = vpop.f32.mrb[14].mxu0  ;;  %3821 = vmatpush1.bf16.msra.mxu0 %v6715_v38  ;;  %v3767_v26 = vpack.c.bf16 %v8794_v29, %v8794_v29  ;;  %v2471_v16 = vmul.f32 %v8159_v44, %v8149_v32  ;;  %v6437_v29 = vld [vmem:[#allocation11 + $0x40] ss:$16 sps:$4 sm:$0xff]  }
 0x449   : > { %v8168_v45 = vadd.f32 %v3581_v30, %v3409_v27  ;;  %v3584_v8 = vmul.f32 %v3576_v43, %v2470_v36  ;;  %v3578_v22 = vpop.f32.mrb[14].mxu1  ;;  %3903 = vmatpush1.bf16.msra.mxu1 %v6716_v10  ;;  %v3497_v28 = vpop.f32.mrb[15].mxu0  ;;  %3822 = vmatprep.subr.bf16.mxu0 %v6717_v41  ;;  %v6753_v36 = vld [vmem:[#allocation10 + $0x3e4] ss:$16 sps:$4 sm:$0xff]   ;;  %v6755_v27 = vld [vmem:[#allocation10 + $0x3e0] ss:$16 sps:$4 sm:$0xff]  }
 0x44a   : > { %v8171_v6 = vadd.f32 %v3583_v37, %v3411_v7  ;;  %v8173_v19 = vadd.f32 %v3582_v12, %v3410_v4  ;;  %v3579_v40 = vpop.f32.mrb[15].mxu1  ;;  %3904 = vmatprep.subr.bf16.mxu1 %v6718_v35  ;;  %v6756_v30 = vld [vmem:[#allocation10 + $0x3e8] ss:$16 sps:$4 sm:$0xff]   ;;  %v3941_v35 = vld [vmem:[%s8319_s6] sm:$0xf] }
 0x44b   : > { %v8175_v33 = vadd.f32 %v3584_v8, %v3412_v5 }
 0x44c   : > { %3823 = vmatpush1.bf16.msra.mxu0 %v6719_v9  ;;  %v2472_v9 = vmul.f32 %v8159_v44, %v8154_v54 }
 0x44d   : > { %3905 = vmatpush1.bf16.msra.mxu1 %v6720_v11  ;;  %3824 = vmatprep.subr.bf16.mxu0 %v6721_v13 }
 0x44e   : > { %3906 = vmatprep.subr.bf16.mxu1 %v6722_v31 }
 0x450   : > { %3825 = vmatpush1.bf16.msra.mxu0 %v6723_v17 }
 0x451   : > { %3907 = vmatpush1.bf16.msra.mxu1 %v6724_v24  ;;  %3826 = vmatprep.subr.bf16.mxu0 %v6725_v25 }
 0x452   : > { %3908 = vmatprep.subr.bf16.mxu1 %v6726_v52  ;;  %v8796_v52 = vld [vmem:[#allocation21_spill] sm:$0xff] }
 0x454   : > { %3827 = vmatpush1.bf16.msra.mxu0 %v6727_v53 }
 0x455   : > { %3909 = vmatpush1.bf16.msra.mxu1 %v6728_v55  ;;  %3828 = vmatprep.subr.bf16.mxu0 %v6729_v56 }
 0x456   : > { %3910 = vmatprep.subr.bf16.mxu1 %v6730_v57 }
 0x458   : > { %3829 = vmatpush1.bf16.msra.mxu0 %v6731_v58 }
 0x459   : > { %3911 = vmatpush1.bf16.msra.mxu1 %v6732_v15  ;;  %3830 = vmatprep.subr.bf16.mxu0 %v6733_v59  ;;  %v8797_v59 = vld [vmem:[#allocation23_spill] sm:$0xff] }
 0x45a   : > { %3912 = vmatprep.subr.bf16.mxu1 %v6734_v60  ;;  %v3954_v60 = vrot.slane %v3941_v35, %v8797_v59 }
 0x45c   : > { %3831 = vmatpush1.bf16.msra.mxu0 %v6735_v61 }
 0x45d   : > { %3913 = vmatpush1.bf16.msra.mxu1 %v6736_v62  ;;  %3832 = vmatprep.subr.bf16.mxu0 %v6737_v63 }
 0x45e   : > { %3914 = vmatprep.subr.bf16.mxu1 %v6738_v0  ;;  %v8798_v0 = vld [vmem:[#allocation22_spill] sm:$0xff] }
 0x460   : > { %3833 = vmatpush1.bf16.msra.mxu0 %v6739_v1  ;;  %v3958_v1 = vrot.slane %v3941_v35, %v8798_v0 }
 0x461   : > { %3915 = vmatpush1.bf16.msra.mxu1 %v6740_v2  ;;  %3834 = vmatprep.subr.bf16.mxu0 %v6741_v34 }
 0x462   : > { %3916 = vmatprep.subr.bf16.mxu1 %v6742_v14 }
 0x464   : > { %3835 = vmatpush1.bf16.msra.mxu0 %v6743_v39 }
 0x465   : > { %3917 = vmatpush1.bf16.msra.mxu1 %v6744_v42  ;;  %3836 = vmatprep.subr.bf16.mxu0 %v6745_v20  ;;  %v6425_v20 = vld [vmem:[#allocation11] ss:$16 sps:$4 sm:$0xff]  }
 0x466   : > { %3918 = vmatprep.subr.bf16.mxu1 %v6746_v46  ;;  %v6427_v46 = vld [vmem:[#allocation11 + $0x4] ss:$16 sps:$4 sm:$0xff]  }
 0x468   : > { %3837 = vmatpush1.bf16.msra.mxu0 %v6747_v47  ;;  %v6428_v47 = vld [vmem:[#allocation11 + $0x200] ss:$16 sps:$4 sm:$0xff]  }
 0x469   : > { %3919 = vmatpush1.bf16.msra.mxu1 %v6748_v48  ;;  %3838 = vmatprep.subr.bf16.mxu0 %v6749_v49  ;;  %v6430_v48 = vld [vmem:[#allocation11 + $0x204] ss:$16 sps:$4 sm:$0xff]  }
 0x46a   : > { %3920 = vmatprep.subr.bf16.mxu1 %v6750_v50  ;;  %v6433_v49 = vld [vmem:[#allocation11 + $0x24] ss:$16 sps:$4 sm:$0xff]  }
 0x46b   : > { %v6436_v50 = vld [vmem:[#allocation11 + $0x224] ss:$16 sps:$4 sm:$0xff]  }
 0x46c   : > { %3839 = vmatpush1.bf16.msra.mxu0 %v6751_v51  ;;  %v6431_v51 = vld [vmem:[#allocation11 + $0x20] ss:$16 sps:$4 sm:$0xff]  }
 0x46d   : > { %3921 = vmatpush1.bf16.msra.mxu1 %v6752_v21  ;;  %3840 = vmatprep.subr.bf16.mxu0 %v6753_v36  ;;  %v6434_v21 = vld [vmem:[#allocation11 + $0x220] ss:$16 sps:$4 sm:$0xff]   ;;  %v6439_v36 = vld [vmem:[#allocation11 + $0x44] ss:$16 sps:$4 sm:$0xff]  }
 0x46e   : > { %3922 = vmatprep.subr.bf16.mxu1 %v6754_v18  ;;  %v6442_v18 = vld [vmem:[#allocation11 + $0x244] ss:$16 sps:$4 sm:$0xff]  }
 0x470   : > { %3841 = vmatpush1.bf16.msra.mxu0 %v6755_v27  ;;  %v6445_v27 = vld [vmem:[#allocation11 + $0x64] ss:$16 sps:$4 sm:$0xff]  }
 0x471   : > { %3923 = vmatpush1.bf16.msra.mxu1 %v6756_v30  ;;  %4844 = vmatprep.subr.bf16.mxu0 %v6427_v46  ;;  %v6448_v30 = vld [vmem:[#allocation11 + $0x264] ss:$16 sps:$4 sm:$0xff]  }
 0x472   : > { %4885 = vmatprep.subr.bf16.mxu1 %v6430_v48  ;;  %v6499_v46 = vld [vmem:[#allocation11 + $0x184] ss:$16 sps:$4 sm:$0xff]   ;;  %v6497_v48 = vld [vmem:[#allocation11 + $0x180] ss:$16 sps:$4 sm:$0xff]  }
 0x473   : > { %3843 = vmatmul.mubr.bf16.vlgmr.msra.gmra.mrb[20].mxu0 %v3767_v26 }
 0x474   : > { %3925 = vmatmul.mubr.bf16.vlgmr.msra.gmra.mrb[20].mxu1 %v3767_v26  ;;  %4845 = vmatpush1.bf16.msra.mxu0 %v6425_v20  ;;  %v6440_v26 = vld [vmem:[#allocation11 + $0x240] ss:$16 sps:$4 sm:$0xff]  }
 0x475   : > { %4886 = vmatpush1.bf16.msra.mxu1 %v6428_v47  ;;  %4846 = vmatprep.subr.bf16.mxu0 %v6433_v49  ;;  %v6494_v20 = vld [vmem:[#allocation11 + $0x360] ss:$16 sps:$4 sm:$0xff]   ;;  %v6502_v47 = vld [vmem:[#allocation11 + $0x384] ss:$16 sps:$4 sm:$0xff]  }
 0x476   : > { %4887 = vmatprep.subr.bf16.mxu1 %v6436_v50  ;;  %v6500_v49 = vld [vmem:[#allocation11 + $0x380] ss:$16 sps:$4 sm:$0xff]   ;;  %v6505_v50 = vld [vmem:[#allocation11 + $0x1a4] ss:$16 sps:$4 sm:$0xff]  }
 0x478   : > { %4847 = vmatpush1.bf16.msra.mxu0 %v6431_v51  ;;  %v6508_v51 = vld [vmem:[#allocation11 + $0x3a4] ss:$16 sps:$4 sm:$0xff]  }
 0x479   : > { %4888 = vmatpush1.bf16.msra.mxu1 %v6434_v21  ;;  %4848 = vmatprep.subr.bf16.mxu0 %v6439_v36  ;;  %v6503_v21 = vld [vmem:[#allocation11 + $0x1a0] ss:$16 sps:$4 sm:$0xff]  }
 0x47a   : > { %4889 = vmatprep.subr.bf16.mxu1 %v6442_v18  ;;  %v6506_v36 = vld [vmem:[#allocation11 + $0x3a0] ss:$16 sps:$4 sm:$0xff]   ;;  %v6511_v18 = vld [vmem:[#allocation11 + $0x1c4] ss:$16 sps:$4 sm:$0xff]  }
 0x47c   : > { %4849 = vmatpush1.bf16.msra.mxu0 %v6437_v29  ;;  %v6514_v29 = vld [vmem:[#allocation11 + $0x3c4] ss:$16 sps:$4 sm:$0xff]  }
 0x47d   : > { %4890 = vmatpush1.bf16.msra.mxu1 %v6440_v26  ;;  %4850 = vmatprep.subr.bf16.mxu0 %v6445_v27  ;;  %v6509_v26 = vld [vmem:[#allocation11 + $0x1c0] ss:$16 sps:$4 sm:$0xff]  }
 0x47e   : > { %4891 = vmatprep.subr.bf16.mxu1 %v6448_v30  ;;  %v6512_v27 = vld [vmem:[#allocation11 + $0x3c0] ss:$16 sps:$4 sm:$0xff]   ;;  %v6517_v30 = vld [vmem:[#allocation11 + $0x1e4] ss:$16 sps:$4 sm:$0xff]  }
 0x4c6   : > { %v3668_v23 = vpop.f32.mrb[16].mxu0 }
 0x4c7   : > { %v3757_v7 = vmul.f32 %v3668_v23, %v2471_v16  ;;  %v3750_v37 = vpop.f32.mrb[16].mxu1  ;;  %v3670_v4 = vpop.f32.mrb[17].mxu0  ;;  %v6446_v23 = vld [vmem:[#allocation11 + $0x260] ss:$16 sps:$4 sm:$0xff]  }
 0x4c8   : > { %v3759_v12 = vmul.f32 %v3750_v37, %v2471_v16  ;;  %v3758_v43 = vmul.f32 %v3670_v4, %v2471_v16  ;;  %v3752_v3 = vpop.f32.mrb[17].mxu1  ;;  %v3672_v38 = vpop.f32.mrb[18].mxu0  ;;  %v6454_v37 = vld [vmem:[#allocation11 + $0x284] ss:$16 sps:$4 sm:$0xff]   ;;  %v6449_v4 = vld [vmem:[#allocation11 + $0x80] ss:$16 sps:$4 sm:$0xff]   ;;  %4892 = vmatpush1.bf16.msra.mxu1 %v6446_v23 }
 0x4c9   : > { %v3761_v5 = vadd.f32 %v3757_v7, %v8168_v45  ;;  %v3760_v8 = vmul.f32 %v3752_v3, %v2471_v16  ;;  %v3754_v22 = vpop.f32.mrb[18].mxu1  ;;  %v3673_v10 = vpop.f32.mrb[19].mxu0  ;;  %v8795_v45 = vld [vmem:[#allocation20_spill] sm:$0xff]  ;;  %4893 = vmatprep.subr.bf16.mxu1 %v6454_v37  ;;  %v6523_v37 = vld [vmem:[#allocation11 + $0xc] ss:$16 sps:$4 sm:$0xff]  }
 0x4ca   : > { %v3763_v28 = vadd.f32 %v3759_v12, %v8171_v6  ;;  %v3762_v41 = vadd.f32 %v3758_v43, %v8173_v19  ;;  %v3755_v40 = vpop.f32.mrb[19].mxu1  ;;  %v3946_v31 = vrot.slane %v3941_v35, %v8795_v45  ;;  %v3950_v19 = vrot.slane %v3941_v35, %v8796_v52  ;;  %v6443_v16 = vld [vmem:[#allocation11 + $0x60] ss:$16 sps:$4 sm:$0xff]   ;;  %v6451_v7 = vld [vmem:[#allocation11 + $0x84] ss:$16 sps:$4 sm:$0xff]  }
 0x4cb   : > { %v3764_v32 = vadd.f32 %v3760_v8, %v8175_v33  ;;  %4851 = vmatpush1.bf16.msra.mxu0 %v6443_v16  ;;  %v6452_v12 = vld [vmem:[#allocation11 + $0x280] ss:$16 sps:$4 sm:$0xff]   ;;  %v6457_v43 = vld [vmem:[#allocation11 + $0xa4] ss:$16 sps:$4 sm:$0xff]  }
 0x4cc   : > { %4852 = vmatprep.subr.bf16.mxu0 %v6451_v7  ;;  %v6460_v3 = vld [vmem:[#allocation11 + $0x2a4] ss:$16 sps:$4 sm:$0xff]   ;;  %v6455_v38 = vld [vmem:[#allocation11 + $0xa0] ss:$16 sps:$4 sm:$0xff]   ;;  %4894 = vmatpush1.bf16.msra.mxu1 %v6452_v12 }
 0x4cd   : > { %v6463_v8 = vld [vmem:[#allocation11 + $0xc4] ss:$16 sps:$4 sm:$0xff]   ;;  %4895 = vmatprep.subr.bf16.mxu1 %v6460_v3  ;;  %v6461_v10 = vld [vmem:[#allocation11 + $0xc0] ss:$16 sps:$4 sm:$0xff]  }
 0x4ce   : > { %v6466_v22 = vld [vmem:[#allocation11 + $0x2c4] ss:$16 sps:$4 sm:$0xff]   ;;  %v6470_v35 = vld [vmem:[#allocation11 + $0x2e0] ss:$16 sps:$4 sm:$0xff]  }
 0x4cf   : > { %4853 = vmatpush1.bf16.msra.mxu0 %v6449_v4  ;;  %v6472_v40 = vld [vmem:[#allocation11 + $0x2e4] ss:$16 sps:$4 sm:$0xff]   ;;  %v6515_v23 = vld [vmem:[#allocation11 + $0x1e0] ss:$16 sps:$4 sm:$0xff]   ;;  %v6526_v4 = vld [vmem:[#allocation11 + $0x20c] ss:$16 sps:$4 sm:$0xff]  }
 0x4d0   : > { %4854 = vmatprep.subr.bf16.mxu0 %v6457_v43  ;;  %v6520_v16 = vld [vmem:[#allocation11 + $0x3e4] ss:$16 sps:$4 sm:$0xff]   ;;  %v6518_v7 = vld [vmem:[#allocation11 + $0x3e0] ss:$16 sps:$4 sm:$0xff]  }
 0x4d3   : > { %4855 = vmatpush1.bf16.msra.mxu0 %v6455_v38  ;;  %v3994_v38 = vld [vmem:[%s8322_s9] sm:$0xf] }
 0x4d4   : > { %4856 = vmatprep.subr.bf16.mxu0 %v6463_v8  ;;  %v4003_v8 = vrot.slane %v3994_v38, %v8796_v52 }
 0x4d7   : > { %4857 = vmatpush1.bf16.msra.mxu0 %v6461_v10  ;;  %v3999_v10 = vrot.slane %v3994_v38, %v8795_v45 }
 0x546   : > { %v3844_v11 = vpop.f32.mrb[20].mxu0 }
 0x547   : > { %v3933_v13 = vmul.f32 %v3844_v11, %v2472_v9  ;;  %v3926_v17 = vpop.f32.mrb[20].mxu1  ;;  %v3846_v24 = vpop.f32.mrb[21].mxu0  ;;  %v6478_v11 = vld [vmem:[#allocation11 + $0x304] ss:$16 sps:$4 sm:$0xff]  }
 0x548   : > { %v3935_v25 = vmul.f32 %v3926_v17, %v2472_v9  ;;  %v3934_v6 = vmul.f32 %v3846_v24, %v2472_v9  ;;  %v3928_v53 = vpop.f32.mrb[21].mxu1  ;;  %v3848_v55 = vpop.f32.mrb[22].mxu0  ;;  %v6481_v17 = vld [vmem:[#allocation11 + $0x124] ss:$16 sps:$4 sm:$0xff]  }
 0x549   : > { %v3937_v33 = vadd.f32 %v3933_v13, %v3761_v5  ;;  %v3936_v56 = vmul.f32 %v3928_v53, %v2472_v9  ;;  %v3930_v57 = vpop.f32.mrb[22].mxu1  ;;  %v3849_v58 = vpop.f32.mrb[23].mxu0  ;;  %v6458_v5 = vld [vmem:[#allocation11 + $0x2a0] ss:$16 sps:$4 sm:$0xff]   ;;  %v6475_v9 = vld [vmem:[#allocation11 + $0x104] ss:$16 sps:$4 sm:$0xff]  }
 0x54a   : > { %v3939_v15 = vadd.f32 %v3935_v25, %v3763_v28  ;;  %v3938_v54 = vadd.f32 %v3934_v6, %v3762_v41  ;;  %v3931_v44 = vpop.f32.mrb[23].mxu1  ;;  %4896 = vmatpush1.bf16.msra.mxu1 %v6458_v5  ;;  %v6464_v28 = vld [vmem:[#allocation11 + $0x2c0] ss:$16 sps:$4 sm:$0xff]   ;;  %v6469_v41 = vld [vmem:[#allocation11 + $0xe4] ss:$16 sps:$4 sm:$0xff]  }
 0x54b   : > { %v8193_v61 = vadd.f32 %v3946_v31, %v3937_v33  ;;  %v3940_v62 = vadd.f32 %v3936_v56, %v3764_v32  ;;  %4897 = vmatprep.subr.bf16.mxu1 %v6466_v22  ;;  %v6467_v32 = vld [vmem:[#allocation11 + $0xe0] ss:$16 sps:$4 sm:$0xff]   ;;  %4858 = vmatprep.subr.bf16.mxu0 %v6469_v41  ;;  %v6484_v24 = vld [vmem:[#allocation11 + $0x324] ss:$16 sps:$4 sm:$0xff]   ;;  %v4011_v22 = vrot.slane %v3994_v38, %v8798_v0 }
 0x54c   : > { %v8195_v63 = vadd.f32 %v3950_v19, %v3938_v54  ;;  %v8198_v2 = vadd.f32 %v3954_v60, %v3939_v15  ;;  %4859 = vmatpush1.bf16.msra.mxu0 %v6467_v32  ;;  %v6473_v13 = vld [vmem:[#allocation11 + $0x100] ss:$16 sps:$4 sm:$0xff]  }
 0x54d   : > { %v8202_v14 = vadd.f32 %v3958_v1, %v3940_v62  ;;  %4860 = vmatprep.subr.bf16.mxu0 %v6475_v9  ;;  %v6476_v31 = vld [vmem:[#allocation11 + $0x300] ss:$16 sps:$4 sm:$0xff]   ;;  %v6490_v1 = vld [vmem:[#allocation11 + $0x344] ss:$16 sps:$4 sm:$0xff]  }
 0x54e   : > { %v3967_v34 = vadd.f32 %v8195_v63, %v8193_v61  ;;  %4898 = vmatpush1.bf16.msra.mxu1 %v6464_v28  ;;  %v6479_v25 = vld [vmem:[#allocation11 + $0x120] ss:$16 sps:$4 sm:$0xff]   ;;  %v4007_v28 = vrot.slane %v3994_v38, %v8797_v59  ;;  %v6566_v38 = vld [vmem:[#allocation11 + $0x2e8] ss:$16 sps:$4 sm:$0xff]  }
 0x54f   : > { %4899 = vmatprep.subr.bf16.mxu1 %v6472_v40  ;;  %v6482_v6 = vld [vmem:[#allocation11 + $0x320] ss:$16 sps:$4 sm:$0xff]  }
 0x550   : > { %v3968_v39 = vadd.f32 %v3967_v34, %v8198_v2  ;;  %4861 = vmatpush1.bf16.msra.mxu0 %v6473_v13  ;;  %v6488_v34 = vld [vmem:[#allocation11 + $0x340] ss:$16 sps:$4 sm:$0xff]  }
 0x551   : > { %4862 = vmatprep.subr.bf16.mxu0 %v6481_v17  ;;  %v4020_v5 = vld [vmem:[%s8799_s13] sm:$0xf] }
 0x552   : > { %v3969_v42 = vadd.f32 %v3968_v39, %v8202_v14  ;;  %4900 = vmatpush1.bf16.msra.mxu1 %v6470_v35  ;;  %v6496_v39 = vld [vmem:[#allocation11 + $0x364] ss:$16 sps:$4 sm:$0xff]   ;;  %v4029_v40 = vrot.slane %v4020_v5, %v8796_v52  ;;  %v4037_v32 = vrot.slane %v4020_v5, %v8798_v0  ;;  %v4025_v35 = vrot.slane %v4020_v5, %v8795_v45 }
 0x553   : > { %4901 = vmatprep.subr.bf16.mxu1 %v6478_v11  ;;  %v4033_v9 = vrot.slane %v4020_v5, %v8797_v59  ;;  %v6571_v5 = vld [vmem:[#allocation11 + $0x10c] ss:$16 sps:$4 sm:$0xff]  }
 0x554   : > { %3970 = vadd.xlane.f32.xlu0 %v3969_v42  ;;  %4863 = vmatpush1.bf16.msra.mxu0 %v6479_v25  ;;  %v6491_v42 = vld [vmem:[#allocation11 + $0x160] ss:$16 sps:$4 sm:$0xff]  }
 0x556   : > { %4902 = vmatpush1.bf16.msra.mxu1 %v6476_v31 }
 0x557   : > { %4903 = vmatprep.subr.bf16.mxu1 %v6484_v24 }
 0x55a   : > { %4904 = vmatpush1.bf16.msra.mxu1 %v6482_v6 }
 0x55b   : > { %4905 = vmatprep.subr.bf16.mxu1 %v6490_v1  ;;  %v6521_v1 = vld [vmem:[#allocation11 + $0x8] ss:$16 sps:$4 sm:$0xff]  }
 0x55e   : > { %4906 = vmatpush1.bf16.msra.mxu1 %v6488_v34  ;;  %v6532_v34 = vld [vmem:[#allocation11 + $0x22c] ss:$16 sps:$4 sm:$0xff]  }
 0x55f   : > { %4907 = vmatprep.subr.bf16.mxu1 %v6496_v39  ;;  %v6530_v39 = vld [vmem:[#allocation11 + $0x228] ss:$16 sps:$4 sm:$0xff]  }
 0x562   : > { %4908 = vmatpush1.bf16.msra.mxu1 %v6494_v20  ;;  %v6538_v20 = vld [vmem:[#allocation11 + $0x24c] ss:$16 sps:$4 sm:$0xff]  }
 0x563   : > { %4909 = vmatprep.subr.bf16.mxu1 %v6502_v47  ;;  %v6536_v47 = vld [vmem:[#allocation11 + $0x248] ss:$16 sps:$4 sm:$0xff]  }
 0x566   : > { %4910 = vmatpush1.bf16.msra.mxu1 %v6500_v49  ;;  %v6544_v49 = vld [vmem:[#allocation11 + $0x26c] ss:$16 sps:$4 sm:$0xff]  }
 0x567   : > { %4911 = vmatprep.subr.bf16.mxu1 %v6508_v51  ;;  %v6542_v51 = vld [vmem:[#allocation11 + $0x268] ss:$16 sps:$4 sm:$0xff]  }
 0x56a   : > { %4912 = vmatpush1.bf16.msra.mxu1 %v6506_v36  ;;  %v6550_v36 = vld [vmem:[#allocation11 + $0x28c] ss:$16 sps:$4 sm:$0xff]  }
 0x56b   : > { %4913 = vmatprep.subr.bf16.mxu1 %v6514_v29  ;;  %v6548_v29 = vld [vmem:[#allocation11 + $0x288] ss:$16 sps:$4 sm:$0xff]  }
 0x56e   : > { %4914 = vmatpush1.bf16.msra.mxu1 %v6512_v27  ;;  %v6556_v27 = vld [vmem:[#allocation11 + $0x2ac] ss:$16 sps:$4 sm:$0xff]  }
 0x56f   : > { %4915 = vmatprep.subr.bf16.mxu1 %v6520_v16  ;;  %v6554_v16 = vld [vmem:[#allocation11 + $0x2a8] ss:$16 sps:$4 sm:$0xff]  }
 0x572   : > { %4916 = vmatpush1.bf16.msra.mxu1 %v6518_v7  ;;  %v6562_v7 = vld [vmem:[#allocation11 + $0x2cc] ss:$16 sps:$4 sm:$0xff]  }
 0x573   : > { %4967 = vmatprep.subr.bf16.mxu1 %v6526_v4  ;;  %v6560_v4 = vld [vmem:[#allocation11 + $0x2c8] ss:$16 sps:$4 sm:$0xff]  }
 0x5e1   : > { %v3971_v19 = vpop.xlane.xlu0 %3970 }
 0x5e2   : > { %v3973_v53 = vmul.f32 0.001953125, %v3971_v19 }
 0x5e4   : > { %v8207_v55 = vsub.f32 %v8193_v61, %v3973_v53  ;;  %v8210_v33 = vsub.f32 %v8195_v63, %v3973_v53  ;;  %v8213_v56 = vsub.f32 %v8198_v2, %v3973_v53  ;;  %v8216_v57 = vsub.f32 %v8202_v14, %v3973_v53  ;;  %v6487_v63 = vld [vmem:[#allocation11 + $0x144] ss:$16 sps:$4 sm:$0xff]   ;;  %v6485_v2 = vld [vmem:[#allocation11 + $0x140] ss:$16 sps:$4 sm:$0xff]  }
 0x5e5   : > { %4864 = vmatprep.subr.bf16.mxu0 %v6487_v63  ;;  %v6493_v14 = vld [vmem:[#allocation11 + $0x164] ss:$16 sps:$4 sm:$0xff]  }
 0x5e6   : > { %v3978_v58 = vmul.f32 %v8207_v55, %v8207_v55  ;;  %v3979_v15 = vmul.f32 %v8210_v33, %v8210_v33  ;;  %v3980_v60 = vmul.f32 %v8213_v56, %v8213_v56  ;;  %v3981_v44 = vmul.f32 %v8216_v57, %v8216_v57  ;;  %4865 = vmatpush1.bf16.msra.mxu0 %v6485_v2 }
 0x5e7   : > { %4866 = vmatprep.subr.bf16.mxu0 %v6493_v14  ;;  %v6527_v14 = vld [vmem:[#allocation11 + $0x28] ss:$16 sps:$4 sm:$0xff]  }
 0x5e8   : > { %v3982_v54 = vadd.f32 %v3979_v15, %v3978_v58 }
 0x5ea   : > { %v3983_v61 = vadd.f32 %v3982_v54, %v3980_v60  ;;  %4867 = vmatpush1.bf16.msra.mxu0 %v6491_v42  ;;  %v6535_v42 = vld [vmem:[#allocation11 + $0x4c] ss:$16 sps:$4 sm:$0xff]  }
 0x5eb   : > { %4868 = vmatprep.subr.bf16.mxu0 %v6499_v46  ;;  %v6533_v46 = vld [vmem:[#allocation11 + $0x48] ss:$16 sps:$4 sm:$0xff]  }
 0x5ec   : > { %v3984_v62 = vadd.f32 %v3983_v61, %v3981_v44 }
 0x5ee   : > { %3985 = vadd.xlane.f32.xlu1 %v3984_v62  ;;  %4869 = vmatpush1.bf16.msra.mxu0 %v6497_v48  ;;  %v6541_v48 = vld [vmem:[#allocation11 + $0x6c] ss:$16 sps:$4 sm:$0xff]  }
 0x5ef   : > { %4870 = vmatprep.subr.bf16.mxu0 %v6505_v50  ;;  %v6539_v50 = vld [vmem:[#allocation11 + $0x68] ss:$16 sps:$4 sm:$0xff]  }
 0x5f2   : > { %4871 = vmatpush1.bf16.msra.mxu0 %v6503_v21  ;;  %v6547_v21 = vld [vmem:[#allocation11 + $0x8c] ss:$16 sps:$4 sm:$0xff]  }
 0x5f3   : > { %4872 = vmatprep.subr.bf16.mxu0 %v6511_v18  ;;  %v6545_v18 = vld [vmem:[#allocation11 + $0x88] ss:$16 sps:$4 sm:$0xff]  }
 0x5f6   : > { %4873 = vmatpush1.bf16.msra.mxu0 %v6509_v26  ;;  %v6553_v26 = vld [vmem:[#allocation11 + $0xac] ss:$16 sps:$4 sm:$0xff]  }
 0x5f7   : > { %4874 = vmatprep.subr.bf16.mxu0 %v6517_v30  ;;  %v6551_v30 = vld [vmem:[#allocation11 + $0xa8] ss:$16 sps:$4 sm:$0xff]  }
 0x5fa   : > { %4875 = vmatpush1.bf16.msra.mxu0 %v6515_v23  ;;  %v6559_v23 = vld [vmem:[#allocation11 + $0xcc] ss:$16 sps:$4 sm:$0xff]  }
 0x5fb   : > { %4926 = vmatprep.subr.bf16.mxu0 %v6523_v37  ;;  %v6557_v37 = vld [vmem:[#allocation11 + $0xc8] ss:$16 sps:$4 sm:$0xff]  }
 0x67b   : > { %v3986_v12 = vpop.xlane.xlu1 %3985 }
 0x67c   : > { %v3987_v43 = vmul.f32 0.001953125, %v3986_v12  ;;  %v6565_v12 = vld [vmem:[#allocation11 + $0xec] ss:$16 sps:$4 sm:$0xff]  }
 0x67e   : > { %v3988_v3 = vadd.f32 1e-05, %v3987_v43  ;;  %v6568_v43 = vld [vmem:[#allocation11 + $0x2ec] ss:$16 sps:$4 sm:$0xff]  }
 0x680   : > { %6627 = vrsqrt.f32 %v3988_v3  ;;  %v6563_v3 = vld [vmem:[#allocation11 + $0xe8] ss:$16 sps:$4 sm:$0xff]  }
 0x68a   : > { %v6628_v41 = vpop.eup %6627 }
 0x68b   : > { %v3991_v11 = vmul.f32 %v6628_v41, %v8210_v33  ;;  %v3993_v13 = vmul.f32 %v6628_v41, %v8216_v57  ;;  %v3990_v31 = vmul.f32 %v6628_v41, %v8207_v55  ;;  %v3992_v17 = vmul.f32 %v6628_v41, %v8213_v56  ;;  %v6524_v57 = vld [vmem:[#allocation11 + $0x208] ss:$16 sps:$4 sm:$0xff]   ;;  %v6529_v56 = vld [vmem:[#allocation11 + $0x2c] ss:$16 sps:$4 sm:$0xff]  }
 0x68c   : > { %v6580_v41 = vld [vmem:[#allocation11 + $0x32c] ss:$16 sps:$4 sm:$0xff]  }
 0x68d   : > { %v4017_v24 = vmul.f32 %v4003_v8, %v3991_v11  ;;  %v4019_v25 = vmul.f32 %v4011_v22, %v3993_v13  ;;  %v4016_v6 = vmul.f32 %v3999_v10, %v3990_v31  ;;  %v4018_v19 = vmul.f32 %v4007_v28, %v3992_v17  ;;  %v6574_v8 = vld [vmem:[#allocation11 + $0x30c] ss:$16 sps:$4 sm:$0xff]   ;;  %v6569_v22 = vld [vmem:[#allocation11 + $0x108] ss:$16 sps:$4 sm:$0xff]  }
 0x68e   : > { %v6572_v10 = vld [vmem:[#allocation11 + $0x308] ss:$16 sps:$4 sm:$0xff]   ;;  %v6577_v28 = vld [vmem:[#allocation11 + $0x12c] ss:$16 sps:$4 sm:$0xff]  }
 0x68f   : > { %v4043_v53 = vadd.f32 %v4029_v40, %v4017_v24  ;;  %v4045_v58 = vadd.f32 %v4037_v32, %v4019_v25  ;;  %v4042_v15 = vadd.f32 %v4025_v35, %v4016_v6  ;;  %v4044_v60 = vadd.f32 %v4033_v9, %v4018_v19  ;;  %v6575_v40 = vld [vmem:[#allocation11 + $0x128] ss:$16 sps:$4 sm:$0xff]   ;;  %v6583_v35 = vld [vmem:[#allocation11 + $0x14c] ss:$16 sps:$4 sm:$0xff]  }
 0x690   : > { %v6578_v32 = vld [vmem:[#allocation11 + $0x328] ss:$16 sps:$4 sm:$0xff]   ;;  %v6586_v9 = vld [vmem:[#allocation11 + $0x34c] ss:$16 sps:$4 sm:$0xff]  }
 0x691   : > { %v4047_v54 = vmax.f32 %v4043_v53, 0.0  ;;  %v4049_v44 = vmax.f32 %v4045_v58, 0.0  ;;  %v4046_v61 = vmax.f32 %v4042_v15, 0.0  ;;  %v4048_v62 = vmax.f32 %v4044_v60, 0.0  ;;  %v6581_v11 = vld [vmem:[#allocation11 + $0x148] ss:$16 sps:$4 sm:$0xff]  }
 0x692   : > { %v6584_v13 = vld [vmem:[#allocation11 + $0x348] ss:$16 sps:$4 sm:$0xff]   ;;  %v6589_v31 = vld [vmem:[#allocation11 + $0x16c] ss:$16 sps:$4 sm:$0xff]  }
 0x693   : > { %v4051_v63 = vpack.c.bf16 %v4047_v54, %v4047_v54  ;;  %v4053_v33 = vpack.c.bf16 %v4049_v44, %v4049_v44  ;;  %v8244_v2 = vpack.c.bf16 %v4046_v61, %v4046_v61  ;;  %v8246_v55 = vpack.c.bf16 %v4048_v62, %v4048_v62  ;;  %v6592_v17 = vld [vmem:[#allocation11 + $0x36c] ss:$16 sps:$4 sm:$0xff]   ;;  %v6587_v24 = vld [vmem:[#allocation11 + $0x168] ss:$16 sps:$4 sm:$0xff]  }
 0x694   : > { %v6590_v25 = vld [vmem:[#allocation11 + $0x368] ss:$16 sps:$4 sm:$0xff]   ;;  %v6595_v6 = vld [vmem:[#allocation11 + $0x18c] ss:$16 sps:$4 sm:$0xff]  }
 0x695   : > { %4876 = vmatprep.mubr.bf16.mxu0 %v4051_v63  ;;  %4917 = vmatprep.mubr.bf16.mxu1 %v4053_v33  ;;  %v6598_v19 = vld [vmem:[#allocation11 + $0x38c] ss:$16 sps:$4 sm:$0xff]   ;;  %v6593_v53 = vld [vmem:[#allocation11 + $0x188] ss:$16 sps:$4 sm:$0xff]  }
 0x696   : > { %4877 = vmatmul.mubr.bf16.vlgmr.msra.gmra.mrb[24].mxu0 %v8244_v2  ;;  %4918 = vmatmul.mubr.bf16.vlgmr.msra.gmra.mrb[24].mxu1 %v8246_v55  ;;  %v6596_v58 = vld [vmem:[#allocation11 + $0x388] ss:$16 sps:$4 sm:$0xff]   ;;  %v6601_v15 = vld [vmem:[#allocation11 + $0x1ac] ss:$16 sps:$4 sm:$0xff]  }
 0x697   : > { %4927 = vmatpush1.bf16.msra.mxu0 %v6521_v1  ;;  %4968 = vmatpush1.bf16.msra.mxu1 %v6524_v57  ;;  %v6604_v60 = vld [vmem:[#allocation11 + $0x3ac] ss:$16 sps:$4 sm:$0xff]   ;;  %v6599_v54 = vld [vmem:[#allocation11 + $0x1a8] ss:$16 sps:$4 sm:$0xff]  }
 0x698   : > { %4958 = vmatprep.mubr.bf16.mxu0 %v4051_v63  ;;  %4999 = vmatprep.mubr.bf16.mxu1 %v4053_v33  ;;  %v6602_v44 = vld [vmem:[#allocation11 + $0x3a8] ss:$16 sps:$4 sm:$0xff]   ;;  %v6607_v61 = vld [vmem:[#allocation11 + $0x1cc] ss:$16 sps:$4 sm:$0xff]  }
 0x699   : > { %4928 = vmatprep.subr.bf16.mxu0 %v6529_v56  ;;  %4969 = vmatprep.subr.bf16.mxu1 %v6532_v34  ;;  %v6610_v62 = vld [vmem:[#allocation11 + $0x3cc] ss:$16 sps:$4 sm:$0xff]   ;;  %v6605_v63 = vld [vmem:[#allocation11 + $0x1c8] ss:$16 sps:$4 sm:$0xff]  }
 0x69a   : > { %v6608_v33 = vld [vmem:[#allocation11 + $0x3c8] ss:$16 sps:$4 sm:$0xff]   ;;  %v6613_v1 = vld [vmem:[#allocation11 + $0x1ec] ss:$16 sps:$4 sm:$0xff]  }
 0x69b   : > { %4929 = vmatpush1.bf16.msra.mxu0 %v6527_v14  ;;  %4970 = vmatpush1.bf16.msra.mxu1 %v6530_v39  ;;  %v6616_v57 = vld [vmem:[#allocation11 + $0x3ec] ss:$16 sps:$4 sm:$0xff]   ;;  %v6611_v56 = vld [vmem:[#allocation11 + $0x1e8] ss:$16 sps:$4 sm:$0xff]   ;;  %v4182_v14 = vld [vmem:[%s8800_s24] sm:$0xf] }
 0x69c   : > { %4930 = vmatprep.subr.bf16.mxu0 %v6535_v42  ;;  %4971 = vmatprep.subr.bf16.mxu1 %v6538_v20  ;;  %v6614_v34 = vld [vmem:[#allocation11 + $0x3e8] ss:$16 sps:$4 sm:$0xff]   ;;  %v4187_v39 = vrot.slane %v4182_v14, %v8795_v45  ;;  %v4191_v42 = vrot.slane %v4182_v14, %v8796_v52  ;;  %v4195_v52 = vrot.slane %v4182_v14, %v8797_v59 }
 0x69f   : > { %4931 = vmatpush1.bf16.msra.mxu0 %v6533_v46  ;;  %4972 = vmatpush1.bf16.msra.mxu1 %v6536_v47 }
 0x6a0   : > { %4932 = vmatprep.subr.bf16.mxu0 %v6541_v48  ;;  %4973 = vmatprep.subr.bf16.mxu1 %v6544_v49 }
 0x6a3   : > { %4933 = vmatpush1.bf16.msra.mxu0 %v6539_v50  ;;  %4974 = vmatpush1.bf16.msra.mxu1 %v6542_v51 }
 0x6a4   : > { %4934 = vmatprep.subr.bf16.mxu0 %v6547_v21  ;;  %4975 = vmatprep.subr.bf16.mxu1 %v6550_v36 }
 0x6a7   : > { %4935 = vmatpush1.bf16.msra.mxu0 %v6545_v18  ;;  %4976 = vmatpush1.bf16.msra.mxu1 %v6548_v29  ;;  %v6757_v29 = vld [vmem:[%s7355_s27] sm:$0xff] }
 0x6a8   : > { %4936 = vmatprep.subr.bf16.mxu0 %v6553_v26  ;;  %4977 = vmatprep.subr.bf16.mxu1 %v6556_v27  ;;  %v6758_v27 = vld [vmem:[%s7355_s27 + $0x8] sm:$0xff] }
 0x6ab   : > { %4937 = vmatpush1.bf16.msra.mxu0 %v6551_v30  ;;  %4978 = vmatpush1.bf16.msra.mxu1 %v6554_v16  ;;  %v4199_v30 = vrot.slane %v4182_v14, %v8798_v0  ;;  %v6760_v0 = vld [vmem:[%s7355_s27 + $0x18] sm:$0xff] }
 0x6ac   : > { %4938 = vmatprep.subr.bf16.mxu0 %v6559_v23  ;;  %4979 = vmatprep.subr.bf16.mxu1 %v6562_v7 }
 0x6af   : > { %4939 = vmatpush1.bf16.msra.mxu0 %v6557_v37  ;;  %4980 = vmatpush1.bf16.msra.mxu1 %v6560_v4 }
 0x6b0   : > { %4940 = vmatprep.subr.bf16.mxu0 %v6565_v12  ;;  %4981 = vmatprep.subr.bf16.mxu1 %v6568_v43 }
 0x6b3   : > { %4941 = vmatpush1.bf16.msra.mxu0 %v6563_v3  ;;  %4982 = vmatpush1.bf16.msra.mxu1 %v6566_v38 }
 0x6b4   : > { %4942 = vmatprep.subr.bf16.mxu0 %v6571_v5  ;;  %4983 = vmatprep.subr.bf16.mxu1 %v6574_v8 }
 0x6b7   : > { %4943 = vmatpush1.bf16.msra.mxu0 %v6569_v22  ;;  %4984 = vmatpush1.bf16.msra.mxu1 %v6572_v10  ;;  %v6759_v22 = vld [vmem:[%s7355_s27 + $0x10] sm:$0xff]  ;;  %s7025_s27 = smov [#allocation13]  }
 0x6b8   : > { %4944 = vmatprep.subr.bf16.mxu0 %v6577_v28  ;;  %4985 = vmatprep.subr.bf16.mxu1 %v6580_v41  ;;  %s6937_s2 = sshll.u32 %s7025_s27, 4  ;;  %s6938_s2 = int_to_ptr.vmem [resolvable:$false] %s6937_s2 }
 0x6b9   : > { %s6939_s15 = scalar_lea.vmem %s6938_s2, 1024  ;;  %p6940_p5 = scmp.lt.s32.totalorder %s8271_s25, %s6938_s2 }
 0x6ba   : > { %p6941_p7 = scmp.lt.s32.totalorder %s6939_s15, %s6933_s23 }
 0x6bb   : > { %4945 = vmatpush1.bf16.msra.mxu0 %v6575_v40  ;;  %4986 = vmatpush1.bf16.msra.mxu1 %v6578_v32 }
 0x6bc   : > { %4946 = vmatprep.subr.bf16.mxu0 %v6583_v35  ;;  %4987 = vmatprep.subr.bf16.mxu1 %v6586_v9  ;;  %p6942_p8 = por %p6941_p7, %p6940_p5 }
 0x6be   : > { %p6943_p6 = pnand %p6942_p8, %p6936_p10 }
 0x6bf   : > { %4947 = vmatpush1.bf16.msra.mxu0 %v6581_v11  ;;  %4988 = vmatpush1.bf16.msra.mxu1 %v6584_v13 }
 0x6c0   : > { %4948 = vmatprep.subr.bf16.mxu0 %v6589_v31  ;;  %4989 = vmatprep.subr.bf16.mxu1 %v6592_v17 }
 0x6c3   : > { %4949 = vmatpush1.bf16.msra.mxu0 %v6587_v24  ;;  %4990 = vmatpush1.bf16.msra.mxu1 %v6590_v25 }
 0x6c4   : > { %4950 = vmatprep.subr.bf16.mxu0 %v6595_v6  ;;  %4991 = vmatprep.subr.bf16.mxu1 %v6598_v19 }
 0x6c7   : > { %4951 = vmatpush1.bf16.msra.mxu0 %v6593_v53  ;;  %4992 = vmatpush1.bf16.msra.mxu1 %v6596_v58 }
 0x6c8   : > { %4952 = vmatprep.subr.bf16.mxu0 %v6601_v15  ;;  %4993 = vmatprep.subr.bf16.mxu1 %v6604_v60 }
 0x6cb   : > { %4953 = vmatpush1.bf16.msra.mxu0 %v6599_v54  ;;  %4994 = vmatpush1.bf16.msra.mxu1 %v6602_v44 }
 0x6cc   : > { %4954 = vmatprep.subr.bf16.mxu0 %v6607_v61  ;;  %4995 = vmatprep.subr.bf16.mxu1 %v6610_v62 }
 0x6cf   : > { %4955 = vmatpush1.bf16.msra.mxu0 %v6605_v63  ;;  %4996 = vmatpush1.bf16.msra.mxu1 %v6608_v33 }
 0x6d0   : > { %4956 = vmatprep.subr.bf16.mxu0 %v6613_v1  ;;  %4997 = vmatprep.subr.bf16.mxu1 %v6616_v57 }
 0x6d3   : > { %4957 = vmatpush1.bf16.msra.mxu0 %v6611_v56  ;;  %4998 = vmatpush1.bf16.msra.mxu1 %v6614_v34 }
 0x6d6   : > { %4959 = vmatmul.mubr.bf16.vlgmr.msra.gmra.mrb[28].mxu0 %v8244_v2  ;;  %5000 = vmatmul.mubr.bf16.vlgmr.msra.gmra.mrb[28].mxu1 %v8246_v55 }
 0x769   : > { %v4878_v20 = vpop.f32.mrb[24].mxu0  ;;  %v4919_v46 = vpop.f32.mrb[24].mxu1 }
 0x76a   : > { %v4879_v47 = vadd.f32 %v4878_v20, %v4187_v39  ;;  %v4880_v48 = vpop.f32.mrb[25].mxu0  ;;  %v4921_v49 = vpop.f32.mrb[25].mxu1 }
 0x76b   : > { %v4881_v50 = vadd.f32 %v4880_v48, %v4191_v42  ;;  %v4882_v2 = vpop.f32.mrb[26].mxu0  ;;  %v4923_v51 = vpop.f32.mrb[26].mxu1 }
 0x76c   : > { %v4920_v55 = vadd.f32 %v4919_v46, %v4879_v47  ;;  %v4883_v21 = vpop.f32.mrb[27].mxu0  ;;  %v4924_v36 = vpop.f32.mrb[27].mxu1 }
 0x76d   : > { %v4922_v18 = vadd.f32 %v4921_v49, %v4881_v50 }
 0x76e   : > { %v5008_v26 = vadd.f32 %v6757_v29, %v4920_v55 }
 0x76f   : > { %v5009_v45 = vadd.f32 %v6758_v27, %v4922_v18 }
 0x770   : > { %5012 = vst [vmem:[%s498_s10] sm:$0xff] %v5008_v26 }
 0x771   : > { %5013 = vst [vmem:[%s498_s10 + $0x8] sm:$0xff] %v5009_v45 }
 0x7a9   : > { %v4960_v16 = vpop.f32.mrb[28].mxu0  ;;  %v5001_v23 = vpop.f32.mrb[28].mxu1 }
 0x7aa   : > { %v4961_v7 = vadd.f32 %v4960_v16, %v4195_v52  ;;  %v4962_v37 = vpop.f32.mrb[29].mxu0  ;;  %v5003_v4 = vpop.f32.mrb[29].mxu1 }
 0x7ab   : > { %v4963_v12 = vadd.f32 %v4962_v37, %v4199_v30  ;;  %v4964_v43 = vpop.f32.mrb[30].mxu0  ;;  %v5005_v3 = vpop.f32.mrb[30].mxu1 }
 0x7ac   : > { %v5002_v38 = vadd.f32 %v5001_v23, %v4961_v7  ;;  %v4965_v5 = vpop.f32.mrb[31].mxu0  ;;  %v5006_v8 = vpop.f32.mrb[31].mxu1 }
 0x7ad   : > { %v5004_v59 = vadd.f32 %v5003_v4, %v4963_v12 }
 0x7ae   : > { %v5010_v10 = vadd.f32 %v6759_v22, %v5002_v38 }
 0x7af   : > { %v5011_v28 = vadd.f32 %v6760_v0, %v5004_v59 }
 0x7b0   : > { %5014 = vst [vmem:[%s498_s10 + $0x10] sm:$0xff] %v5010_v10 }
 0x7b1   : > { %5015 = vst [vmem:[%s498_s10 + $0x18] sm:$0xff] %v5011_v28 }
 0x7b2   : > { %6946 = shalt.err (!%p6943_p6)
}
 0x7b3   : > { %s6947_s5 = scalar_lea.hbm %s8269_s12, 512  ;;  %s6951_s22 = scalar_lea.hbm %s8801_s26, 1024 }
 0x7b4   : > { %p6948_p11 = scmp.ne.s32.totalorder %s8269_s12, %s6947_s5  ;;  %p6952_p12 = scmp.lt.u32.totalorder %s8269_s12, %s8801_s26 }
 0x7b5   : > { %p6953_p3 = scmp.lt.u32.totalorder %s6951_s22, %s6947_s5  ;;  %p6955_p0 = scmp.lt.u32.totalorder %s6947_s5, %s8269_s12 }
 0x7b6   : > { %p6949_p1 = pnand %p6948_p11, %p8802_p2 }
 0x7b7   : > { %p6954_p13 = por %p6953_p3, %p6952_p12 }
 0x7b8   : > { %p6950_p9 = pneg %p6949_p1 }
 0x7b9   : > { %p6956_p4 = por %p6955_p0, %p6954_p13 }
 0x7bb   : > { %p6957_p10 = pnand %p6956_p4, %p6950_p9 }
 0x7bd   : > { %6960 = shalt.err (!%p6957_p10)
}
 0x7be   : > { %5775 = dma.vmem_to_hbm [thread:$0]  (%p8802_p2), %s8271_s25, 512, %s8269_s12, %s5017_s28  }
 0x7bf PF: > { %s5043_s10 = sand.u32 1, %s7003_s17   ;;  %p8803_p5 = scmp.ne.s32.totalorder %s8528_s21, 0 }
 0x7c0   : > { %p8804_p7 = scmp.ge.s32.totalorder %s7015_s20, 2  ;;  %s5044_s4 = scalar_lea.sflag [#allocation4], %s5043_s10 }
 0x7c2   : > { %p5798_p8 = pnand %p8804_p7, %p8803_p5 }
 0x7c4   : > { %6998 = dma.done.wait (!%p5798_p8), %s5044_s4, 512  }
 0x7c5   : > { %7000 = vsyncadd (!%p5798_p8), %s5044_s4, 4294966784  ;;  %p29_p6 = scmp.ge.s32.totalorder %s7238_s16, 4   ;;  %s8805_s17 = smov %s7007_s18 }
 0x7c6   : > { %s8806_s18 = smov %s7011_s19  ;;  %s8807_s19 = smov %s7249_s14 }
 0x7c7   : > { %s8808_s20 = smov %s7238_s16  ;;  %31 = sbr.rel (!%p29_p6) target bundleno = 17 (0x11), region = 138 }
 0x7ce   :  { %5049 = vsyncpa [#allocation3], 1 }
 0x7cf   :  { %5051 = vsyncpa [#allocation3 + $0x1], 1 }
 0x7d0   :  { %5052 = vsyncpa [#allocation6], 1 }
 0x7d1   :  { %5054 = vsyncpa [#allocation6 + $0x1], 1 }
 0x7d2   :  { %5055 = vsyncpa [#allocation9], 1 }
 0x7d3   :  { %5056 = vsyncpa [#allocation12], 1 }
 0x7d4   :  { %5057 = vsyncpa [#allocation4], 1 }
 0x7d5   :  { %5059 = vsyncpa [#allocation4 + $0x1], 1 }

</bundles_post_ra>
